<compile_context>
chip_gen: v7x
topology: tpu7x:2x2x1
jax: 0.10.0
libtpu: 0.0.40
codegen_flags: <defaults>
</compile_context>

<pallas_src>
import functools
import math

import jax
import jax.numpy as jnp
from jax.experimental import pallas as pl
from jax.experimental.pallas import tpu as pltpu


# ----------------------------------------------------------------------------
# Pallas kernels: fused (patches @ W) + bias [+ residual] [+ ReLU]
# ----------------------------------------------------------------------------
def _mm_bias_kernel(x_ref, w_ref, b_ref, o_ref, *, relu):
    # x_ref: (TM, K) bf16, w_ref: (K, N) bf16 (BN scale folded), b_ref: (1, N) f32
    acc = jnp.dot(x_ref[...], w_ref[...], preferred_element_type=jnp.float32)
    y = acc + b_ref[...]
    if relu:
        y = jnp.maximum(y, 0.0)
    o_ref[...] = y.astype(o_ref.dtype)


def _mm_bias_res_relu_kernel(x_ref, w_ref, b_ref, r_ref, o_ref):
    # Deconv epilogue: bias + residual + ReLU fused after the MXU matmul.
    acc = jnp.dot(x_ref[...], w_ref[...], preferred_element_type=jnp.float32)
    y = acc + b_ref[...] + r_ref[...].astype(jnp.float32)
    o_ref[...] = jnp.maximum(y, 0.0).astype(o_ref.dtype)


def _ceil_to(x, m):
    return -(-x // m) * m


def _choose_tm(m):
    # Multiple of 16 rows (bf16 sublane packing), at least 2 grid steps where
    # possible (keeps both v7x TensorCores busy and enables DMA/compute
    # pipelining), capped at 1024 rows to stay well inside every generation's
    # VMEM (x tile <= ~1 MiB at K<=512).
    half = -(-m // 2)
    tm = min(1024, _ceil_to(half, 16))
    return min(tm, _ceil_to(m, 16))


def fused_matmul_bn(patches, w_mat, bias, residual=None, relu=False,
                    out_dtype=jnp.bfloat16):
    """out = relu_opt(patches @ w_mat + bias [+ residual]).

    patches : (M, K) activation patches, bf16
    w_mat   : (K, N) weights with BN scale pre-folded (cast to bf16)
    bias    : (N,)   folded BN bias, f32, added to the f32 accumulator
    residual: (M, N) optional bf16 tensor fused into the epilogue (implies ReLU)
    """
    M, K = patches.shape
    N = w_mat.shape[1]
    TM = _choose_tm(M)
    grid = (pl.cdiv(M, TM),)

    x = patches.astype(jnp.bfloat16)
    w = w_mat.astype(jnp.bfloat16)
    b = bias.reshape(1, N).astype(jnp.float32)

    in_specs = [
        pl.BlockSpec((TM, K), lambda i: (i, 0)),
        pl.BlockSpec((K, N), lambda i: (0, 0)),
        pl.BlockSpec((1, N), lambda i: (0, 0)),
    ]
    args = [x, w, b]
    out_itemsize = jnp.dtype(out_dtype).itemsize
    bytes_accessed = M * K * 2 + K * N * 2 + N * 4 + M * N * out_itemsize
    if residual is not None:
        r = residual.astype(jnp.bfloat16)
        in_specs.append(pl.BlockSpec((TM, N), lambda i: (i, 0)))
        args.append(r)
        bytes_accessed += M * N * 2
        kernel = _mm_bias_res_relu_kernel
    else:
        kernel = functools.partial(_mm_bias_kernel, relu=relu)

    return pl.pallas_call(
        kernel,
        out_shape=jax.ShapeDtypeStruct((M, N), out_dtype),
        grid=grid,
        in_specs=in_specs,
        out_specs=pl.BlockSpec((TM, N), lambda i: (i, 0)),
        compiler_params=pltpu.CompilerParams(
            dimension_semantics=("parallel",),
            vmem_limit_bytes=48 * 1024 * 1024,
        ),
        cost_estimate=pl.CostEstimate(
            flops=2 * M * K * N,
            transcendentals=0,
            bytes_accessed=bytes_accessed,
        ),
    )(*args)


# ----------------------------------------------------------------------------
# Glue: im2col / weight layout / BN folding (plain JAX, data movement only)
# ----------------------------------------------------------------------------
def im2col_3d(x, ksizes, strides, pads):
    """x: (N,D,H,W,C) bf16 -> (N*Do*Ho*Wo, kd*kh*kw*C), column order (kd,kh,kw,C)."""
    n, d, h, w, c = x.shape
    kd_, kh_, kw_ = ksizes
    sd, sh, sw = strides
    (pd0, pd1), (ph0, ph1), (pw0, pw1) = pads
    xp = jnp.pad(x, ((0, 0), (pd0, pd1), (ph0, ph1), (pw0, pw1), (0, 0)))
    do = (d + pd0 + pd1 - kd_) // sd + 1
    ho = (h + ph0 + ph1 - kh_) // sh + 1
    wo = (w + pw0 + pw1 - kw_) // sw + 1
    cols = []
    for kd in range(kd_):
        for kh in range(kh_):
            for kw in range(kw_):
                cols.append(
                    xp[:, kd:kd + do * sd:sd,
                          kh:kh + ho * sh:sh,
                          kw:kw + wo * sw:sw, :])
    # TODO(synk): fold this tap loop into the Pallas grid (reduction axis over
    # taps + VMEM accumulator, input indexed via tap offsets in the index_map)
    # so the k^3-expanded patch matrix is never materialized in HBM; done in
    # plain JAX here with bf16 patches (halves its HBM traffic).
    patches = jnp.concatenate(cols, axis=-1)
    return patches.reshape(n * do * ho * wo, kd_ * kh_ * kw_ * c), (n, do, ho, wo)


def conv_w_to_mat(w):
    """torch Conv3d weight (Cout, Cin, kd, kh, kw) -> (kd*kh*kw*Cin, Cout)."""
    cout = w.shape[0]
    return jnp.transpose(w, (2, 3, 4, 1, 0)).reshape(-1, cout)


def bn_fold(gamma, beta, mean, var, eps=1e-5):
    scale = gamma / jnp.sqrt(var + eps)
    bias = beta - mean * scale
    return scale, bias


# ----------------------------------------------------------------------------
# Layer helpers
# ----------------------------------------------------------------------------
def conv_bn(x, w_t, scale, bias, stride, pad, relu, out_dtype=jnp.bfloat16):
    """convbn_3d (+ optional ReLU). x: NDHWC bf16, w_t in torch layout."""
    cout, _, k, _, _ = w_t.shape
    patches, (n, do, ho, wo) = im2col_3d(
        x, (k, k, k), (stride,) * 3, ((pad, pad),) * 3)
    w_mat = conv_w_to_mat(w_t) * scale[None, :]      # fold BN scale into weights
    out = fused_matmul_bn(patches, w_mat, bias, relu=relu, out_dtype=out_dtype)
    return out.reshape(n, do, ho, wo, cout)


def _merged_deconv_weight(w_t, scale):
    """ConvTranspose3d(k=3,s=2,p=1,out_p=1) sub-pixel weights merged over the
    8 output parity phases: (8*Cin, 8*Cout), BN scale folded into columns.

    Output index o = 2*i - 1 + k.  Per axis, for parity r and window offset o
    in {0,1}: (r=0,o=0)->tap 1, (r=1,o=0)->tap 2, (r=1,o=1)->tap 0, (r=0,o=1)
    contributes nothing (zero weight)."""
    cin, cout = w_t.shape[0], w_t.shape[1]
    tap = {(0, 0): 1, (1, 0): 2, (1, 1): 0}
    zero = jnp.zeros((cin, cout), w_t.dtype)
    rows = []
    for od in (0, 1):
        for oh in (0, 1):
            for ow in (0, 1):
                cols = []
                for rd in (0, 1):
                    for rh in (0, 1):
                        for rw in (0, 1):
                            kd = tap.get((rd, od))
                            kh = tap.get((rh, oh))
                            kw = tap.get((rw, ow))
                            if kd is None or kh is None or kw is None:
                                cols.append(zero)
                            else:
                                cols.append(w_t[:, :, kd, kh, kw])
                rows.append(jnp.concatenate(cols, axis=1))   # (Cin, 8*Cout)
    w_mat = jnp.concatenate(rows, axis=0)                    # (8*Cin, 8*Cout)
    return w_mat * jnp.tile(scale, 8)[None, :]


def deconv_bn_add_relu(x, w_t, scale, bias, residual, out_dtype=jnp.bfloat16):
    """relu(BN(ConvTranspose3d(x; k=3,s=2,p=1,out_p=1,bias=False)) + residual).

    All 8 output parity phases are computed by ONE lane-dense Pallas matmul:
    im2col with the union (2,2,2) window (K = 8*Cin), weight (8*Cin, 8*Cout)
    with zeros for unused taps, residual pre-interleaved to (M, 8*Cout);
    bias + residual + ReLU fused into the epilogue.
    """
    n, d, h, w, cin = x.shape
    cout = w_t.shape[1]
    # Union window, stride 1, zero pad at the high end of each axis (covers the
    # out-of-range tap of the last odd output position).
    patches, _ = im2col_3d(x, (2, 2, 2), (1, 1, 1), ((0, 1), (0, 1), (0, 1)))
    w_mat = _merged_deconv_weight(w_t, scale)
    bias_m = jnp.tile(bias, 8)
    # residual (N, 2d, 2h, 2w, Cout) -> (M, 8*Cout), phase-major columns.
    r = residual.reshape(n, d, 2, h, 2, w, 2, cout)
    r = jnp.transpose(r, (0, 1, 3, 5, 2, 4, 6, 7)).reshape(n * d * h * w, 8 * cout)

    out = fused_matmul_bn(patches, w_mat, bias_m, residual=r, relu=True,
                          out_dtype=out_dtype)
    out = out.reshape(n, d, h, w, 2, 2, 2, cout)
    out = jnp.transpose(out, (0, 1, 4, 2, 5, 3, 6, 7))
    return out.reshape(n, 2 * d, 2 * h, 2 * w, cout)


# ----------------------------------------------------------------------------
# Parameters (deterministic synthetic init; inference-mode BN, folded)
# ----------------------------------------------------------------------------
def init_params(key, c):
    keys = jax.random.split(key, 64)
    ki = iter(keys)

    def conv_w(cin, cout, k):
        fan = cin * k ** 3
        return jax.random.normal(next(ki), (cout, cin, k, k, k),
                                 jnp.float32) / math.sqrt(fan)

    def deconv_w(cin, cout, k=3):
        fan = cin * k ** 3
        return jax.random.normal(next(ki), (cin, cout, k, k, k),
                                 jnp.float32) / math.sqrt(fan)

    def bn(cout):
        g = 1.0 + 0.1 * jax.random.normal(next(ki), (cout,), jnp.float32)
        b = 0.1 * jax.random.normal(next(ki), (cout,), jnp.float32)
        m = 0.05 * jax.random.normal(next(ki), (cout,), jnp.float32)
        v = 1.0 + 0.1 * jnp.abs(jax.random.normal(next(ki), (cout,), jnp.float32))
        return bn_fold(g, b, m, v)

    p = {}
    p['w1'] = conv_w(c, 2 * c, 3);      p['s1'], p['b1'] = bn(2 * c)
    p['w2'] = conv_w(2 * c, 2 * c, 3);  p['s2'], p['b2'] = bn(2 * c)
    p['w3'] = conv_w(2 * c, 4 * c, 3);  p['s3'], p['b3'] = bn(4 * c)
    p['w4'] = conv_w(4 * c, 4 * c, 3);  p['s4'], p['b4'] = bn(4 * c)
    p['w5'] = deconv_w(4 * c, 2 * c);   p['s5'], p['b5'] = bn(2 * c)
    p['w6'] = deconv_w(2 * c, c);       p['s6'], p['b6'] = bn(c)
    p['wr1'] = conv_w(c, c, 1);         p['sr1'], p['br1'] = bn(c)
    p['wr2'] = conv_w(2 * c, 2 * c, 1); p['sr2'], p['br2'] = bn(2 * c)
    return p


# ----------------------------------------------------------------------------
# hourglass forward
# ----------------------------------------------------------------------------
def hourglass_forward(x_ncdhw, p):
    # PyTorch NCDHW -> NDHWC, cast once to bf16 so im2col + intermediates are
    # all 2-byte; back to NCDHW (f32) at the end.
    x = jnp.transpose(x_ncdhw, (0, 2, 3, 4, 1)).astype(jnp.bfloat16)

    c1 = conv_bn(x,  p['w1'], p['s1'], p['b1'], stride=2, pad=1, relu=True)
    c2 = conv_bn(c1, p['w2'], p['s2'], p['b2'], stride=1, pad=1, relu=True)
    c3 = conv_bn(c2, p['w3'], p['s3'], p['b3'], stride=2, pad=1, relu=True)
    c4 = conv_bn(c3, p['w4'], p['s4'], p['b4'], stride=1, pad=1, relu=True)

    r2 = conv_bn(c2, p['wr2'], p['sr2'], p['br2'], stride=1, pad=0, relu=False)
    c5 = deconv_bn_add_relu(c4, p['w5'], p['s5'], p['b5'], r2)

    r1 = conv_bn(x, p['wr1'], p['sr1'], p['br1'], stride=1, pad=0, relu=False)
    c6 = deconv_bn_add_relu(c5, p['w6'], p['s6'], p['b6'], r1,
                            out_dtype=jnp.float32)   # network output stays f32

    return jnp.transpose(c6, (0, 4, 1, 2, 3))  # back to NCDHW


if __name__ == "__main__":
    key = jax.random.PRNGKey(0)
    kx, kp = jax.random.split(key)

    in_channels = 4
    N, D, H, W = 2, 8, 16, 16  # D, H, W divisible by 4 (two stride-2 stages)
    x = jax.random.normal(kx, (N, in_channels, D, H, W), jnp.float32)
    params = init_params(kp, in_channels)

    fwd = jax.jit(hourglass_forward)
    out = fwd(x, params)
    out = jax.block_until_ready(out)
    assert out.shape == (N, in_channels, D, H, W), out.shape
    assert out.dtype == jnp.float32
    print("KERNEL_OK")
</pallas_src>

<mosaic_0001>
module attributes {stable_mosaic.version = 11 : i64} {
  func.func @_mm_bias_kernel(%arg0: i32, %arg1: memref<256x108xbf16, #tpu.memory_space<vmem>>, %arg2: memref<108x8xbf16, #tpu.memory_space<vmem>>, %arg3: memref<1x8xf32, #tpu.memory_space<vmem>>, %arg4: memref<256x8xbf16, #tpu.memory_space<vmem>>) attributes {dimension_semantics = [#tpu.dimension_semantics<parallel>], iteration_bounds = array<i64: 2>, scalar_prefetch = 0 : i64, scratch_operands = 0 : i64, tpu.core_type = #tpu.core_type<tc>, window_params = [{transform_indices = @transform_0, window_bounds = array<i64: 256, 108>}, {pipeline_mode = #tpu.pipeline_mode<synchronous>, transform_indices = @transform_1, window_bounds = array<i64: 108, 8>}, {pipeline_mode = #tpu.pipeline_mode<synchronous>, transform_indices = @transform_2, window_bounds = array<i64: 1, 8>}, {transform_indices = @transform_3, window_bounds = array<i64: 256, 8>}]} {
    %c0 = arith.constant 0 : index
    %c0_0 = arith.constant 0 : index
    %0 = vector.load %arg1[%c0, %c0_0] : memref<256x108xbf16, #tpu.memory_space<vmem>>, vector<256x108xbf16>
    %c0_1 = arith.constant 0 : index
    %c0_2 = arith.constant 0 : index
    %1 = vector.load %arg2[%c0_1, %c0_2] : memref<108x8xbf16, #tpu.memory_space<vmem>>, vector<108x8xbf16>
    %cst = arith.constant dense<0.000000e+00> : vector<256x8xf32>
    %2 = tpu.matmul %0, %1, %cst {dimension_numbers = #tpu.dot_dimension_numbers<[1], [0], [0], [1], [0, 0, 1, 1], [], []>} : vector<256x108xbf16>, vector<108x8xbf16>, vector<256x8xf32> -> vector<256x8xf32>
    %c0_3 = arith.constant 0 : index
    %c0_4 = arith.constant 0 : index
    %3 = vector.load %arg3[%c0_3, %c0_4] : memref<1x8xf32, #tpu.memory_space<vmem>>, vector<1x8xf32>
    %4 = vector.broadcast %3 : vector<1x8xf32> to vector<256x8xf32>
    %5 = arith.addf %2, %4 : vector<256x8xf32>
    %cst_5 = arith.constant 0.000000e+00 : f32
    %6 = vector.broadcast %cst_5 : f32 to vector<256x8xf32>
    %7 = arith.maximumf %5, %6 : vector<256x8xf32>
    %8 = arith.truncf %7 : vector<256x8xf32> to vector<256x8xbf16>
    %c0_6 = arith.constant 0 : index
    %c0_7 = arith.constant 0 : index
    %9 = vector.load %arg4[%c0_6, %c0_7] : memref<256x8xbf16, #tpu.memory_space<vmem>>, vector<256x8xbf16>
    tpu.vector_store %arg4[%c0_6, %c0_7], %8 {strides = array<i32>} : memref<256x8xbf16, #tpu.memory_space<vmem>>, vector<256x8xbf16>,
    return
  }
  func.func @transform_0(%arg0: i32) -> (i32, i32) {
    %c0_i32 = arith.constant 0 : i32
    %c0_i32_0 = arith.constant 0 : i32
    return %arg0, %c0_i32 : i32, i32
  }
  func.func @transform_1(%arg0: i32) -> (i32, i32) {
    %c0_i32 = arith.constant 0 : i32
    %c0_i32_0 = arith.constant 0 : i32
    %c0_i32_1 = arith.constant 0 : i32
    return %c0_i32, %c0_i32_0 : i32, i32
  }
  func.func @transform_2(%arg0: i32) -> (i32, i32) {
    %c0_i32 = arith.constant 0 : i32
    %c0_i32_0 = arith.constant 0 : i32
    %c0_i32_1 = arith.constant 0 : i32
    return %c0_i32, %c0_i32_0 : i32, i32
  }
  func.func @transform_3(%arg0: i32) -> (i32, i32) {
    %c0_i32 = arith.constant 0 : i32
    %c0_i32_0 = arith.constant 0 : i32
    return %arg0, %c0_i32 : i32, i32
  }
}

module attributes {stable_mosaic.version = 11 : i64} {
  func.func @_mm_bias_kernel(%arg0: i32, %arg1: memref<256x216xbf16, #tpu.memory_space<vmem>>, %arg2: memref<216x8xbf16, #tpu.memory_space<vmem>>, %arg3: memref<1x8xf32, #tpu.memory_space<vmem>>, %arg4: memref<256x8xbf16, #tpu.memory_space<vmem>>) attributes {dimension_semantics = [#tpu.dimension_semantics<parallel>], iteration_bounds = array<i64: 2>, scalar_prefetch = 0 : i64, scratch_operands = 0 : i64, tpu.core_type = #tpu.core_type<tc>, window_params = [{transform_indices = @transform_0, window_bounds = array<i64: 256, 216>}, {pipeline_mode = #tpu.pipeline_mode<synchronous>, transform_indices = @transform_1, window_bounds = array<i64: 216, 8>}, {pipeline_mode = #tpu.pipeline_mode<synchronous>, transform_indices = @transform_2, window_bounds = array<i64: 1, 8>}, {transform_indices = @transform_3, window_bounds = array<i64: 256, 8>}]} {
    %c0 = arith.constant 0 : index
    %c0_0 = arith.constant 0 : index
    %0 = vector.load %arg1[%c0, %c0_0] : memref<256x216xbf16, #tpu.memory_space<vmem>>, vector<256x216xbf16>
    %c0_1 = arith.constant 0 : index
    %c0_2 = arith.constant 0 : index
    %1 = vector.load %arg2[%c0_1, %c0_2] : memref<216x8xbf16, #tpu.memory_space<vmem>>, vector<216x8xbf16>
    %cst = arith.constant dense<0.000000e+00> : vector<256x8xf32>
    %2 = tpu.matmul %0, %1, %cst {dimension_numbers = #tpu.dot_dimension_numbers<[1], [0], [0], [1], [0, 0, 1, 1], [], []>} : vector<256x216xbf16>, vector<216x8xbf16>, vector<256x8xf32> -> vector<256x8xf32>
    %c0_3 = arith.constant 0 : index
    %c0_4 = arith.constant 0 : index
    %3 = vector.load %arg3[%c0_3, %c0_4] : memref<1x8xf32, #tpu.memory_space<vmem>>, vector<1x8xf32>
    %4 = vector.broadcast %3 : vector<1x8xf32> to vector<256x8xf32>
    %5 = arith.addf %2, %4 : vector<256x8xf32>
    %cst_5 = arith.constant 0.000000e+00 : f32
    %6 = vector.broadcast %cst_5 : f32 to vector<256x8xf32>
    %7 = arith.maximumf %5, %6 : vector<256x8xf32>
    %8 = arith.truncf %7 : vector<256x8xf32> to vector<256x8xbf16>
    %c0_6 = arith.constant 0 : index
    %c0_7 = arith.constant 0 : index
    %9 = vector.load %arg4[%c0_6, %c0_7] : memref<256x8xbf16, #tpu.memory_space<vmem>>, vector<256x8xbf16>
    tpu.vector_store %arg4[%c0_6, %c0_7], %8 {strides = array<i32>} : memref<256x8xbf16, #tpu.memory_space<vmem>>, vector<256x8xbf16>,
    return
  }
  func.func @transform_0(%arg0: i32) -> (i32, i32) {
    %c0_i32 = arith.constant 0 : i32
    %c0_i32_0 = arith.constant 0 : i32
    return %arg0, %c0_i32 : i32, i32
  }
  func.func @transform_1(%arg0: i32) -> (i32, i32) {
    %c0_i32 = arith.constant 0 : i32
    %c0_i32_0 = arith.constant 0 : i32
    %c0_i32_1 = arith.constant 0 : i32
    return %c0_i32, %c0_i32_0 : i32, i32
  }
  func.func @transform_2(%arg0: i32) -> (i32, i32) {
    %c0_i32 = arith.constant 0 : i32
    %c0_i32_0 = arith.constant 0 : i32
    %c0_i32_1 = arith.constant 0 : i32
    return %c0_i32, %c0_i32_0 : i32, i32
  }
  func.func @transform_3(%arg0: i32) -> (i32, i32) {
    %c0_i32 = arith.constant 0 : i32
    %c0_i32_0 = arith.constant 0 : i32
    return %arg0, %c0_i32 : i32, i32
  }
}

module attributes {stable_mosaic.version = 11 : i64} {
  func.func @_mm_bias_kernel(%arg0: i32, %arg1: memref<32x216xbf16, #tpu.memory_space<vmem>>, %arg2: memref<216x16xbf16, #tpu.memory_space<vmem>>, %arg3: memref<1x16xf32, #tpu.memory_space<vmem>>, %arg4: memref<32x16xbf16, #tpu.memory_space<vmem>>) attributes {dimension_semantics = [#tpu.dimension_semantics<parallel>], iteration_bounds = array<i64: 2>, scalar_prefetch = 0 : i64, scratch_operands = 0 : i64, tpu.core_type = #tpu.core_type<tc>, window_params = [{transform_indices = @transform_0, window_bounds = array<i64: 32, 216>}, {pipeline_mode = #tpu.pipeline_mode<synchronous>, transform_indices = @transform_1, window_bounds = array<i64: 216, 16>}, {pipeline_mode = #tpu.pipeline_mode<synchronous>, transform_indices = @transform_2, window_bounds = array<i64: 1, 16>}, {transform_indices = @transform_3, window_bounds = array<i64: 32, 16>}]} {
    %c0 = arith.constant 0 : index
    %c0_0 = arith.constant 0 : index
    %0 = vector.load %arg1[%c0, %c0_0] : memref<32x216xbf16, #tpu.memory_space<vmem>>, vector<32x216xbf16>
    %c0_1 = arith.constant 0 : index
    %c0_2 = arith.constant 0 : index
    %1 = vector.load %arg2[%c0_1, %c0_2] : memref<216x16xbf16, #tpu.memory_space<vmem>>, vector<216x16xbf16>
    %cst = arith.constant dense<0.000000e+00> : vector<32x16xf32>
    %2 = tpu.matmul %0, %1, %cst {dimension_numbers = #tpu.dot_dimension_numbers<[1], [0], [0], [1], [0, 0, 1, 1], [], []>} : vector<32x216xbf16>, vector<216x16xbf16>, vector<32x16xf32> -> vector<32x16xf32>
    %c0_3 = arith.constant 0 : index
    %c0_4 = arith.constant 0 : index
    %3 = vector.load %arg3[%c0_3, %c0_4] : memref<1x16xf32, #tpu.memory_space<vmem>>, vector<1x16xf32>
    %4 = vector.broadcast %3 : vector<1x16xf32> to vector<32x16xf32>
    %5 = arith.addf %2, %4 : vector<32x16xf32>
    %cst_5 = arith.constant 0.000000e+00 : f32
    %6 = vector.broadcast %cst_5 : f32 to vector<32x16xf32>
    %7 = arith.maximumf %5, %6 : vector<32x16xf32>
    %8 = arith.truncf %7 : vector<32x16xf32> to vector<32x16xbf16>
    %c0_6 = arith.constant 0 : index
    %c0_7 = arith.constant 0 : index
    %9 = vector.load %arg4[%c0_6, %c0_7] : memref<32x16xbf16, #tpu.memory_space<vmem>>, vector<32x16xbf16>
    tpu.vector_store %arg4[%c0_6, %c0_7], %8 {strides = array<i32>} : memref<32x16xbf16, #tpu.memory_space<vmem>>, vector<32x16xbf16>,
    return
  }
  func.func @transform_0(%arg0: i32) -> (i32, i32) {
    %c0_i32 = arith.constant 0 : i32
    %c0_i32_0 = arith.constant 0 : i32
    return %arg0, %c0_i32 : i32, i32
  }
  func.func @transform_1(%arg0: i32) -> (i32, i32) {
    %c0_i32 = arith.constant 0 : i32
    %c0_i32_0 = arith.constant 0 : i32
    %c0_i32_1 = arith.constant 0 : i32
    return %c0_i32, %c0_i32_0 : i32, i32
  }
  func.func @transform_2(%arg0: i32) -> (i32, i32) {
    %c0_i32 = arith.constant 0 : i32
    %c0_i32_0 = arith.constant 0 : i32
    %c0_i32_1 = arith.constant 0 : i32
    return %c0_i32, %c0_i32_0 : i32, i32
  }
  func.func @transform_3(%arg0: i32) -> (i32, i32) {
    %c0_i32 = arith.constant 0 : i32
    %c0_i32_0 = arith.constant 0 : i32
    return %arg0, %c0_i32 : i32, i32
  }
}

module attributes {stable_mosaic.version = 11 : i64} {
  func.func @_mm_bias_kernel(%arg0: i32, %arg1: memref<32x432xbf16, #tpu.memory_space<vmem>>, %arg2: memref<432x16xbf16, #tpu.memory_space<vmem>>, %arg3: memref<1x16xf32, #tpu.memory_space<vmem>>, %arg4: memref<32x16xbf16, #tpu.memory_space<vmem>>) attributes {dimension_semantics = [#tpu.dimension_semantics<parallel>], iteration_bounds = array<i64: 2>, scalar_prefetch = 0 : i64, scratch_operands = 0 : i64, tpu.core_type = #tpu.core_type<tc>, window_params = [{transform_indices = @transform_0, window_bounds = array<i64: 32, 432>}, {pipeline_mode = #tpu.pipeline_mode<synchronous>, transform_indices = @transform_1, window_bounds = array<i64: 432, 16>}, {pipeline_mode = #tpu.pipeline_mode<synchronous>, transform_indices = @transform_2, window_bounds = array<i64: 1, 16>}, {transform_indices = @transform_3, window_bounds = array<i64: 32, 16>}]} {
    %c0 = arith.constant 0 : index
    %c0_0 = arith.constant 0 : index
    %0 = vector.load %arg1[%c0, %c0_0] : memref<32x432xbf16, #tpu.memory_space<vmem>>, vector<32x432xbf16>
    %c0_1 = arith.constant 0 : index
    %c0_2 = arith.constant 0 : index
    %1 = vector.load %arg2[%c0_1, %c0_2] : memref<432x16xbf16, #tpu.memory_space<vmem>>, vector<432x16xbf16>
    %cst = arith.constant dense<0.000000e+00> : vector<32x16xf32>
    %2 = tpu.matmul %0, %1, %cst {dimension_numbers = #tpu.dot_dimension_numbers<[1], [0], [0], [1], [0, 0, 1, 1], [], []>} : vector<32x432xbf16>, vector<432x16xbf16>, vector<32x16xf32> -> vector<32x16xf32>
    %c0_3 = arith.constant 0 : index
    %c0_4 = arith.constant 0 : index
    %3 = vector.load %arg3[%c0_3, %c0_4] : memref<1x16xf32, #tpu.memory_space<vmem>>, vector<1x16xf32>
    %4 = vector.broadcast %3 : vector<1x16xf32> to vector<32x16xf32>
    %5 = arith.addf %2, %4 : vector<32x16xf32>
    %cst_5 = arith.constant 0.000000e+00 : f32
    %6 = vector.broadcast %cst_5 : f32 to vector<32x16xf32>
    %7 = arith.maximumf %5, %6 : vector<32x16xf32>
    %8 = arith.truncf %7 : vector<32x16xf32> to vector<32x16xbf16>
    %c0_6 = arith.constant 0 : index
    %c0_7 = arith.constant 0 : index
    %9 = vector.load %arg4[%c0_6, %c0_7] : memref<32x16xbf16, #tpu.memory_space<vmem>>, vector<32x16xbf16>
    tpu.vector_store %arg4[%c0_6, %c0_7], %8 {strides = array<i32>} : memref<32x16xbf16, #tpu.memory_space<vmem>>, vector<32x16xbf16>,
    return
  }
  func.func @transform_0(%arg0: i32) -> (i32, i32) {
    %c0_i32 = arith.constant 0 : i32
    %c0_i32_0 = arith.constant 0 : i32
    return %arg0, %c0_i32 : i32, i32
  }
  func.func @transform_1(%arg0: i32) -> (i32, i32) {
    %c0_i32 = arith.constant 0 : i32
    %c0_i32_0 = arith.constant 0 : i32
    %c0_i32_1 = arith.constant 0 : i32
    return %c0_i32, %c0_i32_0 : i32, i32
  }
  func.func @transform_2(%arg0: i32) -> (i32, i32) {
    %c0_i32 = arith.constant 0 : i32
    %c0_i32_0 = arith.constant 0 : i32
    %c0_i32_1 = arith.constant 0 : i32
    return %c0_i32, %c0_i32_0 : i32, i32
  }
  func.func @transform_3(%arg0: i32) -> (i32, i32) {
    %c0_i32 = arith.constant 0 : i32
    %c0_i32_0 = arith.constant 0 : i32
    return %arg0, %c0_i32 : i32, i32
  }
}

module attributes {stable_mosaic.version = 11 : i64} {
  func.func @_mm_bias_kernel(%arg0: i32, %arg1: memref<256x8xbf16, #tpu.memory_space<vmem>>, %arg2: memref<8x8xbf16, #tpu.memory_space<vmem>>, %arg3: memref<1x8xf32, #tpu.memory_space<vmem>>, %arg4: memref<256x8xbf16, #tpu.memory_space<vmem>>) attributes {dimension_semantics = [#tpu.dimension_semantics<parallel>], iteration_bounds = array<i64: 2>, scalar_prefetch = 0 : i64, scratch_operands = 0 : i64, tpu.core_type = #tpu.core_type<tc>, window_params = [{transform_indices = @transform_0, window_bounds = array<i64: 256, 8>}, {pipeline_mode = #tpu.pipeline_mode<synchronous>, transform_indices = @transform_1, window_bounds = array<i64: 8, 8>}, {pipeline_mode = #tpu.pipeline_mode<synchronous>, transform_indices = @transform_2, window_bounds = array<i64: 1, 8>}, {transform_indices = @transform_3, window_bounds = array<i64: 256, 8>}]} {
    %c0 = arith.constant 0 : index
    %c0_0 = arith.constant 0 : index
    %0 = vector.load %arg1[%c0, %c0_0] : memref<256x8xbf16, #tpu.memory_space<vmem>>, vector<256x8xbf16>
    %c0_1 = arith.constant 0 : index
    %c0_2 = arith.constant 0 : index
    %1 = vector.load %arg2[%c0_1, %c0_2] : memref<8x8xbf16, #tpu.memory_space<vmem>>, vector<8x8xbf16>
    %cst = arith.constant dense<0.000000e+00> : vector<256x8xf32>
    %2 = tpu.matmul %0, %1, %cst {dimension_numbers = #tpu.dot_dimension_numbers<[1], [0], [0], [1], [0, 0, 1, 1], [], []>} : vector<256x8xbf16>, vector<8x8xbf16>, vector<256x8xf32> -> vector<256x8xf32>
    %c0_3 = arith.constant 0 : index
    %c0_4 = arith.constant 0 : index
    %3 = vector.load %arg3[%c0_3, %c0_4] : memref<1x8xf32, #tpu.memory_space<vmem>>, vector<1x8xf32>
    %4 = vector.broadcast %3 : vector<1x8xf32> to vector<256x8xf32>
    %5 = arith.addf %2, %4 : vector<256x8xf32>
    %6 = arith.truncf %5 : vector<256x8xf32> to vector<256x8xbf16>
    %c0_5 = arith.constant 0 : index
    %c0_6 = arith.constant 0 : index
    %7 = vector.load %arg4[%c0_5, %c0_6] : memref<256x8xbf16, #tpu.memory_space<vmem>>, vector<256x8xbf16>
    tpu.vector_store %arg4[%c0_5, %c0_6], %6 {strides = array<i32>} : memref<256x8xbf16, #tpu.memory_space<vmem>>, vector<256x8xbf16>,
    return
  }
  func.func @transform_0(%arg0: i32) -> (i32, i32) {
    %c0_i32 = arith.constant 0 : i32
    %c0_i32_0 = arith.constant 0 : i32
    return %arg0, %c0_i32 : i32, i32
  }
  func.func @transform_1(%arg0: i32) -> (i32, i32) {
    %c0_i32 = arith.constant 0 : i32
    %c0_i32_0 = arith.constant 0 : i32
    %c0_i32_1 = arith.constant 0 : i32
    return %c0_i32, %c0_i32_0 : i32, i32
  }
  func.func @transform_2(%arg0: i32) -> (i32, i32) {
    %c0_i32 = arith.constant 0 : i32
    %c0_i32_0 = arith.constant 0 : i32
    %c0_i32_1 = arith.constant 0 : i32
    return %c0_i32, %c0_i32_0 : i32, i32
  }
  func.func @transform_3(%arg0: i32) -> (i32, i32) {
    %c0_i32 = arith.constant 0 : i32
    %c0_i32_0 = arith.constant 0 : i32
    return %arg0, %c0_i32 : i32, i32
  }
}

module attributes {stable_mosaic.version = 11 : i64} {
  func.func @_mm_bias_res_relu_kernel(%arg0: i32, %arg1: memref<32x128xbf16, #tpu.memory_space<vmem>>, %arg2: memref<128x64xbf16, #tpu.memory_space<vmem>>, %arg3: memref<1x64xf32, #tpu.memory_space<vmem>>, %arg4: memref<32x64xbf16, #tpu.memory_space<vmem>>, %arg5: memref<32x64xbf16, #tpu.memory_space<vmem>>) attributes {dimension_semantics = [#tpu.dimension_semantics<parallel>], iteration_bounds = array<i64: 2>, scalar_prefetch = 0 : i64, scratch_operands = 0 : i64, tpu.core_type = #tpu.core_type<tc>, window_params = [{transform_indices = @transform_0, window_bounds = array<i64: 32, 128>}, {pipeline_mode = #tpu.pipeline_mode<synchronous>, transform_indices = @transform_1, window_bounds = array<i64: 128, 64>}, {pipeline_mode = #tpu.pipeline_mode<synchronous>, transform_indices = @transform_2, window_bounds = array<i64: 1, 64>}, {transform_indices = @transform_3, window_bounds = array<i64: 32, 64>}, {transform_indices = @transform_4, window_bounds = array<i64: 32, 64>}]} {
    %c0 = arith.constant 0 : index
    %c0_0 = arith.constant 0 : index
    %0 = vector.load %arg1[%c0, %c0_0] : memref<32x128xbf16, #tpu.memory_space<vmem>>, vector<32x128xbf16>
    %c0_1 = arith.constant 0 : index
    %c0_2 = arith.constant 0 : index
    %1 = vector.load %arg2[%c0_1, %c0_2] : memref<128x64xbf16, #tpu.memory_space<vmem>>, vector<128x64xbf16>
    %cst = arith.constant dense<0.000000e+00> : vector<32x64xf32>
    %2 = tpu.matmul %0, %1, %cst {dimension_numbers = #tpu.dot_dimension_numbers<[1], [0], [0], [1], [0, 0, 1, 1], [], []>} : vector<32x128xbf16>, vector<128x64xbf16>, vector<32x64xf32> -> vector<32x64xf32>
    %c0_3 = arith.constant 0 : index
    %c0_4 = arith.constant 0 : index
    %3 = vector.load %arg3[%c0_3, %c0_4] : memref<1x64xf32, #tpu.memory_space<vmem>>, vector<1x64xf32>
    %4 = vector.broadcast %3 : vector<1x64xf32> to vector<32x64xf32>
    %5 = arith.addf %2, %4 : vector<32x64xf32>
    %c0_5 = arith.constant 0 : index
    %c0_6 = arith.constant 0 : index
    %6 = vector.load %arg4[%c0_5, %c0_6] : memref<32x64xbf16, #tpu.memory_space<vmem>>, vector<32x64xbf16>
    %7 = arith.extf %6 : vector<32x64xbf16> to vector<32x64xf32>
    %8 = arith.addf %5, %7 : vector<32x64xf32>
    %cst_7 = arith.constant 0.000000e+00 : f32
    %9 = vector.broadcast %cst_7 : f32 to vector<32x64xf32>
    %10 = arith.maximumf %8, %9 : vector<32x64xf32>
    %11 = arith.truncf %10 : vector<32x64xf32> to vector<32x64xbf16>
    %c0_8 = arith.constant 0 : index
    %c0_9 = arith.constant 0 : index
    %12 = vector.load %arg5[%c0_8, %c0_9] : memref<32x64xbf16, #tpu.memory_space<vmem>>, vector<32x64xbf16>
    tpu.vector_store %arg5[%c0_8, %c0_9], %11 {strides = array<i32>} : memref<32x64xbf16, #tpu.memory_space<vmem>>, vector<32x64xbf16>,
    return
  }
  func.func @transform_0(%arg0: i32) -> (i32, i32) {
    %c0_i32 = arith.constant 0 : i32
    %c0_i32_0 = arith.constant 0 : i32
    return %arg0, %c0_i32 : i32, i32
  }
  func.func @transform_1(%arg0: i32) -> (i32, i32) {
    %c0_i32 = arith.constant 0 : i32
    %c0_i32_0 = arith.constant 0 : i32
    %c0_i32_1 = arith.constant 0 : i32
    return %c0_i32, %c0_i32_0 : i32, i32
  }
  func.func @transform_2(%arg0: i32) -> (i32, i32) {
    %c0_i32 = arith.constant 0 : i32
    %c0_i32_0 = arith.constant 0 : i32
    %c0_i32_1 = arith.constant 0 : i32
    return %c0_i32, %c0_i32_0 : i32, i32
  }
  func.func @transform_3(%arg0: i32) -> (i32, i32) {
    %c0_i32 = arith.constant 0 : i32
    %c0_i32_0 = arith.constant 0 : i32
    return %arg0, %c0_i32 : i32, i32
  }
  func.func @transform_4(%arg0: i32) -> (i32, i32) {
    %c0_i32 = arith.constant 0 : i32
    %c0_i32_0 = arith.constant 0 : i32
    return %arg0, %c0_i32 : i32, i32
  }
}

module attributes {stable_mosaic.version = 11 : i64} {
  func.func @_mm_bias_kernel(%arg0: i32, %arg1: memref<1024x4xbf16, #tpu.memory_space<vmem>>, %arg2: memref<4x4xbf16, #tpu.memory_space<vmem>>, %arg3: memref<1x4xf32, #tpu.memory_space<vmem>>, %arg4: memref<1024x4xbf16, #tpu.memory_space<vmem>>) attributes {dimension_semantics = [#tpu.dimension_semantics<parallel>], iteration_bounds = array<i64: 4>, scalar_prefetch = 0 : i64, scratch_operands = 0 : i64, tpu.core_type = #tpu.core_type<tc>, window_params = [{transform_indices = @transform_0, window_bounds = array<i64: 1024, 4>}, {pipeline_mode = #tpu.pipeline_mode<synchronous>, transform_indices = @transform_1, window_bounds = array<i64: 4, 4>}, {pipeline_mode = #tpu.pipeline_mode<synchronous>, transform_indices = @transform_2, window_bounds = array<i64: 1, 4>}, {transform_indices = @transform_3, window_bounds = array<i64: 1024, 4>}]} {
    %c0 = arith.constant 0 : index
    %c0_0 = arith.constant 0 : index
    %0 = vector.load %arg1[%c0, %c0_0] : memref<1024x4xbf16, #tpu.memory_space<vmem>>, vector<1024x4xbf16>
    %c0_1 = arith.constant 0 : index
    %c0_2 = arith.constant 0 : index
    %1 = vector.load %arg2[%c0_1, %c0_2] : memref<4x4xbf16, #tpu.memory_space<vmem>>, vector<4x4xbf16>
    %cst = arith.constant dense<0.000000e+00> : vector<1024x4xf32>
    %2 = tpu.matmul %0, %1, %cst {dimension_numbers = #tpu.dot_dimension_numbers<[1], [0], [0], [1], [0, 0, 1, 1], [], []>} : vector<1024x4xbf16>, vector<4x4xbf16>, vector<1024x4xf32> -> vector<1024x4xf32>
    %c0_3 = arith.constant 0 : index
    %c0_4 = arith.constant 0 : index
    %3 = vector.load %arg3[%c0_3, %c0_4] : memref<1x4xf32, #tpu.memory_space<vmem>>, vector<1x4xf32>
    %4 = vector.broadcast %3 : vector<1x4xf32> to vector<1024x4xf32>
    %5 = arith.addf %2, %4 : vector<1024x4xf32>
    %6 = arith.truncf %5 : vector<1024x4xf32> to vector<1024x4xbf16>
    %c0_5 = arith.constant 0 : index
    %c0_6 = arith.constant 0 : index
    %7 = vector.load %arg4[%c0_5, %c0_6] : memref<1024x4xbf16, #tpu.memory_space<vmem>>, vector<1024x4xbf16>
    tpu.vector_store %arg4[%c0_5, %c0_6], %6 {strides = array<i32>} : memref<1024x4xbf16, #tpu.memory_space<vmem>>, vector<1024x4xbf16>,
    return
  }
  func.func @transform_0(%arg0: i32) -> (i32, i32) {
    %c0_i32 = arith.constant 0 : i32
    %c0_i32_0 = arith.constant 0 : i32
    return %arg0, %c0_i32 : i32, i32
  }
  func.func @transform_1(%arg0: i32) -> (i32, i32) {
    %c0_i32 = arith.constant 0 : i32
    %c0_i32_0 = arith.constant 0 : i32
    %c0_i32_1 = arith.constant 0 : i32
    return %c0_i32, %c0_i32_0 : i32, i32
  }
  func.func @transform_2(%arg0: i32) -> (i32, i32) {
    %c0_i32 = arith.constant 0 : i32
    %c0_i32_0 = arith.constant 0 : i32
    %c0_i32_1 = arith.constant 0 : i32
    return %c0_i32, %c0_i32_0 : i32, i32
  }
  func.func @transform_3(%arg0: i32) -> (i32, i32) {
    %c0_i32 = arith.constant 0 : i32
    %c0_i32_0 = arith.constant 0 : i32
    return %arg0, %c0_i32 : i32, i32
  }
}

module attributes {stable_mosaic.version = 11 : i64} {
  func.func @_mm_bias_res_relu_kernel(%arg0: i32, %arg1: memref<256x64xbf16, #tpu.memory_space<vmem>>, %arg2: memref<64x32xbf16, #tpu.memory_space<vmem>>, %arg3: memref<1x32xf32, #tpu.memory_space<vmem>>, %arg4: memref<256x32xbf16, #tpu.memory_space<vmem>>, %arg5: memref<256x32xf32, #tpu.memory_space<vmem>>) attributes {dimension_semantics = [#tpu.dimension_semantics<parallel>], iteration_bounds = array<i64: 2>, scalar_prefetch = 0 : i64, scratch_operands = 0 : i64, tpu.core_type = #tpu.core_type<tc>, window_params = [{transform_indices = @transform_0, window_bounds = array<i64: 256, 64>}, {pipeline_mode = #tpu.pipeline_mode<synchronous>, transform_indices = @transform_1, window_bounds = array<i64: 64, 32>}, {pipeline_mode = #tpu.pipeline_mode<synchronous>, transform_indices = @transform_2, window_bounds = array<i64: 1, 32>}, {transform_indices = @transform_3, window_bounds = array<i64: 256, 32>}, {transform_indices = @transform_4, window_bounds = array<i64: 256, 32>}]} {
    %c0 = arith.constant 0 : index
    %c0_0 = arith.constant 0 : index
    %0 = vector.load %arg1[%c0, %c0_0] : memref<256x64xbf16, #tpu.memory_space<vmem>>, vector<256x64xbf16>
    %c0_1 = arith.constant 0 : index
    %c0_2 = arith.constant 0 : index
    %1 = vector.load %arg2[%c0_1, %c0_2] : memref<64x32xbf16, #tpu.memory_space<vmem>>, vector<64x32xbf16>
    %cst = arith.constant dense<0.000000e+00> : vector<256x32xf32>
    %2 = tpu.matmul %0, %1, %cst {dimension_numbers = #tpu.dot_dimension_numbers<[1], [0], [0], [1], [0, 0, 1, 1], [], []>} : vector<256x64xbf16>, vector<64x32xbf16>, vector<256x32xf32> -> vector<256x32xf32>
    %c0_3 = arith.constant 0 : index
    %c0_4 = arith.constant 0 : index
    %3 = vector.load %arg3[%c0_3, %c0_4] : memref<1x32xf32, #tpu.memory_space<vmem>>, vector<1x32xf32>
    %4 = vector.broadcast %3 : vector<1x32xf32> to vector<256x32xf32>
    %5 = arith.addf %2, %4 : vector<256x32xf32>
    %c0_5 = arith.constant 0 : index
    %c0_6 = arith.constant 0 : index
    %6 = vector.load %arg4[%c0_5, %c0_6] : memref<256x32xbf16, #tpu.memory_space<vmem>>, vector<256x32xbf16>
    %7 = arith.extf %6 : vector<256x32xbf16> to vector<256x32xf32>
    %8 = arith.addf %5, %7 : vector<256x32xf32>
    %cst_7 = arith.constant 0.000000e+00 : f32
    %9 = vector.broadcast %cst_7 : f32 to vector<256x32xf32>
    %10 = arith.maximumf %8, %9 : vector<256x32xf32>
    %c0_8 = arith.constant 0 : index
    %c0_9 = arith.constant 0 : index
    %11 = vector.load %arg5[%c0_8, %c0_9] : memref<256x32xf32, #tpu.memory_space<vmem>>, vector<256x32xf32>
    tpu.vector_store %arg5[%c0_8, %c0_9], %10 {strides = array<i32>} : memref<256x32xf32, #tpu.memory_space<vmem>>, vector<256x32xf32>,
    return
  }
  func.func @transform_0(%arg0: i32) -> (i32, i32) {
    %c0_i32 = arith.constant 0 : i32
    %c0_i32_0 = arith.constant 0 : i32
    return %arg0, %c0_i32 : i32, i32
  }
  func.func @transform_1(%arg0: i32) -> (i32, i32) {
    %c0_i32 = arith.constant 0 : i32
    %c0_i32_0 = arith.constant 0 : i32
    %c0_i32_1 = arith.constant 0 : i32
    return %c0_i32, %c0_i32_0 : i32, i32
  }
  func.func @transform_2(%arg0: i32) -> (i32, i32) {
    %c0_i32 = arith.constant 0 : i32
    %c0_i32_0 = arith.constant 0 : i32
    %c0_i32_1 = arith.constant 0 : i32
    return %c0_i32, %c0_i32_0 : i32, i32
  }
  func.func @transform_3(%arg0: i32) -> (i32, i32) {
    %c0_i32 = arith.constant 0 : i32
    %c0_i32_0 = arith.constant 0 : i32
    return %arg0, %c0_i32 : i32, i32
  }
  func.func @transform_4(%arg0: i32) -> (i32, i32) {
    %c0_i32 = arith.constant 0 : i32
    %c0_i32_0 = arith.constant 0 : i32
    return %arg0, %c0_i32 : i32, i32
  }
}

</mosaic_0001>

<bundles_post_ra>
// kernel: hourglass_forward.8
= control target key start
LH: loop header
LB: loop body
LE: loop exit
PB: predicated region body
PF: predicated region fallthrough
CT: control target
= control target key end

     0   :  { %s1071_s12 = smov 0   ;;  %s1253_s0 = inlined_call_operand.vmem [shape: bf16[512,108], index: 0, kind: input, shape index: {}]   ;;  %s1254_s1 = inlined_call_operand.vmem [shape: bf16[108,8], index: 1, kind: input, shape index: {}]   ;;  %s1255_s2 = inlined_call_operand.vmem [shape: f32[1,8], index: 2, kind: input, shape index: {}]   ;;  %s1256_s3 = inlined_call_operand.vmem [shape: bf16[512,8], index: 3, kind: output, shape index: {}]  }
   0x1 LB: > { %s812_s13 = sadd.s32 4294967295, %s1049_s12   ;;  %p816_p0 = scmp.ge.s32.totalorder %s1049_s12, 1  ;;  %s1049_s12 = sphi %s1071_s12, %s13_s12  }
   0x2   : > { %p138_p1 = scmp.lt.s32.totalorder %s1049_s12, 3 }
   0x4   : > { %p139_p2 = pnand %p816_p0, %p138_p1 }
   0x5   : > { %v1020_v0 = vld [vmem:[%s1254_s1] sm:$0xff] (!%p139_p2)   ;;  %v1021_v1 = vld [vmem:[%s1254_s1 + $0x8] sm:$0xff] (!%p139_p2)   ;;  %s817_s18 = sshll.u32 (!%p139_p2), %s812_s13, 5  ;;  %v1022_v2 = vld [vmem:[%s1254_s1 + $0x10] sm:$0xff] (!%p139_p2)   ;;  %vm349_vm0 = vcmask (!%p139_p2), 883712   ;;  %vm398_vm1 = vcmask (!%p139_p2), 1045504  }
   0x6   : > { %142 = sbr.rel (%p139_p2) target bundleno = 280 (0x118), region = 32  ;;  %950 = vmatprep.subr.bf16.mxu0 (!%p139_p2), %v1020_v0  ;;  %996 = vmatprep.subr.bf16.mxu1 (!%p139_p2), %v1020_v0  ;;  %p163_p3 = scmp.lt.s32.totalorder (!%p139_p2), %s817_s18, 63  ;;  %v1023_v3 = vld [vmem:[%s1254_s1 + $0x18] sm:$0xff] (!%p139_p2)   ;;  %v1024_v6 = vld [vmem:[%s1254_s1 + $0x20] sm:$0xff] (!%p139_p2)   ;;  %v1025_v7 = vld [vmem:[%s1254_s1 + $0x28] sm:$0xff] (!%p139_p2)   ;;  %vm723_vm2 = vcmask (!%p139_p2), 60416  }
   0x7   : > { %951 = vmatpush3.bf16.msra.mxu0 (!%p139_p2), %v1020_v0  ;;  %1003 = vmatpush3.bf16.msra.mxu1 (!%p139_p2), %v1020_v0  ;;  %v1026_v8 = vld [vmem:[%s1254_s1 + $0x30] sm:$0x3f] (!%p139_p2)   ;;  %v1145_v24 = vld [vmem:[%s1255_s2] ss:$0 sm:$0xff] (!%p139_p2) }
   0x8   : > { %952 = vmatprep.subr.bf16.mxu0 (!%p139_p2), %v1021_v1  ;;  %997 = vmatprep.subr.bf16.mxu1 (!%p139_p2), %v1021_v1  ;;  %v400_v9 = vsel (!%p139_p2), %vm398_vm1, %v1026_v8, 0 }
   0xb   : > { %953 = vmatpush3.bf16.msra.mxu0 (!%p139_p2), %v1021_v1  ;;  %1004 = vmatpush3.bf16.msra.mxu1 (!%p139_p2), %v1021_v1 }
   0xc   : > { %954 = vmatprep.subr.bf16.mxu0 (!%p139_p2), %v1022_v2  ;;  %998 = vmatprep.subr.bf16.mxu1 (!%p139_p2), %v1022_v2 }
   0xd   : > { %s1258_s18 = smov (!%p163_p3, %s817_s18), 63 }
   0xe   : > { %s818_s21 = sshll.u32 %s1258_s18, 2 }
   0xf   : > { %s1099_s26 = scalar_lea.vmem %s1253_s0, %s818_s21  ;;  %955 = vmatpush3.bf16.msra.mxu0 %v1022_v2  ;;  %1005 = vmatpush3.bf16.msra.mxu1 %v1022_v2  ;;  %s1158_s10 = scalar_lea.vmem %s1256_s3, %s818_s21 }
  0x10   : > { %v1027_v4 = vld [vmem:[%s1099_s26] sm:$0xff]   ;;  %956 = vmatprep.subr.bf16.mxu0 %v1023_v3  ;;  %999 = vmatprep.subr.bf16.mxu1 %v1023_v3  ;;  %v1029_v10 = vld [vmem:[%s1099_s26 + $0x8] sm:$0xff]   ;;  %v1031_v12 = vld [vmem:[%s1099_s26 + $0x10] sm:$0xff]  }
  0x11   : > { %v1028_v5 = vld [vmem:[%s1099_s26 + $0x40] sm:$0xff]   ;;  %964 = vmatprep.mubr.msk.bf16.mxu0 %vm349_vm0, %v1027_v4  ;;  %v1030_v11 = vld [vmem:[%s1099_s26 + $0x48] sm:$0xff]   ;;  %v1032_v13 = vld [vmem:[%s1099_s26 + $0x50] sm:$0xff]  }
  0x12   : > { %980 = vmatprep.mubr.msk.bf16.mxu1 %vm349_vm0, %v1028_v5  ;;  %v1033_v14 = vld [vmem:[%s1099_s26 + $0x18] sm:$0xff]   ;;  %v1035_v16 = vld [vmem:[%s1099_s26 + $0x20] sm:$0xff]   ;;  %v1037_v18 = vld [vmem:[%s1099_s26 + $0x28] sm:$0xff]  }
  0x13   : > { %957 = vmatpush3.bf16.msra.mxu0 %v1023_v3  ;;  %1006 = vmatpush3.bf16.msra.mxu1 %v1023_v3  ;;  %v1034_v15 = vld [vmem:[%s1099_s26 + $0x58] sm:$0xff]   ;;  %v1036_v17 = vld [vmem:[%s1099_s26 + $0x60] sm:$0xff]   ;;  %v1038_v19 = vld [vmem:[%s1099_s26 + $0x68] sm:$0xff]  }
  0x14   : > { %958 = vmatprep.subr.bf16.mxu0 %v1024_v6  ;;  %1000 = vmatprep.subr.bf16.mxu1 %v1024_v6  ;;  %v1039_v20 = vld [vmem:[%s1099_s26 + $0x30] sm:$0xff]   ;;  %v1041_v22 = vld [vmem:[%s1099_s26 + $0x38] sm:$0xff]  }
  0x15   : > { %v1040_v21 = vld [vmem:[%s1099_s26 + $0x70] sm:$0xff]   ;;  %v1042_v23 = vld [vmem:[%s1099_s26 + $0x78] sm:$0xff]  }
  0x17   : > { %959 = vmatpush3.bf16.msra.mxu0 %v1024_v6  ;;  %1007 = vmatpush3.bf16.msra.mxu1 %v1024_v6 }
  0x18   : > { %960 = vmatprep.subr.bf16.mxu0 %v1025_v7  ;;  %1001 = vmatprep.subr.bf16.mxu1 %v1025_v7 }
  0x1b   : > { %961 = vmatpush3.bf16.msra.mxu0 %v1025_v7  ;;  %1008 = vmatpush3.bf16.msra.mxu1 %v1025_v7 }
  0x1c   : > { %1010 = vmatprep.subr.msk.bf16.mxu0 %vm398_vm1, %v1026_v8  ;;  %1011 = vmatprep.subr.msk.bf16.mxu1 %vm398_vm1, %v1026_v8 }
  0x1f   : > { %963 = vmatpush3.bf16.msra.mxu0 %v400_v9  ;;  %1009 = vmatpush3.bf16.msra.mxu1 %v400_v9 }
  0x22   : > { %965 = vmatmul.mubr.msk.bf16.vlgmr.msra.gmra.mrb[0].mxu0 %vm349_vm0, %v1029_v10  ;;  %981 = vmatmul.mubr.msk.bf16.vlgmr.msra.gmra.mrb[0].mxu1 %vm349_vm0, %v1030_v11 }
  0x23   : > { %968 = vmatprep.mubr.msk.bf16.mxu0 %vm349_vm0, %v1031_v12  ;;  %984 = vmatprep.mubr.msk.bf16.mxu1 %vm349_vm0, %v1032_v13 }
  0x2a   : > { %969 = vmatmul.mubr.msk.bf16.gmra.mrb[4].mxu0 %vm349_vm0, %v1033_v14  ;;  %985 = vmatmul.mubr.msk.bf16.gmra.mrb[4].mxu1 %vm349_vm0, %v1034_v15 }
  0x2b   : > { %972 = vmatprep.mubr.msk.bf16.mxu0 %vm349_vm0, %v1035_v16  ;;  %988 = vmatprep.mubr.msk.bf16.mxu1 %vm349_vm0, %v1036_v17 }
  0x32   : > { %973 = vmatmul.mubr.msk.bf16.gmra.mrb[8].mxu0 %vm349_vm0, %v1037_v18  ;;  %989 = vmatmul.mubr.msk.bf16.gmra.mrb[8].mxu1 %vm349_vm0, %v1038_v19 }
  0x33   : > { %976 = vmatprep.mubr.msk.bf16.mxu0 %vm349_vm0, %v1039_v20  ;;  %992 = vmatprep.mubr.msk.bf16.mxu1 %vm349_vm0, %v1040_v21 }
  0x3a   : > { %977 = vmatmul.mubr.msk.bf16.gmra.mrb[12].mxu0 %vm349_vm0, %v1041_v22  ;;  %993 = vmatmul.mubr.msk.bf16.gmra.mrb[12].mxu1 %vm349_vm0, %v1042_v23 }
  0xf5   : > { %v966_v25 = vpop.f32.mrb[0].mxu0  ;;  %v982_v26 = vpop.f32.mrb[0].mxu1 }
  0xf6   : > { %v445_v27 = vadd.f32 %v966_v25, %v1145_v24  ;;  %v509_v28 = vadd.f32 %v982_v26, %v1145_v24  ;;  %v436_v29 = vpop.f32.mrb[1].mxu0  ;;  %v500_v30 = vpop.f32.mrb[1].mxu1 }
  0xf7   : > { %v437_v31 = vadd.f32 %v1145_v24, %v436_v29  ;;  %v501_v32 = vadd.f32 %v1145_v24, %v500_v30  ;;  %v967_v33 = vpop.f32.mrb[2].mxu0  ;;  %v983_v34 = vpop.f32.mrb[2].mxu1 }
  0xf8   : > { %v565_v35 = vmax.f32 %v445_v27, 0.0  ;;  %v581_v36 = vmax.f32 %v509_v28, 0.0  ;;  %v448_v37 = vadd.f32 %v967_v33, %v1145_v24  ;;  %v512_v38 = vadd.f32 %v983_v34, %v1145_v24  ;;  %v439_v39 = vpop.f32.mrb[3].mxu0  ;;  %v503_v40 = vpop.f32.mrb[3].mxu1 }
  0xf9   : > { %v563_v41 = vmax.f32 %v437_v31, 0.0  ;;  %v579_v42 = vmax.f32 %v501_v32, 0.0  ;;  %v440_v43 = vadd.f32 %v1145_v24, %v439_v39  ;;  %v504_v44 = vadd.f32 %v1145_v24, %v503_v40 }
  0xfa   : > { %v897_v45 = vpack.c.bf16 %v565_v35, %v565_v35  ;;  %v913_v46 = vpack.c.bf16 %v581_v36, %v581_v36  ;;  %v566_v47 = vmax.f32 %v448_v37, 0.0  ;;  %v582_v48 = vmax.f32 %v512_v38, 0.0 }
  0xfb   : > { %v895_v49 = vpack.c.bf16 %v563_v41, %v563_v41  ;;  %v911_v50 = vpack.c.bf16 %v579_v42, %v579_v42  ;;  %v564_v51 = vmax.f32 %v440_v43, 0.0  ;;  %v580_v52 = vmax.f32 %v504_v44, 0.0 }
  0xfc   : > { %726 = vst.msk [vmem:[%s1158_s10 + $0x8] sm:$0xf] %vm723_vm2, %v897_v45  ;;  %742 = vst.msk [vmem:[%s1158_s10 + $0x48] sm:$0xf] %vm723_vm2, %v913_v46  ;;  %v898_v53 = vpack.c.bf16 %v566_v47, %v566_v47  ;;  %v914_v54 = vpack.c.bf16 %v582_v48, %v582_v48 }
  0xfd   : > { %724 = vst.msk [vmem:[%s1158_s10] sm:$0xf] %vm723_vm2, %v895_v49  ;;  %740 = vst.msk [vmem:[%s1158_s10 + $0x40] sm:$0xf] %vm723_vm2, %v911_v50  ;;  %v896_v55 = vpack.c.bf16 %v564_v51, %v564_v51  ;;  %v912_v56 = vpack.c.bf16 %v580_v52, %v580_v52  ;;  %v970_v57 = vpop.f32.mrb[4].mxu0  ;;  %v986_v58 = vpop.f32.mrb[4].mxu1 }
  0xfe   : > { %727 = vst.msk [vmem:[%s1158_s10 + $0xc] sm:$0xf] %vm723_vm2, %v898_v53  ;;  %743 = vst.msk [vmem:[%s1158_s10 + $0x4c] sm:$0xf] %vm723_vm2, %v914_v54  ;;  %v461_v59 = vadd.f32 %v970_v57, %v1145_v24  ;;  %v525_v60 = vadd.f32 %v986_v58, %v1145_v24  ;;  %v452_v61 = vpop.f32.mrb[5].mxu0  ;;  %v516_v62 = vpop.f32.mrb[5].mxu1 }
  0xff   : > { %725 = vst.msk [vmem:[%s1158_s10 + $0x4] sm:$0xf] %vm723_vm2, %v896_v55  ;;  %741 = vst.msk [vmem:[%s1158_s10 + $0x44] sm:$0xf] %vm723_vm2, %v912_v56  ;;  %v453_v63 = vadd.f32 %v1145_v24, %v452_v61  ;;  %v517_v0 = vadd.f32 %v1145_v24, %v516_v62  ;;  %v971_v1 = vpop.f32.mrb[6].mxu0  ;;  %v987_v2 = vpop.f32.mrb[6].mxu1 }
 0x100   : > { %v569_v3 = vmax.f32 %v461_v59, 0.0  ;;  %v585_v4 = vmax.f32 %v525_v60, 0.0  ;;  %v464_v5 = vadd.f32 %v971_v1, %v1145_v24  ;;  %v528_v6 = vadd.f32 %v987_v2, %v1145_v24  ;;  %v455_v7 = vpop.f32.mrb[7].mxu0  ;;  %v519_v8 = vpop.f32.mrb[7].mxu1 }
 0x101   : > { %v567_v9 = vmax.f32 %v453_v63, 0.0  ;;  %v583_v10 = vmax.f32 %v517_v0, 0.0  ;;  %v456_v11 = vadd.f32 %v1145_v24, %v455_v7  ;;  %v520_v12 = vadd.f32 %v1145_v24, %v519_v8 }
 0x102   : > { %v901_v13 = vpack.c.bf16 %v569_v3, %v569_v3  ;;  %v917_v14 = vpack.c.bf16 %v585_v4, %v585_v4  ;;  %v570_v15 = vmax.f32 %v464_v5, 0.0  ;;  %v586_v16 = vmax.f32 %v528_v6, 0.0 }
 0x103   : > { %v899_v17 = vpack.c.bf16 %v567_v9, %v567_v9  ;;  %v915_v18 = vpack.c.bf16 %v583_v10, %v583_v10  ;;  %v568_v19 = vmax.f32 %v456_v11, 0.0  ;;  %v584_v20 = vmax.f32 %v520_v12, 0.0 }
 0x104   : > { %730 = vst.msk [vmem:[%s1158_s10 + $0x18] sm:$0xf] %vm723_vm2, %v901_v13  ;;  %746 = vst.msk [vmem:[%s1158_s10 + $0x58] sm:$0xf] %vm723_vm2, %v917_v14  ;;  %v902_v21 = vpack.c.bf16 %v570_v15, %v570_v15  ;;  %v918_v22 = vpack.c.bf16 %v586_v16, %v586_v16 }
 0x105   : > { %728 = vst.msk [vmem:[%s1158_s10 + $0x10] sm:$0xf] %vm723_vm2, %v899_v17  ;;  %744 = vst.msk [vmem:[%s1158_s10 + $0x50] sm:$0xf] %vm723_vm2, %v915_v18  ;;  %v900_v23 = vpack.c.bf16 %v568_v19, %v568_v19  ;;  %v916_v25 = vpack.c.bf16 %v584_v20, %v584_v20  ;;  %v974_v26 = vpop.f32.mrb[8].mxu0  ;;  %v990_v27 = vpop.f32.mrb[8].mxu1 }
 0x106   : > { %731 = vst.msk [vmem:[%s1158_s10 + $0x1c] sm:$0xf] %vm723_vm2, %v902_v21  ;;  %747 = vst.msk [vmem:[%s1158_s10 + $0x5c] sm:$0xf] %vm723_vm2, %v918_v22  ;;  %v477_v28 = vadd.f32 %v974_v26, %v1145_v24  ;;  %v541_v29 = vadd.f32 %v990_v27, %v1145_v24  ;;  %v468_v30 = vpop.f32.mrb[9].mxu0  ;;  %v532_v31 = vpop.f32.mrb[9].mxu1 }
 0x107   : > { %729 = vst.msk [vmem:[%s1158_s10 + $0x14] sm:$0xf] %vm723_vm2, %v900_v23  ;;  %745 = vst.msk [vmem:[%s1158_s10 + $0x54] sm:$0xf] %vm723_vm2, %v916_v25  ;;  %v469_v32 = vadd.f32 %v1145_v24, %v468_v30  ;;  %v533_v33 = vadd.f32 %v1145_v24, %v532_v31  ;;  %v975_v34 = vpop.f32.mrb[10].mxu0  ;;  %v991_v35 = vpop.f32.mrb[10].mxu1 }
 0x108   : > { %v573_v36 = vmax.f32 %v477_v28, 0.0  ;;  %v589_v37 = vmax.f32 %v541_v29, 0.0  ;;  %v480_v38 = vadd.f32 %v975_v34, %v1145_v24  ;;  %v544_v39 = vadd.f32 %v991_v35, %v1145_v24  ;;  %v471_v40 = vpop.f32.mrb[11].mxu0  ;;  %v535_v41 = vpop.f32.mrb[11].mxu1 }
 0x109   : > { %v571_v42 = vmax.f32 %v469_v32, 0.0  ;;  %v587_v43 = vmax.f32 %v533_v33, 0.0  ;;  %v472_v44 = vadd.f32 %v1145_v24, %v471_v40  ;;  %v536_v45 = vadd.f32 %v1145_v24, %v535_v41 }
 0x10a   : > { %v905_v46 = vpack.c.bf16 %v573_v36, %v573_v36  ;;  %v921_v47 = vpack.c.bf16 %v589_v37, %v589_v37  ;;  %v574_v48 = vmax.f32 %v480_v38, 0.0  ;;  %v590_v49 = vmax.f32 %v544_v39, 0.0 }
 0x10b   : > { %v903_v50 = vpack.c.bf16 %v571_v42, %v571_v42  ;;  %v919_v51 = vpack.c.bf16 %v587_v43, %v587_v43  ;;  %v572_v52 = vmax.f32 %v472_v44, 0.0  ;;  %v588_v53 = vmax.f32 %v536_v45, 0.0 }
 0x10c   : > { %734 = vst.msk [vmem:[%s1158_s10 + $0x28] sm:$0xf] %vm723_vm2, %v905_v46  ;;  %750 = vst.msk [vmem:[%s1158_s10 + $0x68] sm:$0xf] %vm723_vm2, %v921_v47  ;;  %v906_v54 = vpack.c.bf16 %v574_v48, %v574_v48  ;;  %v922_v55 = vpack.c.bf16 %v590_v49, %v590_v49 }
 0x10d   : > { %732 = vst.msk [vmem:[%s1158_s10 + $0x20] sm:$0xf] %vm723_vm2, %v903_v50  ;;  %748 = vst.msk [vmem:[%s1158_s10 + $0x60] sm:$0xf] %vm723_vm2, %v919_v51  ;;  %v904_v56 = vpack.c.bf16 %v572_v52, %v572_v52  ;;  %v920_v57 = vpack.c.bf16 %v588_v53, %v588_v53  ;;  %v978_v58 = vpop.f32.mrb[12].mxu0  ;;  %v994_v59 = vpop.f32.mrb[12].mxu1 }
 0x10e   : > { %735 = vst.msk [vmem:[%s1158_s10 + $0x2c] sm:$0xf] %vm723_vm2, %v906_v54  ;;  %751 = vst.msk [vmem:[%s1158_s10 + $0x6c] sm:$0xf] %vm723_vm2, %v922_v55  ;;  %v493_v60 = vadd.f32 %v978_v58, %v1145_v24  ;;  %v557_v61 = vadd.f32 %v994_v59, %v1145_v24  ;;  %v484_v62 = vpop.f32.mrb[13].mxu0  ;;  %v548_v63 = vpop.f32.mrb[13].mxu1 }
 0x10f   : > { %733 = vst.msk [vmem:[%s1158_s10 + $0x24] sm:$0xf] %vm723_vm2, %v904_v56  ;;  %749 = vst.msk [vmem:[%s1158_s10 + $0x64] sm:$0xf] %vm723_vm2, %v920_v57  ;;  %v485_v0 = vadd.f32 %v1145_v24, %v484_v62  ;;  %v549_v1 = vadd.f32 %v1145_v24, %v548_v63  ;;  %v979_v2 = vpop.f32.mrb[14].mxu0  ;;  %v995_v3 = vpop.f32.mrb[14].mxu1 }
 0x110   : > { %v577_v4 = vmax.f32 %v493_v60, 0.0  ;;  %v593_v5 = vmax.f32 %v557_v61, 0.0  ;;  %v496_v6 = vadd.f32 %v979_v2, %v1145_v24  ;;  %v560_v7 = vadd.f32 %v995_v3, %v1145_v24  ;;  %v487_v8 = vpop.f32.mrb[15].mxu0  ;;  %v551_v9 = vpop.f32.mrb[15].mxu1 }
 0x111   : > { %v575_v10 = vmax.f32 %v485_v0, 0.0  ;;  %v591_v11 = vmax.f32 %v549_v1, 0.0  ;;  %v488_v12 = vadd.f32 %v1145_v24, %v487_v8  ;;  %v552_v13 = vadd.f32 %v1145_v24, %v551_v9 }
 0x112   : > { %v909_v14 = vpack.c.bf16 %v577_v4, %v577_v4  ;;  %v925_v15 = vpack.c.bf16 %v593_v5, %v593_v5  ;;  %v578_v16 = vmax.f32 %v496_v6, 0.0  ;;  %v594_v17 = vmax.f32 %v560_v7, 0.0 }
 0x113   : > { %v907_v18 = vpack.c.bf16 %v575_v10, %v575_v10  ;;  %v923_v19 = vpack.c.bf16 %v591_v11, %v591_v11  ;;  %v576_v20 = vmax.f32 %v488_v12, 0.0  ;;  %v592_v21 = vmax.f32 %v552_v13, 0.0 }
 0x114   : > { %738 = vst.msk [vmem:[%s1158_s10 + $0x38] sm:$0xf] %vm723_vm2, %v909_v14  ;;  %754 = vst.msk [vmem:[%s1158_s10 + $0x78] sm:$0xf] %vm723_vm2, %v925_v15  ;;  %v910_v22 = vpack.c.bf16 %v578_v16, %v578_v16  ;;  %v926_v23 = vpack.c.bf16 %v594_v17, %v594_v17 }
 0x115   : > { %736 = vst.msk [vmem:[%s1158_s10 + $0x30] sm:$0xf] %vm723_vm2, %v907_v18  ;;  %752 = vst.msk [vmem:[%s1158_s10 + $0x70] sm:$0xf] %vm723_vm2, %v923_v19  ;;  %v908_v24 = vpack.c.bf16 %v576_v20, %v576_v20  ;;  %v924_v25 = vpack.c.bf16 %v592_v21, %v592_v21 }
 0x116   : > { %739 = vst.msk [vmem:[%s1158_s10 + $0x3c] sm:$0xf] %vm723_vm2, %v910_v22  ;;  %755 = vst.msk [vmem:[%s1158_s10 + $0x7c] sm:$0xf] %vm723_vm2, %v926_v23 }
 0x117   : > { %737 = vst.msk [vmem:[%s1158_s10 + $0x34] sm:$0xf] %vm723_vm2, %v908_v24  ;;  %753 = vst.msk [vmem:[%s1158_s10 + $0x74] sm:$0xf] %vm723_vm2, %v924_v25 }
 0x118 PF: > { %s13_s12 = sadd.s32 1, %s1049_s12  }
 0x119   : > { %p10_p4 = scmp.ge.s32.totalorder %s13_s12, 4  }
 0x11b   :  { %12 = sbr.rel (!%p10_p4) target bundleno = 1 (0x1), region = 62 }

// kernel: hourglass_forward.9
= control target key start
LH: loop header
LB: loop body
LE: loop exit
PB: predicated region body
PF: predicated region fallthrough
CT: control target
= control target key end

     0   :  { %s1200_s12 = smov 0   ;;  %s1444_s0 = inlined_call_operand.vmem [shape: bf16[512,216], index: 0, kind: input, shape index: {}]   ;;  %s1445_s1 = inlined_call_operand.vmem [shape: bf16[216,8], index: 1, kind: input, shape index: {}]   ;;  %s1446_s2 = inlined_call_operand.vmem [shape: f32[1,8], index: 2, kind: input, shape index: {}]   ;;  %s1447_s3 = inlined_call_operand.vmem [shape: bf16[512,8], index: 3, kind: output, shape index: {}]  }
   0x1 LB: > { %s932_s13 = sadd.s32 4294967295, %s1177_s12   ;;  %p936_p0 = scmp.ge.s32.totalorder %s1177_s12, 1  ;;  %s1177_s12 = sphi %s1200_s12, %s13_s12  }
   0x2   : > { %p139_p1 = scmp.lt.s32.totalorder %s1177_s12, 3 }
   0x4   : > { %p140_p2 = pnand %p936_p0, %p139_p1 }
   0x5   : > { %v1109_v0 = vld [vmem:[%s1445_s1] sm:$0xff] (!%p140_p2)   ;;  %v1179_v1 = vmov (!%p140_p2), 0   ;;  %v1110_v2 = vld [vmem:[%s1445_s1 + $0x8] sm:$0xff] (!%p140_p2)   ;;  %s937_s18 = sshll.u32 (!%p140_p2), %s932_s13, 5  ;;  %v1111_v3 = vld [vmem:[%s1445_s1 + $0x10] sm:$0xff] (!%p140_p2)   ;;  %vm469_vm0 = vcmask (!%p140_p2), 719872  }
   0x6   : > { %143 = sbr.rel (%p140_p2) target bundleno = 339 (0x153), region = 32  ;;  %522 = vmatprep.subr.bf16.mxu0 (!%p140_p2), %v1179_v1  ;;  %1072 = vmatprep.subr.bf16.mxu1 (!%p140_p2), %v1179_v1  ;;  %p165_p3 = scmp.lt.s32.totalorder (!%p140_p2), %s937_s18, 63  ;;  %v1112_v4 = vld [vmem:[%s1445_s1 + $0x18] sm:$0xff] (!%p140_p2)   ;;  %v1113_v5 = vld [vmem:[%s1445_s1 + $0x20] sm:$0xff] (!%p140_p2)   ;;  %v1114_v8 = vld [vmem:[%s1445_s1 + $0x28] sm:$0xff] (!%p140_p2)   ;;  %vm518_vm1 = vcmask (!%p140_p2), 1043456  }
   0x7   : > { %523 = vmatpush1.bf16.msra.mxu0 (!%p140_p2), %v1109_v0  ;;  %1086 = vmatpush1.bf16.msra.mxu1 (!%p140_p2), %v1109_v0  ;;  %v1115_v9 = vld [vmem:[%s1445_s1 + $0x30] sm:$0xff] (!%p140_p2)   ;;  %v1116_v10 = vld [vmem:[%s1445_s1 + $0x38] sm:$0xff] (!%p140_p2)   ;;  %v1117_v11 = vld [vmem:[%s1445_s1 + $0x40] sm:$0xff] (!%p140_p2)   ;;  %vm843_vm2 = vcmask (!%p140_p2), 60416  }
   0x8   : > { %524 = vmatprep.subr.bf16.mxu0 (!%p140_p2), %v1179_v1  ;;  %1073 = vmatprep.subr.bf16.mxu1 (!%p140_p2), %v1179_v1  ;;  %v1118_v12 = vld [vmem:[%s1445_s1 + $0x48] sm:$0xff] (!%p140_p2)   ;;  %v1119_v13 = vld [vmem:[%s1445_s1 + $0x50] sm:$0xff] (!%p140_p2)   ;;  %v1120_v14 = vld [vmem:[%s1445_s1 + $0x58] sm:$0xff] (!%p140_p2)  }
   0x9   : > { %v1121_v15 = vld [vmem:[%s1445_s1 + $0x60] sm:$0xff] (!%p140_p2)   ;;  %v1122_v16 = vld [vmem:[%s1445_s1 + $0x68] ss:$0 sps:$4 sm:$0xff] (!%p140_p2)  }
   0xa   : > { %v520_v17 = vsel (!%p140_p2), %vm518_vm1, %v1122_v16, 0  ;;  %v1337_v48 = vld [vmem:[%s1446_s2] ss:$0 sm:$0xff] (!%p140_p2) }
   0xb   : > { %525 = vmatpush1.bf16.msra.mxu0 (!%p140_p2), %v1110_v2  ;;  %1087 = vmatpush1.bf16.msra.mxu1 (!%p140_p2), %v1110_v2 }
   0xc   : > { %526 = vmatprep.subr.bf16.mxu0 (!%p140_p2), %v1179_v1  ;;  %1074 = vmatprep.subr.bf16.mxu1 (!%p140_p2), %v1179_v1 }
   0xd   : > { %s1449_s18 = smov (!%p165_p3, %s937_s18), 63 }
   0xe   : > { %s1039_s21 = sshll.u32 %s1449_s18, 3  ;;  %s941_s24 = sshll.u32 %s1449_s18, 2 }
   0xf   : > { %527 = vmatpush1.bf16.msra.mxu0 %v1111_v3  ;;  %1088 = vmatpush1.bf16.msra.mxu1 %v1111_v3  ;;  %s1234_s26 = scalar_lea.vmem %s1444_s0, %s1039_s21  ;;  %s1347_s18 = scalar_lea.vmem %s1447_s3, %s941_s24 }
  0x10   : > { %528 = vmatprep.subr.bf16.mxu0 %v1179_v1  ;;  %1075 = vmatprep.subr.bf16.mxu1 %v1179_v1  ;;  %v1125_v6 = vld [vmem:[%s1234_s26 + $0x4] ss:$8 sps:$4 sm:$0xff]   ;;  %v1123_v18 = vld [vmem:[%s1234_s26] ss:$8 sps:$4 sm:$0xff]   ;;  %v1129_v20 = vld [vmem:[%s1234_s26 + $0x14] ss:$8 sps:$4 sm:$0xff]  }
  0x11   : > { %989 = vmatprep.mubr.msk.bf16.mxu0 %vm469_vm0, %v1125_v6  ;;  %v1128_v7 = vld [vmem:[%s1234_s26 + $0x84] ss:$8 sps:$4 sm:$0xff]   ;;  %v1126_v19 = vld [vmem:[%s1234_s26 + $0x80] ss:$8 sps:$4 sm:$0xff]   ;;  %v1131_v21 = vld [vmem:[%s1234_s26 + $0x94] ss:$8 sps:$4 sm:$0xff]  }
  0x12   : > { %997 = vmatprep.mubr.msk.bf16.mxu1 %vm469_vm0, %v1128_v7  ;;  %v1133_v22 = vld [vmem:[%s1234_s26 + $0x10] ss:$8 sps:$4 sm:$0xff]   ;;  %v1135_v24 = vld [vmem:[%s1234_s26 + $0x24] ss:$8 sps:$4 sm:$0xff]   ;;  %v1139_v26 = vld [vmem:[%s1234_s26 + $0x20] ss:$8 sps:$4 sm:$0xff]  }
  0x13   : > { %529 = vmatpush1.bf16.msra.mxu0 %v1112_v4  ;;  %1089 = vmatpush1.bf16.msra.mxu1 %v1112_v4  ;;  %v1134_v23 = vld [vmem:[%s1234_s26 + $0x90] ss:$8 sps:$4 sm:$0xff]   ;;  %v1137_v25 = vld [vmem:[%s1234_s26 + $0xa4] ss:$8 sps:$4 sm:$0xff]   ;;  %v1140_v27 = vld [vmem:[%s1234_s26 + $0xa0] ss:$8 sps:$4 sm:$0xff]  }
  0x14   : > { %530 = vmatprep.subr.bf16.mxu0 %v1179_v1  ;;  %1076 = vmatprep.subr.bf16.mxu1 %v1179_v1  ;;  %v1141_v28 = vld [vmem:[%s1234_s26 + $0x34] ss:$8 sps:$4 sm:$0xff]   ;;  %v1145_v30 = vld [vmem:[%s1234_s26 + $0x30] ss:$8 sps:$4 sm:$0xff]   ;;  %v1147_v32 = vld [vmem:[%s1234_s26 + $0x44] ss:$8 sps:$4 sm:$0xff]  }
  0x15   : > { %v1143_v29 = vld [vmem:[%s1234_s26 + $0xb4] ss:$8 sps:$4 sm:$0xff]   ;;  %v1146_v31 = vld [vmem:[%s1234_s26 + $0xb0] ss:$8 sps:$4 sm:$0xff]   ;;  %v1149_v33 = vld [vmem:[%s1234_s26 + $0xc4] ss:$8 sps:$4 sm:$0xff]  }
  0x16   : > { %v1151_v34 = vld [vmem:[%s1234_s26 + $0x40] ss:$8 sps:$4 sm:$0xff]   ;;  %v1153_v36 = vld [vmem:[%s1234_s26 + $0x54] ss:$8 sps:$4 sm:$0xff]   ;;  %v1157_v38 = vld [vmem:[%s1234_s26 + $0x50] ss:$8 sps:$4 sm:$0xff]  }
  0x17   : > { %531 = vmatpush1.bf16.msra.mxu0 %v1113_v5  ;;  %1090 = vmatpush1.bf16.msra.mxu1 %v1113_v5  ;;  %v1152_v35 = vld [vmem:[%s1234_s26 + $0xc0] ss:$8 sps:$4 sm:$0xff]   ;;  %v1155_v37 = vld [vmem:[%s1234_s26 + $0xd4] ss:$8 sps:$4 sm:$0xff]   ;;  %v1158_v39 = vld [vmem:[%s1234_s26 + $0xd0] ss:$8 sps:$4 sm:$0xff]  }
  0x18   : > { %532 = vmatprep.subr.bf16.mxu0 %v1179_v1  ;;  %1077 = vmatprep.subr.bf16.mxu1 %v1179_v1  ;;  %v1159_v40 = vld [vmem:[%s1234_s26 + $0x64] ss:$8 sps:$4 sm:$0xff]   ;;  %v1163_v42 = vld [vmem:[%s1234_s26 + $0x60] ss:$8 sps:$4 sm:$0xff]   ;;  %v1165_v44 = vld [vmem:[%s1234_s26 + $0x74] ss:$8 sps:$4 sm:$0xff]  }
  0x19   : > { %v1161_v41 = vld [vmem:[%s1234_s26 + $0xe4] ss:$8 sps:$4 sm:$0xff]   ;;  %v1164_v43 = vld [vmem:[%s1234_s26 + $0xe0] ss:$8 sps:$4 sm:$0xff]   ;;  %v1167_v45 = vld [vmem:[%s1234_s26 + $0xf4] ss:$8 sps:$4 sm:$0xff]  }
  0x1a   : > { %v1169_v46 = vld [vmem:[%s1234_s26 + $0x70] ss:$8 sps:$4 sm:$0xff]  }
  0x1b   : > { %533 = vmatpush1.bf16.msra.mxu0 %v1114_v8  ;;  %1091 = vmatpush1.bf16.msra.mxu1 %v1114_v8  ;;  %v1170_v47 = vld [vmem:[%s1234_s26 + $0xf0] ss:$8 sps:$4 sm:$0xff]  }
  0x1c   : > { %534 = vmatprep.subr.bf16.mxu0 %v1179_v1  ;;  %1078 = vmatprep.subr.bf16.mxu1 %v1179_v1 }
  0x1f   : > { %535 = vmatpush1.bf16.msra.mxu0 %v1115_v9  ;;  %1092 = vmatpush1.bf16.msra.mxu1 %v1115_v9 }
  0x20   : > { %536 = vmatprep.subr.bf16.mxu0 %v1179_v1  ;;  %1079 = vmatprep.subr.bf16.mxu1 %v1179_v1 }
  0x23   : > { %537 = vmatpush1.bf16.msra.mxu0 %v1116_v10  ;;  %1093 = vmatpush1.bf16.msra.mxu1 %v1116_v10 }
  0x24   : > { %538 = vmatprep.subr.bf16.mxu0 %v1179_v1  ;;  %1080 = vmatprep.subr.bf16.mxu1 %v1179_v1 }
  0x27   : > { %539 = vmatpush1.bf16.msra.mxu0 %v1117_v11  ;;  %1094 = vmatpush1.bf16.msra.mxu1 %v1117_v11 }
  0x28   : > { %540 = vmatprep.subr.bf16.mxu0 %v1179_v1  ;;  %1081 = vmatprep.subr.bf16.mxu1 %v1179_v1 }
  0x2b   : > { %541 = vmatpush1.bf16.msra.mxu0 %v1118_v12  ;;  %1095 = vmatpush1.bf16.msra.mxu1 %v1118_v12 }
  0x2c   : > { %542 = vmatprep.subr.bf16.mxu0 %v1179_v1  ;;  %1082 = vmatprep.subr.bf16.mxu1 %v1179_v1 }
  0x2f   : > { %543 = vmatpush1.bf16.msra.mxu0 %v1119_v13  ;;  %1096 = vmatpush1.bf16.msra.mxu1 %v1119_v13 }
  0x30   : > { %544 = vmatprep.subr.bf16.mxu0 %v1179_v1  ;;  %1083 = vmatprep.subr.bf16.mxu1 %v1179_v1 }
  0x33   : > { %545 = vmatpush1.bf16.msra.mxu0 %v1120_v14  ;;  %1097 = vmatpush1.bf16.msra.mxu1 %v1120_v14 }
  0x34   : > { %546 = vmatprep.subr.bf16.mxu0 %v1179_v1  ;;  %1084 = vmatprep.subr.bf16.mxu1 %v1179_v1 }
  0x37   : > { %547 = vmatpush1.bf16.msra.mxu0 %v1121_v15  ;;  %1098 = vmatpush1.bf16.msra.mxu1 %v1121_v15 }
  0x38   : > { %548 = vmatprep.subr.bf16.mxu0 %v1179_v1  ;;  %1085 = vmatprep.subr.bf16.mxu1 %v1179_v1 }
  0x3b   : > { %549 = vmatpush1.bf16.msra.mxu0 %v520_v17  ;;  %1099 = vmatpush1.bf16.msra.mxu1 %v520_v17 }
  0x3e   : > { %555 = vmatmul.mubr.bf16.vlgmr.msra.gmra.mrb[0].mxu0 %v1123_v18  ;;  %619 = vmatmul.mubr.bf16.vlgmr.msra.gmra.mrb[0].mxu1 %v1126_v19 }
  0x3f   : > { %990 = vmatprep.mubr.msk.bf16.mxu0 %vm469_vm0, %v1129_v20  ;;  %998 = vmatprep.mubr.msk.bf16.mxu1 %vm469_vm0, %v1131_v21 }
  0x46   : > { %563 = vmatmul.mubr.bf16.gmra.mrb[4].mxu0 %v1133_v22  ;;  %627 = vmatmul.mubr.bf16.gmra.mrb[4].mxu1 %v1134_v23 }
  0x47   : > { %991 = vmatprep.mubr.msk.bf16.mxu0 %vm469_vm0, %v1135_v24  ;;  %999 = vmatprep.mubr.msk.bf16.mxu1 %vm469_vm0, %v1137_v25 }
  0x4e   : > { %571 = vmatmul.mubr.bf16.gmra.mrb[8].mxu0 %v1139_v26  ;;  %635 = vmatmul.mubr.bf16.gmra.mrb[8].mxu1 %v1140_v27 }
  0x4f   : > { %992 = vmatprep.mubr.msk.bf16.mxu0 %vm469_vm0, %v1141_v28  ;;  %1000 = vmatprep.mubr.msk.bf16.mxu1 %vm469_vm0, %v1143_v29 }
  0x56   : > { %579 = vmatmul.mubr.bf16.gmra.mrb[12].mxu0 %v1145_v30  ;;  %643 = vmatmul.mubr.bf16.gmra.mrb[12].mxu1 %v1146_v31 }
  0x57   : > { %993 = vmatprep.mubr.msk.bf16.mxu0 %vm469_vm0, %v1147_v32  ;;  %1001 = vmatprep.mubr.msk.bf16.mxu1 %vm469_vm0, %v1149_v33 }
  0x5e   : > { %587 = vmatmul.mubr.bf16.gmra.mrb[16].mxu0 %v1151_v34  ;;  %651 = vmatmul.mubr.bf16.gmra.mrb[16].mxu1 %v1152_v35 }
  0x5f   : > { %994 = vmatprep.mubr.msk.bf16.mxu0 %vm469_vm0, %v1153_v36  ;;  %1002 = vmatprep.mubr.msk.bf16.mxu1 %vm469_vm0, %v1155_v37 }
  0x66   : > { %595 = vmatmul.mubr.bf16.gmra.mrb[20].mxu0 %v1157_v38  ;;  %659 = vmatmul.mubr.bf16.gmra.mrb[20].mxu1 %v1158_v39 }
  0x67   : > { %995 = vmatprep.mubr.msk.bf16.mxu0 %vm469_vm0, %v1159_v40  ;;  %1003 = vmatprep.mubr.msk.bf16.mxu1 %vm469_vm0, %v1161_v41 }
  0x6e   : > { %603 = vmatmul.mubr.bf16.gmra.mrb[24].mxu0 %v1163_v42  ;;  %667 = vmatmul.mubr.bf16.gmra.mrb[24].mxu1 %v1164_v43 }
  0x6f   : > { %996 = vmatprep.mubr.msk.bf16.mxu0 %vm469_vm0, %v1165_v44  ;;  %1004 = vmatprep.mubr.msk.bf16.mxu1 %vm469_vm0, %v1167_v45 }
  0x76   : > { %611 = vmatmul.mubr.bf16.gmra.mrb[28].mxu0 %v1169_v46  ;;  %675 = vmatmul.mubr.bf16.gmra.mrb[28].mxu1 %v1170_v47 }
 0x111   : > { %v556_v49 = vpop.f32.mrb[0].mxu0  ;;  %v620_v50 = vpop.f32.mrb[0].mxu1 }
 0x112   : > { %v557_v51 = vadd.f32 %v1337_v48, %v556_v49  ;;  %v621_v52 = vadd.f32 %v1337_v48, %v620_v50  ;;  %v558_v53 = vpop.f32.mrb[1].mxu0  ;;  %v622_v54 = vpop.f32.mrb[1].mxu1 }
 0x113   : > { %v559_v55 = vpop.f32.mrb[2].mxu0  ;;  %v623_v56 = vpop.f32.mrb[2].mxu1 }
 0x114   : > { %v683_v57 = vmax.f32 %v557_v51, 0.0  ;;  %v699_v58 = vmax.f32 %v621_v52, 0.0  ;;  %v560_v59 = vadd.f32 %v1337_v48, %v559_v55  ;;  %v624_v60 = vadd.f32 %v1337_v48, %v623_v56  ;;  %v561_v61 = vpop.f32.mrb[3].mxu0  ;;  %v625_v62 = vpop.f32.mrb[3].mxu1 }
 0x116   : > { %v1040_v63 = vpack.c.bf16 %v683_v57, %v683_v57  ;;  %v1056_v0 = vpack.c.bf16 %v699_v58, %v699_v58  ;;  %v684_v1 = vmax.f32 %v560_v59, 0.0  ;;  %v700_v2 = vmax.f32 %v624_v60, 0.0 }
 0x118   : > { %844 = vst.msk [vmem:[%s1347_s18] sm:$0xf] %vm843_vm2, %v1040_v63  ;;  %860 = vst.msk [vmem:[%s1347_s18 + $0x40] sm:$0xf] %vm843_vm2, %v1056_v0  ;;  %v1041_v3 = vpack.c.bf16 %v684_v1, %v684_v1  ;;  %v1057_v4 = vpack.c.bf16 %v700_v2, %v700_v2 }
 0x119   : > { %v564_v5 = vpop.f32.mrb[4].mxu0  ;;  %v628_v6 = vpop.f32.mrb[4].mxu1 }
 0x11a   : > { %845 = vst.msk [vmem:[%s1347_s18 + $0x4] sm:$0xf] %vm843_vm2, %v1041_v3  ;;  %861 = vst.msk [vmem:[%s1347_s18 + $0x44] sm:$0xf] %vm843_vm2, %v1057_v4  ;;  %v565_v7 = vadd.f32 %v1337_v48, %v564_v5  ;;  %v629_v8 = vadd.f32 %v1337_v48, %v628_v6  ;;  %v566_v9 = vpop.f32.mrb[5].mxu0  ;;  %v630_v10 = vpop.f32.mrb[5].mxu1 }
 0x11b   : > { %v567_v11 = vpop.f32.mrb[6].mxu0  ;;  %v631_v12 = vpop.f32.mrb[6].mxu1 }
 0x11c   : > { %v685_v13 = vmax.f32 %v565_v7, 0.0  ;;  %v701_v14 = vmax.f32 %v629_v8, 0.0  ;;  %v568_v15 = vadd.f32 %v1337_v48, %v567_v11  ;;  %v632_v16 = vadd.f32 %v1337_v48, %v631_v12  ;;  %v569_v17 = vpop.f32.mrb[7].mxu0  ;;  %v633_v18 = vpop.f32.mrb[7].mxu1 }
 0x11e   : > { %v1042_v19 = vpack.c.bf16 %v685_v13, %v685_v13  ;;  %v1058_v20 = vpack.c.bf16 %v701_v14, %v701_v14  ;;  %v686_v21 = vmax.f32 %v568_v15, 0.0  ;;  %v702_v22 = vmax.f32 %v632_v16, 0.0 }
 0x120   : > { %846 = vst.msk [vmem:[%s1347_s18 + $0x8] sm:$0xf] %vm843_vm2, %v1042_v19  ;;  %862 = vst.msk [vmem:[%s1347_s18 + $0x48] sm:$0xf] %vm843_vm2, %v1058_v20  ;;  %v1043_v23 = vpack.c.bf16 %v686_v21, %v686_v21  ;;  %v1059_v24 = vpack.c.bf16 %v702_v22, %v702_v22 }
 0x121   : > { %v572_v25 = vpop.f32.mrb[8].mxu0  ;;  %v636_v26 = vpop.f32.mrb[8].mxu1 }
 0x122   : > { %847 = vst.msk [vmem:[%s1347_s18 + $0xc] sm:$0xf] %vm843_vm2, %v1043_v23  ;;  %863 = vst.msk [vmem:[%s1347_s18 + $0x4c] sm:$0xf] %vm843_vm2, %v1059_v24  ;;  %v573_v27 = vadd.f32 %v1337_v48, %v572_v25  ;;  %v637_v28 = vadd.f32 %v1337_v48, %v636_v26  ;;  %v574_v29 = vpop.f32.mrb[9].mxu0  ;;  %v638_v30 = vpop.f32.mrb[9].mxu1 }
 0x123   : > { %v575_v31 = vpop.f32.mrb[10].mxu0  ;;  %v639_v32 = vpop.f32.mrb[10].mxu1 }
 0x124   : > { %v687_v33 = vmax.f32 %v573_v27, 0.0  ;;  %v703_v34 = vmax.f32 %v637_v28, 0.0  ;;  %v576_v35 = vadd.f32 %v1337_v48, %v575_v31  ;;  %v640_v36 = vadd.f32 %v1337_v48, %v639_v32  ;;  %v577_v37 = vpop.f32.mrb[11].mxu0  ;;  %v641_v38 = vpop.f32.mrb[11].mxu1 }
 0x126   : > { %v1044_v39 = vpack.c.bf16 %v687_v33, %v687_v33  ;;  %v1060_v40 = vpack.c.bf16 %v703_v34, %v703_v34  ;;  %v688_v41 = vmax.f32 %v576_v35, 0.0  ;;  %v704_v42 = vmax.f32 %v640_v36, 0.0 }
 0x128   : > { %848 = vst.msk [vmem:[%s1347_s18 + $0x10] sm:$0xf] %vm843_vm2, %v1044_v39  ;;  %864 = vst.msk [vmem:[%s1347_s18 + $0x50] sm:$0xf] %vm843_vm2, %v1060_v40  ;;  %v1045_v43 = vpack.c.bf16 %v688_v41, %v688_v41  ;;  %v1061_v44 = vpack.c.bf16 %v704_v42, %v704_v42 }
 0x129   : > { %v580_v45 = vpop.f32.mrb[12].mxu0  ;;  %v644_v46 = vpop.f32.mrb[12].mxu1 }
 0x12a   : > { %849 = vst.msk [vmem:[%s1347_s18 + $0x14] sm:$0xf] %vm843_vm2, %v1045_v43  ;;  %865 = vst.msk [vmem:[%s1347_s18 + $0x54] sm:$0xf] %vm843_vm2, %v1061_v44  ;;  %v581_v47 = vadd.f32 %v1337_v48, %v580_v45  ;;  %v645_v49 = vadd.f32 %v1337_v48, %v644_v46  ;;  %v582_v50 = vpop.f32.mrb[13].mxu0  ;;  %v646_v51 = vpop.f32.mrb[13].mxu1 }
 0x12b   : > { %v583_v52 = vpop.f32.mrb[14].mxu0  ;;  %v647_v53 = vpop.f32.mrb[14].mxu1 }
 0x12c   : > { %v689_v54 = vmax.f32 %v581_v47, 0.0  ;;  %v705_v55 = vmax.f32 %v645_v49, 0.0  ;;  %v584_v56 = vadd.f32 %v1337_v48, %v583_v52  ;;  %v648_v57 = vadd.f32 %v1337_v48, %v647_v53  ;;  %v585_v58 = vpop.f32.mrb[15].mxu0  ;;  %v649_v59 = vpop.f32.mrb[15].mxu1 }
 0x12e   : > { %v1046_v60 = vpack.c.bf16 %v689_v54, %v689_v54  ;;  %v1062_v61 = vpack.c.bf16 %v705_v55, %v705_v55  ;;  %v690_v62 = vmax.f32 %v584_v56, 0.0  ;;  %v706_v63 = vmax.f32 %v648_v57, 0.0 }
 0x130   : > { %850 = vst.msk [vmem:[%s1347_s18 + $0x18] sm:$0xf] %vm843_vm2, %v1046_v60  ;;  %866 = vst.msk [vmem:[%s1347_s18 + $0x58] sm:$0xf] %vm843_vm2, %v1062_v61  ;;  %v1047_v0 = vpack.c.bf16 %v690_v62, %v690_v62  ;;  %v1063_v1 = vpack.c.bf16 %v706_v63, %v706_v63 }
 0x131   : > { %v588_v2 = vpop.f32.mrb[16].mxu0  ;;  %v652_v3 = vpop.f32.mrb[16].mxu1 }
 0x132   : > { %851 = vst.msk [vmem:[%s1347_s18 + $0x1c] sm:$0xf] %vm843_vm2, %v1047_v0  ;;  %867 = vst.msk [vmem:[%s1347_s18 + $0x5c] sm:$0xf] %vm843_vm2, %v1063_v1  ;;  %v589_v4 = vadd.f32 %v1337_v48, %v588_v2  ;;  %v653_v5 = vadd.f32 %v1337_v48, %v652_v3  ;;  %v590_v6 = vpop.f32.mrb[17].mxu0  ;;  %v654_v7 = vpop.f32.mrb[17].mxu1 }
 0x133   : > { %v591_v8 = vpop.f32.mrb[18].mxu0  ;;  %v655_v9 = vpop.f32.mrb[18].mxu1 }
 0x134   : > { %v691_v10 = vmax.f32 %v589_v4, 0.0  ;;  %v707_v11 = vmax.f32 %v653_v5, 0.0  ;;  %v592_v12 = vadd.f32 %v1337_v48, %v591_v8  ;;  %v656_v13 = vadd.f32 %v1337_v48, %v655_v9  ;;  %v593_v14 = vpop.f32.mrb[19].mxu0  ;;  %v657_v15 = vpop.f32.mrb[19].mxu1 }
 0x136   : > { %v1048_v16 = vpack.c.bf16 %v691_v10, %v691_v10  ;;  %v1064_v17 = vpack.c.bf16 %v707_v11, %v707_v11  ;;  %v692_v18 = vmax.f32 %v592_v12, 0.0  ;;  %v708_v19 = vmax.f32 %v656_v13, 0.0 }
 0x138   : > { %852 = vst.msk [vmem:[%s1347_s18 + $0x20] sm:$0xf] %vm843_vm2, %v1048_v16  ;;  %868 = vst.msk [vmem:[%s1347_s18 + $0x60] sm:$0xf] %vm843_vm2, %v1064_v17  ;;  %v1049_v20 = vpack.c.bf16 %v692_v18, %v692_v18  ;;  %v1065_v21 = vpack.c.bf16 %v708_v19, %v708_v19 }
 0x139   : > { %v596_v22 = vpop.f32.mrb[20].mxu0  ;;  %v660_v23 = vpop.f32.mrb[20].mxu1 }
 0x13a   : > { %853 = vst.msk [vmem:[%s1347_s18 + $0x24] sm:$0xf] %vm843_vm2, %v1049_v20  ;;  %869 = vst.msk [vmem:[%s1347_s18 + $0x64] sm:$0xf] %vm843_vm2, %v1065_v21  ;;  %v597_v24 = vadd.f32 %v1337_v48, %v596_v22  ;;  %v661_v25 = vadd.f32 %v1337_v48, %v660_v23  ;;  %v598_v26 = vpop.f32.mrb[21].mxu0  ;;  %v662_v27 = vpop.f32.mrb[21].mxu1 }
 0x13b   : > { %v599_v28 = vpop.f32.mrb[22].mxu0  ;;  %v663_v29 = vpop.f32.mrb[22].mxu1 }
 0x13c   : > { %v693_v30 = vmax.f32 %v597_v24, 0.0  ;;  %v709_v31 = vmax.f32 %v661_v25, 0.0  ;;  %v600_v32 = vadd.f32 %v1337_v48, %v599_v28  ;;  %v664_v33 = vadd.f32 %v1337_v48, %v663_v29  ;;  %v601_v34 = vpop.f32.mrb[23].mxu0  ;;  %v665_v35 = vpop.f32.mrb[23].mxu1 }
 0x13e   : > { %v1050_v36 = vpack.c.bf16 %v693_v30, %v693_v30  ;;  %v1066_v37 = vpack.c.bf16 %v709_v31, %v709_v31  ;;  %v694_v38 = vmax.f32 %v600_v32, 0.0  ;;  %v710_v39 = vmax.f32 %v664_v33, 0.0 }
 0x140   : > { %854 = vst.msk [vmem:[%s1347_s18 + $0x28] sm:$0xf] %vm843_vm2, %v1050_v36  ;;  %870 = vst.msk [vmem:[%s1347_s18 + $0x68] sm:$0xf] %vm843_vm2, %v1066_v37  ;;  %v1051_v40 = vpack.c.bf16 %v694_v38, %v694_v38  ;;  %v1067_v41 = vpack.c.bf16 %v710_v39, %v710_v39 }
 0x141   : > { %v604_v42 = vpop.f32.mrb[24].mxu0  ;;  %v668_v43 = vpop.f32.mrb[24].mxu1 }
 0x142   : > { %855 = vst.msk [vmem:[%s1347_s18 + $0x2c] sm:$0xf] %vm843_vm2, %v1051_v40  ;;  %871 = vst.msk [vmem:[%s1347_s18 + $0x6c] sm:$0xf] %vm843_vm2, %v1067_v41  ;;  %v605_v44 = vadd.f32 %v1337_v48, %v604_v42  ;;  %v669_v45 = vadd.f32 %v1337_v48, %v668_v43  ;;  %v606_v46 = vpop.f32.mrb[25].mxu0  ;;  %v670_v47 = vpop.f32.mrb[25].mxu1 }
 0x143   : > { %v607_v49 = vpop.f32.mrb[26].mxu0  ;;  %v671_v50 = vpop.f32.mrb[26].mxu1 }
 0x144   : > { %v695_v51 = vmax.f32 %v605_v44, 0.0  ;;  %v711_v52 = vmax.f32 %v669_v45, 0.0  ;;  %v608_v53 = vadd.f32 %v1337_v48, %v607_v49  ;;  %v672_v54 = vadd.f32 %v1337_v48, %v671_v50  ;;  %v609_v55 = vpop.f32.mrb[27].mxu0  ;;  %v673_v56 = vpop.f32.mrb[27].mxu1 }
 0x146   : > { %v1052_v57 = vpack.c.bf16 %v695_v51, %v695_v51  ;;  %v1068_v58 = vpack.c.bf16 %v711_v52, %v711_v52  ;;  %v696_v59 = vmax.f32 %v608_v53, 0.0  ;;  %v712_v60 = vmax.f32 %v672_v54, 0.0 }
 0x148   : > { %856 = vst.msk [vmem:[%s1347_s18 + $0x30] sm:$0xf] %vm843_vm2, %v1052_v57  ;;  %872 = vst.msk [vmem:[%s1347_s18 + $0x70] sm:$0xf] %vm843_vm2, %v1068_v58  ;;  %v1053_v61 = vpack.c.bf16 %v696_v59, %v696_v59  ;;  %v1069_v62 = vpack.c.bf16 %v712_v60, %v712_v60 }
 0x149   : > { %v612_v63 = vpop.f32.mrb[28].mxu0  ;;  %v676_v0 = vpop.f32.mrb[28].mxu1 }
 0x14a   : > { %857 = vst.msk [vmem:[%s1347_s18 + $0x34] sm:$0xf] %vm843_vm2, %v1053_v61  ;;  %873 = vst.msk [vmem:[%s1347_s18 + $0x74] sm:$0xf] %vm843_vm2, %v1069_v62  ;;  %v613_v1 = vadd.f32 %v1337_v48, %v612_v63  ;;  %v677_v2 = vadd.f32 %v1337_v48, %v676_v0  ;;  %v614_v3 = vpop.f32.mrb[29].mxu0  ;;  %v678_v4 = vpop.f32.mrb[29].mxu1 }
 0x14b   : > { %v615_v5 = vpop.f32.mrb[30].mxu0  ;;  %v679_v6 = vpop.f32.mrb[30].mxu1 }
 0x14c   : > { %v697_v7 = vmax.f32 %v613_v1, 0.0  ;;  %v713_v8 = vmax.f32 %v677_v2, 0.0  ;;  %v616_v9 = vadd.f32 %v1337_v48, %v615_v5  ;;  %v680_v10 = vadd.f32 %v1337_v48, %v679_v6  ;;  %v617_v11 = vpop.f32.mrb[31].mxu0  ;;  %v681_v12 = vpop.f32.mrb[31].mxu1 }
 0x14e   : > { %v1054_v13 = vpack.c.bf16 %v697_v7, %v697_v7  ;;  %v1070_v14 = vpack.c.bf16 %v713_v8, %v713_v8  ;;  %v698_v15 = vmax.f32 %v616_v9, 0.0  ;;  %v714_v16 = vmax.f32 %v680_v10, 0.0 }
 0x150   : > { %858 = vst.msk [vmem:[%s1347_s18 + $0x38] sm:$0xf] %vm843_vm2, %v1054_v13  ;;  %874 = vst.msk [vmem:[%s1347_s18 + $0x78] sm:$0xf] %vm843_vm2, %v1070_v14  ;;  %v1055_v17 = vpack.c.bf16 %v698_v15, %v698_v15  ;;  %v1071_v18 = vpack.c.bf16 %v714_v16, %v714_v16 }
 0x152   : > { %859 = vst.msk [vmem:[%s1347_s18 + $0x3c] sm:$0xf] %vm843_vm2, %v1055_v17  ;;  %875 = vst.msk [vmem:[%s1347_s18 + $0x7c] sm:$0xf] %vm843_vm2, %v1071_v18 }
 0x153 PF: > { %s13_s12 = sadd.s32 1, %s1177_s12  }
 0x154   : > { %p10_p4 = scmp.ge.s32.totalorder %s13_s12, 4  }
 0x156   :  { %12 = sbr.rel (!%p10_p4) target bundleno = 1 (0x1), region = 62 }

// kernel: hourglass_forward.10
= control target key start
LH: loop header
LB: loop body
LE: loop exit
PB: predicated region body
PF: predicated region fallthrough
CT: control target
= control target key end

     0   :  { %s584_s12 = smov 0   ;;  %s684_s0 = inlined_call_operand.vmem [shape: bf16[64,216], index: 0, kind: input, shape index: {}]   ;;  %s685_s1 = inlined_call_operand.vmem [shape: bf16[216,16], index: 1, kind: input, shape index: {}]   ;;  %s686_s2 = inlined_call_operand.vmem [shape: f32[1,16], index: 2, kind: input, shape index: {}]   ;;  %s687_s3 = inlined_call_operand.vmem [shape: bf16[64,16], index: 3, kind: output, shape index: {}]  }
   0x1 LB: > { %s456_s13 = sadd.s32 4294967295, %s561_s12   ;;  %p460_p0 = scmp.ge.s32.totalorder %s561_s12, 1  ;;  %s561_s12 = sphi %s584_s12, %s13_s12  }
   0x2   : > { %p139_p1 = scmp.lt.s32.totalorder %s561_s12, 3 }
   0x4   : > { %p140_p2 = pnand %p460_p0, %p139_p1 }
   0x5   : > { %v535_v0 = vld [vmem:[%s685_s1] sm:$0xff] (!%p140_p2)   ;;  %v563_v1 = vmov (!%p140_p2), 0   ;;  %v536_v2 = vld [vmem:[%s685_s1 + $0x8] sm:$0xff] (!%p140_p2)   ;;  %s461_s18 = sshll.u32 (!%p140_p2), %s456_s13, 2  ;;  %v537_v3 = vld [vmem:[%s685_s1 + $0x10] sm:$0xff] (!%p140_p2)   ;;  %vm315_vm0 = vcmask (!%p140_p2), 719872  }
   0x6   : > { %143 = sbr.rel (%p140_p2) target bundleno = 283 (0x11b), region = 32  ;;  %326 = vmatprep.subr.bf16.mxu0 (!%p140_p2), %v563_v1  ;;  %498 = vmatprep.subr.bf16.mxu1 (!%p140_p2), %v563_v1  ;;  %p165_p3 = scmp.lt.s32.totalorder (!%p140_p2), %s461_s18, 7  ;;  %v538_v4 = vld [vmem:[%s685_s1 + $0x18] sm:$0xff] (!%p140_p2)   ;;  %v539_v5 = vld [vmem:[%s685_s1 + $0x20] sm:$0xff] (!%p140_p2)   ;;  %v540_v8 = vld [vmem:[%s685_s1 + $0x28] sm:$0xff] (!%p140_p2)   ;;  %vm322_vm1 = vcmask (!%p140_p2), 1043456  }
   0x7   : > { %327 = vmatpush1.bf16.msra.mxu0 (!%p140_p2), %v535_v0  ;;  %512 = vmatpush1.bf16.msra.mxu1 (!%p140_p2), %v535_v0  ;;  %v541_v9 = vld [vmem:[%s685_s1 + $0x30] sm:$0xff] (!%p140_p2)   ;;  %v542_v10 = vld [vmem:[%s685_s1 + $0x38] sm:$0xff] (!%p140_p2)   ;;  %v543_v11 = vld [vmem:[%s685_s1 + $0x40] sm:$0xff] (!%p140_p2)   ;;  %vm395_vm2 = vcmask (!%p140_p2), 125952  }
   0x8   : > { %328 = vmatprep.subr.bf16.mxu0 (!%p140_p2), %v563_v1  ;;  %499 = vmatprep.subr.bf16.mxu1 (!%p140_p2), %v563_v1  ;;  %v544_v12 = vld [vmem:[%s685_s1 + $0x48] sm:$0xff] (!%p140_p2)   ;;  %v545_v13 = vld [vmem:[%s685_s1 + $0x50] sm:$0xff] (!%p140_p2)   ;;  %v546_v14 = vld [vmem:[%s685_s1 + $0x58] sm:$0xff] (!%p140_p2)  }
   0x9   : > { %v547_v15 = vld [vmem:[%s685_s1 + $0x60] sm:$0xff] (!%p140_p2)   ;;  %v548_v16 = vld [vmem:[%s685_s1 + $0x68] ss:$0 sps:$4 sm:$0xff] (!%p140_p2)  }
   0xa   : > { %v324_v17 = vsel (!%p140_p2), %vm322_vm1, %v548_v16, 0  ;;  %v466_v20 = vld [vmem:[%s686_s2] ss:$0 sm:$0xff] (!%p140_p2) }
   0xb   : > { %329 = vmatpush1.bf16.msra.mxu0 (!%p140_p2), %v536_v2  ;;  %513 = vmatpush1.bf16.msra.mxu1 (!%p140_p2), %v536_v2 }
   0xc   : > { %330 = vmatprep.subr.bf16.mxu0 (!%p140_p2), %v563_v1  ;;  %500 = vmatprep.subr.bf16.mxu1 (!%p140_p2), %v563_v1 }
   0xd   : > { %s689_s18 = smov (!%p165_p3, %s461_s18), 7 }
   0xe   : > { %s493_s21 = sshll.u32 %s689_s18, 3  ;;  %s465_s24 = sshll.u32 %s689_s18, 2 }
   0xf   : > { %331 = vmatpush1.bf16.msra.mxu0 %v537_v3  ;;  %514 = vmatpush1.bf16.msra.mxu1 %v537_v3  ;;  %s618_s26 = scalar_lea.vmem %s684_s0, %s493_s21  ;;  %s175_s27 = scalar_lea.vmem %s687_s3, %s465_s24 }
  0x10   : > { %332 = vmatprep.subr.bf16.mxu0 %v563_v1  ;;  %501 = vmatprep.subr.bf16.mxu1 %v563_v1  ;;  %v551_v6 = vld [vmem:[%s618_s26 + $0x4] ss:$8 sps:$4 sm:$0xff]   ;;  %v554_v7 = vld [vmem:[%s618_s26 + $0x14] ss:$8 sps:$4 sm:$0xff]   ;;  %v549_v18 = vld [vmem:[%s618_s26] ss:$8 sps:$4 sm:$0xff]  }
  0x11   : > { %485 = vmatprep.mubr.msk.bf16.mxu0 %vm315_vm0, %v551_v6  ;;  %486 = vmatprep.mubr.msk.bf16.mxu1 %vm315_vm0, %v554_v7  ;;  %v552_v19 = vld [vmem:[%s618_s26 + $0x10] ss:$8 sps:$4 sm:$0xff]  }
  0x13   : > { %333 = vmatpush1.bf16.msra.mxu0 %v538_v4  ;;  %515 = vmatpush1.bf16.msra.mxu1 %v538_v4 }
  0x14   : > { %334 = vmatprep.subr.bf16.mxu0 %v563_v1  ;;  %502 = vmatprep.subr.bf16.mxu1 %v563_v1 }
  0x17   : > { %335 = vmatpush1.bf16.msra.mxu0 %v539_v5  ;;  %516 = vmatpush1.bf16.msra.mxu1 %v539_v5 }
  0x18   : > { %336 = vmatprep.subr.bf16.mxu0 %v563_v1  ;;  %503 = vmatprep.subr.bf16.mxu1 %v563_v1 }
  0x1b   : > { %337 = vmatpush1.bf16.msra.mxu0 %v540_v8  ;;  %517 = vmatpush1.bf16.msra.mxu1 %v540_v8 }
  0x1c   : > { %338 = vmatprep.subr.bf16.mxu0 %v563_v1  ;;  %504 = vmatprep.subr.bf16.mxu1 %v563_v1 }
  0x1f   : > { %339 = vmatpush1.bf16.msra.mxu0 %v541_v9  ;;  %518 = vmatpush1.bf16.msra.mxu1 %v541_v9 }
  0x20   : > { %340 = vmatprep.subr.bf16.mxu0 %v563_v1  ;;  %505 = vmatprep.subr.bf16.mxu1 %v563_v1 }
  0x23   : > { %341 = vmatpush1.bf16.msra.mxu0 %v542_v10  ;;  %519 = vmatpush1.bf16.msra.mxu1 %v542_v10 }
  0x24   : > { %342 = vmatprep.subr.bf16.mxu0 %v563_v1  ;;  %506 = vmatprep.subr.bf16.mxu1 %v563_v1 }
  0x27   : > { %343 = vmatpush1.bf16.msra.mxu0 %v543_v11  ;;  %520 = vmatpush1.bf16.msra.mxu1 %v543_v11 }
  0x28   : > { %344 = vmatprep.subr.bf16.mxu0 %v563_v1  ;;  %507 = vmatprep.subr.bf16.mxu1 %v563_v1 }
  0x2b   : > { %345 = vmatpush1.bf16.msra.mxu0 %v544_v12  ;;  %521 = vmatpush1.bf16.msra.mxu1 %v544_v12 }
  0x2c   : > { %346 = vmatprep.subr.bf16.mxu0 %v563_v1  ;;  %508 = vmatprep.subr.bf16.mxu1 %v563_v1 }
  0x2f   : > { %347 = vmatpush1.bf16.msra.mxu0 %v545_v13  ;;  %522 = vmatpush1.bf16.msra.mxu1 %v545_v13 }
  0x30   : > { %348 = vmatprep.subr.bf16.mxu0 %v563_v1  ;;  %509 = vmatprep.subr.bf16.mxu1 %v563_v1 }
  0x33   : > { %349 = vmatpush1.bf16.msra.mxu0 %v546_v14  ;;  %523 = vmatpush1.bf16.msra.mxu1 %v546_v14 }
  0x34   : > { %350 = vmatprep.subr.bf16.mxu0 %v563_v1  ;;  %510 = vmatprep.subr.bf16.mxu1 %v563_v1 }
  0x37   : > { %351 = vmatpush1.bf16.msra.mxu0 %v547_v15  ;;  %524 = vmatpush1.bf16.msra.mxu1 %v547_v15 }
  0x38   : > { %352 = vmatprep.subr.bf16.mxu0 %v563_v1  ;;  %511 = vmatprep.subr.bf16.mxu1 %v563_v1 }
  0x3b   : > { %353 = vmatpush1.bf16.msra.mxu0 %v324_v17  ;;  %525 = vmatpush1.bf16.msra.mxu1 %v324_v17 }
  0x3e   : > { %359 = vmatmul.mubr.bf16.vlgmr.msra.gmra.mrb[0].mxu0 %v549_v18  ;;  %367 = vmatmul.mubr.bf16.vlgmr.msra.gmra.mrb[0].mxu1 %v552_v19 }
 0x111   : > { %v360_v21 = vpop.f32.mrb[0].mxu0  ;;  %v368_v22 = vpop.f32.mrb[0].mxu1 }
 0x112   : > { %v361_v23 = vadd.f32 %v466_v20, %v360_v21  ;;  %v369_v24 = vadd.f32 %v466_v20, %v368_v22  ;;  %v362_v25 = vpop.f32.mrb[1].mxu0  ;;  %v370_v26 = vpop.f32.mrb[1].mxu1 }
 0x113   : > { %v363_v27 = vpop.f32.mrb[2].mxu0  ;;  %v371_v28 = vpop.f32.mrb[2].mxu1 }
 0x114   : > { %v375_v29 = vmax.f32 %v361_v23, 0.0  ;;  %v377_v30 = vmax.f32 %v369_v24, 0.0  ;;  %v364_v31 = vadd.f32 %v466_v20, %v363_v27  ;;  %v372_v32 = vadd.f32 %v466_v20, %v371_v28  ;;  %v365_v33 = vpop.f32.mrb[3].mxu0  ;;  %v373_v34 = vpop.f32.mrb[3].mxu1 }
 0x116   : > { %v494_v35 = vpack.c.bf16 %v375_v29, %v375_v29  ;;  %v376_v36 = vmax.f32 %v364_v31, 0.0  ;;  %v378_v37 = vmax.f32 %v372_v32, 0.0  ;;  %v496_v38 = vpack.c.bf16 %v377_v30, %v377_v30 }
 0x118   : > { %396 = vst.msk [vmem:[%s175_s27] sm:$0xf] %vm395_vm2, %v494_v35  ;;  %v495_v39 = vpack.c.bf16 %v376_v36, %v376_v36  ;;  %v497_v40 = vpack.c.bf16 %v378_v37, %v378_v37  ;;  %398 = vst.msk [vmem:[%s175_s27 + $0x8] sm:$0xf] %vm395_vm2, %v496_v38 }
 0x11a   : > { %397 = vst.msk [vmem:[%s175_s27 + $0x4] sm:$0xf] %vm395_vm2, %v495_v39  ;;  %399 = vst.msk [vmem:[%s175_s27 + $0xc] sm:$0xf] %vm395_vm2, %v497_v40 }
 0x11b PF: > { %s13_s12 = sadd.s32 1, %s561_s12  }
 0x11c   : > { %p10_p4 = scmp.ge.s32.totalorder %s13_s12, 4  }
 0x11e   :  { %12 = sbr.rel (!%p10_p4) target bundleno = 1 (0x1), region = 62 }

// kernel: hourglass_forward.11
= control target key start
LH: loop header
LB: loop body
LE: loop exit
PB: predicated region body
PF: predicated region fallthrough
CT: control target
= control target key end

     0   :  { %s797_s12 = smov 0   ;;  %s929_s0 = inlined_call_operand.vmem [shape: bf16[64,432], index: 0, kind: input, shape index: {}]   ;;  %s930_s1 = inlined_call_operand.vmem [shape: bf16[432,16], index: 1, kind: input, shape index: {}]   ;;  %s931_s2 = inlined_call_operand.vmem [shape: f32[1,16], index: 2, kind: input, shape index: {}]   ;;  %s932_s3 = inlined_call_operand.vmem [shape: bf16[64,16], index: 3, kind: output, shape index: {}]  }
   0x1 LB: > { %s633_s13 = sadd.s32 4294967295, %s774_s12   ;;  %p637_p0 = scmp.ge.s32.totalorder %s774_s12, 1  ;;  %s774_s12 = sphi %s797_s12, %s13_s12  }
   0x2   : > { %p139_p1 = scmp.lt.s32.totalorder %s774_s12, 3 }
   0x4   : > { %p140_p2 = pnand %p637_p0, %p139_p1 }
   0x5   : > { %v729_v0 = vld [vmem:[%s930_s1 + $0x80] sm:$0xff] (!%p140_p2)   ;;  %v776_v1 = vmov (!%p140_p2), 0   ;;  %v732_v4 = vld [vmem:[%s930_s1 + $0x88] sm:$0xff] (!%p140_p2)   ;;  %v735_v7 = vld [vmem:[%s930_s1 + $0x90] sm:$0xff] (!%p140_p2)   ;;  %s638_s7 = sshll.u32 (!%p140_p2), %s633_s13, 2  ;;  %vm447_vm0 = vcmask (!%p140_p2), 392192  }
   0x6   : > { %143 = sbr.rel (%p140_p2) target bundleno = 279 (0x117), region = 32  ;;  %503 = vmatprep.subr.bf16.mxu1 (!%p140_p2), %v776_v1  ;;  %v730_v2 = vld [vmem:[%s930_s1 + $0x40] sm:$0xff] (!%p140_p2)   ;;  %v733_v5 = vld [vmem:[%s930_s1 + $0x48] sm:$0xff] (!%p140_p2)   ;;  %v736_v8 = vld [vmem:[%s930_s1 + $0x50] sm:$0xff] (!%p140_p2)   ;;  %p165_p3 = scmp.lt.s32.totalorder (!%p140_p2), %s638_s7, 7  ;;  %vm572_vm1 = vcmask (!%p140_p2), 125952  }
   0x7   : > { %504 = vmatpush1.bf16.msra.mxu1 (!%p140_p2), %v729_v0  ;;  %v731_v3 = vld [vmem:[%s930_s1] sm:$0xff] (!%p140_p2)   ;;  %692 = vmatprep.subr.bf16.mxu0 (!%p140_p2), %v730_v2  ;;  %v734_v6 = vld [vmem:[%s930_s1 + $0x8] sm:$0xff] (!%p140_p2)   ;;  %v737_v9 = vld [vmem:[%s930_s1 + $0x10] sm:$0xff] (!%p140_p2)  }
   0x8   : > { %505 = vmatprep.subr.bf16.mxu1 (!%p140_p2), %v776_v1  ;;  %693 = vmatpush3.bf16.msra.mxu0 (!%p140_p2), %v731_v3  ;;  %v738_v10 = vld [vmem:[%s930_s1 + $0x98] sm:$0xff] (!%p140_p2)   ;;  %v742_v13 = vld [vmem:[%s930_s1 + $0x60] sm:$0xff] (!%p140_p2)   ;;  %v745_v16 = vld [vmem:[%s930_s1 + $0x68] sm:$0xff] (!%p140_p2)  }
   0x9   : > { %694 = vmatprep.subr.bf16.mxu0 (!%p140_p2), %v733_v5  ;;  %v739_v11 = vld [vmem:[%s930_s1 + $0x58] sm:$0xff] (!%p140_p2)   ;;  %v741_v14 = vld [vmem:[%s930_s1 + $0xa0] sm:$0xff] (!%p140_p2)   ;;  %v744_v17 = vld [vmem:[%s930_s1 + $0xa8] sm:$0xff] (!%p140_p2)  }
   0xa   : > { %v740_v12 = vld [vmem:[%s930_s1 + $0x18] sm:$0xff] (!%p140_p2)   ;;  %v743_v15 = vld [vmem:[%s930_s1 + $0x20] sm:$0xff] (!%p140_p2)   ;;  %v746_v18 = vld [vmem:[%s930_s1 + $0x28] sm:$0xff] (!%p140_p2)  }
   0xb   : > { %506 = vmatpush1.bf16.msra.mxu1 (!%p140_p2), %v732_v4  ;;  %v748_v19 = vld [vmem:[%s930_s1 + $0x70] sm:$0xff] (!%p140_p2)   ;;  %v750_v22 = vld [vmem:[%s930_s1 + $0xb8] sm:$0xff] (!%p140_p2)   ;;  %v753_v26 = vld [vmem:[%s930_s1 + $0xc0] sm:$0xff] (!%p140_p2)  }
   0xc   : > { %507 = vmatprep.subr.bf16.mxu1 (!%p140_p2), %v776_v1  ;;  %695 = vmatpush3.bf16.msra.mxu0 (!%p140_p2), %v734_v6  ;;  %v747_v20 = vld [vmem:[%s930_s1 + $0xb0] sm:$0xff] (!%p140_p2)   ;;  %v751_v23 = vld [vmem:[%s930_s1 + $0x78] sm:$0xff] (!%p140_p2)   ;;  %v757_v30 = vld [vmem:[%s930_s1 + $0xc8] sm:$0xff] (!%p140_p2)  }
   0xd   : > { %696 = vmatprep.subr.bf16.mxu0 %v736_v8  ;;  %s934_s7 = smov (!%p165_p3, %s638_s7), 7  ;;  %v749_v21 = vld [vmem:[%s930_s1 + $0x30] sm:$0xff]   ;;  %v752_v25 = vld [vmem:[%s930_s1 + $0x38] sm:$0xff]   ;;  %v643_v42 = vld [vmem:[%s931_s2] ss:$0 sm:$0xff] }
   0xe   : > { %s687_s25 = sshll.u32 %s934_s7, 4  ;;  %v758_v31 = vld [vmem:[%s930_s1 + $0xd0] sm:$0xff]   ;;  %s642_s24 = sshll.u32 %s934_s7, 2 }
   0xf   : > { %508 = vmatpush1.bf16.msra.mxu1 %v735_v7  ;;  %s881_s8 = scalar_lea.vmem %s929_s0, %s687_s25  ;;  %s175_s27 = scalar_lea.vmem %s932_s3, %s642_s24 }
  0x10   : > { %509 = vmatprep.subr.bf16.mxu1 %v776_v1  ;;  %697 = vmatpush3.bf16.msra.mxu0 %v737_v9  ;;  %v756_v24 = vld [vmem:[%s881_s8 + $0x4] ss:$16 sps:$4 sm:$0xff]   ;;  %v763_v27 = vld [vmem:[%s881_s8 + $0xc] ss:$16 sps:$4 sm:$0xff]   ;;  %v754_v28 = vld [vmem:[%s881_s8] ss:$16 sps:$4 sm:$0xff]  }
  0x11   : > { %698 = vmatprep.subr.bf16.mxu0 %v739_v11  ;;  %486 = vmatprep.mubr.bf16.mxu0 %v756_v24  ;;  %v759_v29 = vld [vmem:[%s881_s8 + $0x24] ss:$16 sps:$4 sm:$0xff]   ;;  %v764_v32 = vld [vmem:[%s881_s8 + $0x20] ss:$16 sps:$4 sm:$0xff]   ;;  %v761_v33 = vld [vmem:[%s881_s8 + $0x8] ss:$16 sps:$4 sm:$0xff]  }
  0x12   : > { %679 = vmatprep.mubr.msk.bf16.mxu1 %vm447_vm0, %v763_v27  ;;  %v765_v34 = vld [vmem:[%s881_s8 + $0x2c] ss:$16 sps:$4 sm:$0xff]   ;;  %v767_v35 = vld [vmem:[%s881_s8 + $0x28] ss:$16 sps:$4 sm:$0xff]  }
  0x13   : > { %510 = vmatpush1.bf16.msra.mxu1 %v738_v10 }
  0x14   : > { %511 = vmatprep.subr.bf16.mxu1 %v776_v1  ;;  %699 = vmatpush3.bf16.msra.mxu0 %v740_v12 }
  0x15   : > { %700 = vmatprep.subr.bf16.mxu0 %v742_v13 }
  0x17   : > { %512 = vmatpush1.bf16.msra.mxu1 %v741_v14 }
  0x18   : > { %513 = vmatprep.subr.bf16.mxu1 %v776_v1  ;;  %701 = vmatpush3.bf16.msra.mxu0 %v743_v15 }
  0x19   : > { %702 = vmatprep.subr.bf16.mxu0 %v745_v16 }
  0x1b   : > { %514 = vmatpush1.bf16.msra.mxu1 %v744_v17 }
  0x1c   : > { %515 = vmatprep.subr.bf16.mxu1 %v776_v1  ;;  %703 = vmatpush3.bf16.msra.mxu0 %v746_v18 }
  0x1d   : > { %704 = vmatprep.subr.bf16.mxu0 %v748_v19 }
  0x1f   : > { %516 = vmatpush1.bf16.msra.mxu1 %v747_v20 }
  0x20   : > { %517 = vmatprep.subr.bf16.mxu1 %v776_v1  ;;  %705 = vmatpush3.bf16.msra.mxu0 %v749_v21 }
  0x21   : > { %706 = vmatprep.subr.bf16.mxu0 %v751_v23 }
  0x23   : > { %518 = vmatpush1.bf16.msra.mxu1 %v750_v22 }
  0x24   : > { %519 = vmatprep.subr.bf16.mxu1 %v776_v1  ;;  %707 = vmatpush3.bf16.msra.mxu0 %v752_v25 }
  0x27   : > { %520 = vmatpush1.bf16.msra.mxu1 %v753_v26  ;;  %487 = vmatmul.mubr.bf16.vlgmr.msra.gmra.mrb[0].mxu0 %v754_v28 }
  0x28   : > { %521 = vmatprep.subr.bf16.mxu1 %v776_v1  ;;  %494 = vmatprep.mubr.bf16.mxu0 %v759_v29 }
  0x2b   : > { %522 = vmatpush1.bf16.msra.mxu1 %v757_v30 }
  0x2c   : > { %523 = vmatprep.subr.bf16.mxu1 %v776_v1 }
  0x2f   : > { %524 = vmatpush1.bf16.msra.mxu1 %v758_v31  ;;  %495 = vmatmul.mubr.bf16.gmra.mrb[4].mxu0 %v764_v32 }
  0x32   : > { %536 = vmatmul.mubr.bf16.vlgmr.msra.gmra.mrb[0].mxu1 %v761_v33 }
  0x33   : > { %680 = vmatprep.mubr.msk.bf16.mxu1 %vm447_vm0, %v765_v34 }
  0x3a   : > { %544 = vmatmul.mubr.bf16.gmra.mrb[4].mxu1 %v767_v35 }
  0xfa   : > { %v708_v36 = vpop.f32.mrb[0].mxu0 }
  0xfb   : > { %v709_v37 = vpop.f32.mrb[1].mxu0 }
  0xfc   : > { %v710_v38 = vadd.f32 %v709_v37, %v708_v36  ;;  %v711_v39 = vpop.f32.mrb[2].mxu0 }
  0xfd   : > { %v712_v40 = vpop.f32.mrb[3].mxu0 }
  0xfe   : > { %v713_v41 = vadd.f32 %v712_v40, %v711_v39  ;;  %v489_v43 = vadd.f32 %v710_v38, %v643_v42 }
 0x100   : > { %v492_v51 = vadd.f32 %v713_v41, %v643_v42 }
 0x102   : > { %v714_v44 = vpop.f32.mrb[4].mxu0 }
 0x103   : > { %v715_v45 = vpop.f32.mrb[5].mxu0 }
 0x104   : > { %v716_v47 = vadd.f32 %v715_v45, %v714_v44  ;;  %v717_v48 = vpop.f32.mrb[6].mxu0 }
 0x105   : > { %v537_v46 = vpop.f32.mrb[0].mxu1  ;;  %v718_v52 = vpop.f32.mrb[7].mxu0 }
 0x106   : > { %v538_v49 = vadd.f32 %v537_v46, %v489_v43  ;;  %v539_v50 = vpop.f32.mrb[1].mxu1  ;;  %v719_v54 = vadd.f32 %v718_v52, %v717_v48  ;;  %v497_v60 = vadd.f32 %v716_v47, %v643_v42 }
 0x107   : > { %v540_v53 = vpop.f32.mrb[2].mxu1 }
 0x108   : > { %v552_v55 = vmax.f32 %v538_v49, 0.0  ;;  %v541_v56 = vadd.f32 %v540_v53, %v492_v51  ;;  %v542_v57 = vpop.f32.mrb[3].mxu1  ;;  %v500_v1 = vadd.f32 %v719_v54, %v643_v42 }
 0x10a   : > { %v688_v58 = vpack.c.bf16 %v552_v55, %v552_v55  ;;  %v553_v59 = vmax.f32 %v541_v56, 0.0 }
 0x10c   : > { %573 = vst.msk [vmem:[%s175_s27] sm:$0xf] %vm572_vm1, %v688_v58  ;;  %v689_v61 = vpack.c.bf16 %v553_v59, %v553_v59 }
 0x10d   : > { %v545_v62 = vpop.f32.mrb[4].mxu1 }
 0x10e   : > { %574 = vst.msk [vmem:[%s175_s27 + $0x4] sm:$0xf] %vm572_vm1, %v689_v61  ;;  %v546_v63 = vadd.f32 %v545_v62, %v497_v60  ;;  %v547_v0 = vpop.f32.mrb[5].mxu1 }
 0x10f   : > { %v548_v2 = vpop.f32.mrb[6].mxu1 }
 0x110   : > { %v554_v3 = vmax.f32 %v546_v63, 0.0  ;;  %v549_v4 = vadd.f32 %v548_v2, %v500_v1  ;;  %v550_v5 = vpop.f32.mrb[7].mxu1 }
 0x112   : > { %v690_v6 = vpack.c.bf16 %v554_v3, %v554_v3  ;;  %v555_v7 = vmax.f32 %v549_v4, 0.0 }
 0x114   : > { %575 = vst.msk [vmem:[%s175_s27 + $0x8] sm:$0xf] %vm572_vm1, %v690_v6  ;;  %v691_v8 = vpack.c.bf16 %v555_v7, %v555_v7 }
 0x116   : > { %576 = vst.msk [vmem:[%s175_s27 + $0xc] sm:$0xf] %vm572_vm1, %v691_v8 }
 0x117 PF: > { %s13_s12 = sadd.s32 1, %s774_s12  }
 0x118   : > { %p10_p4 = scmp.ge.s32.totalorder %s13_s12, 4  }
 0x11a   :  { %12 = sbr.rel (!%p10_p4) target bundleno = 1 (0x1), region = 62 }

// kernel: hourglass_forward.12
= control target key start
LH: loop header
LB: loop body
LE: loop exit
PB: predicated region body
PF: predicated region fallthrough
CT: control target
= control target key end

     0   :  { %s941_s12 = smov 0   ;;  %s1105_s0 = inlined_call_operand.vmem [shape: bf16[512,8], index: 0, kind: input, shape index: {}]   ;;  %s1106_s1 = inlined_call_operand.vmem [shape: bf16[8,8], index: 1, kind: input, shape index: {}]   ;;  %s1107_s2 = inlined_call_operand.vmem [shape: f32[1,8], index: 2, kind: input, shape index: {}]   ;;  %s1108_s3 = inlined_call_operand.vmem [shape: bf16[512,8], index: 3, kind: output, shape index: {}]  }
   0x1 LB: > { %s726_s13 = sadd.s32 4294967295, %s919_s12   ;;  %p730_p0 = scmp.ge.s32.totalorder %s919_s12, 1  ;;  %s919_s12 = sphi %s941_s12, %s13_s12  }
   0x2   : > { %p138_p1 = scmp.lt.s32.totalorder %s919_s12, 3 }
   0x4   : > { %p139_p2 = pnand %p730_p0, %p138_p1 }
   0x5   : > { %v207_v0 = vld [vmem:[%s1106_s1] sm:$0xf] (!%p139_p2)  ;;  %vm344_vm0 = vcmask (!%p139_p2), 1043456   ;;  %s731_s16 = sshll.u32 (!%p139_p2), %s726_s13, 5  ;;  %vm295_vm1 = vcmask (!%p139_p2), 64512   ;;  %vm637_vm2 = vcmask (!%p139_p2), 60416  }
   0x6   : > { %142 = sbr.rel (%p139_p2) target bundleno = 263 (0x107), region = 32  ;;  %887 = vmatprep.subr.msk.bf16.mxu0 (!%p139_p2), %vm344_vm0, %v207_v0  ;;  %888 = vmatprep.subr.msk.bf16.mxu1 (!%p139_p2), %vm344_vm0, %v207_v0  ;;  %v346_v1 = vsel (!%p139_p2), %vm344_vm0, %v207_v0, 0  ;;  %p163_p3 = scmp.lt.s32.totalorder (!%p139_p2), %s731_s16, 63  ;;  %v997_v18 = vld [vmem:[%s1107_s2] ss:$0 sm:$0xff] (!%p139_p2) }
   0x7   : > { %852 = vmatpush3.bf16.msra.mxu0 (!%p139_p2), %v346_v1  ;;  %886 = vmatpush3.bf16.msra.mxu1 (!%p139_p2), %v346_v1 }
   0xd   : > { %s1110_s16 = smov (!%p163_p3, %s731_s16), 63 }
   0xe   : > { %s732_s17 = sshll.u32 %s1110_s16, 2 }
   0xf   : > { %s960_s20 = scalar_lea.vmem %s1105_s0, %s732_s17  ;;  %s1005_s25 = scalar_lea.vmem %s1108_s3, %s732_s17 }
  0x10   : > { %v897_v2 = vld [vmem:[%s960_s20] sm:$0xff]   ;;  %v899_v4 = vld [vmem:[%s960_s20 + $0x8] sm:$0xff]   ;;  %v901_v6 = vld [vmem:[%s960_s20 + $0x10] sm:$0xff]  }
  0x11   : > { %v898_v3 = vld [vmem:[%s960_s20 + $0x40] sm:$0xff]   ;;  %853 = vmatprep.mubr.msk.bf16.mxu0 %vm295_vm1, %v897_v2  ;;  %v900_v5 = vld [vmem:[%s960_s20 + $0x48] sm:$0xff]   ;;  %v902_v7 = vld [vmem:[%s960_s20 + $0x50] sm:$0xff]  }
  0x12   : > { %869 = vmatprep.mubr.msk.bf16.mxu1 %vm295_vm1, %v898_v3  ;;  %854 = vmatmul.mubr.msk.bf16.vlgmr.msra.gmra.mrb[0].mxu0 %vm295_vm1, %v899_v4  ;;  %v903_v8 = vld [vmem:[%s960_s20 + $0x18] sm:$0xff]   ;;  %v905_v10 = vld [vmem:[%s960_s20 + $0x20] sm:$0xff]   ;;  %v907_v12 = vld [vmem:[%s960_s20 + $0x28] sm:$0xff]  }
  0x13   : > { %870 = vmatmul.mubr.msk.bf16.vlgmr.msra.gmra.mrb[0].mxu1 %vm295_vm1, %v900_v5  ;;  %857 = vmatprep.mubr.msk.bf16.mxu0 %vm295_vm1, %v901_v6  ;;  %v904_v9 = vld [vmem:[%s960_s20 + $0x58] sm:$0xff]   ;;  %v906_v11 = vld [vmem:[%s960_s20 + $0x60] sm:$0xff]   ;;  %v908_v13 = vld [vmem:[%s960_s20 + $0x68] sm:$0xff]  }
  0x14   : > { %873 = vmatprep.mubr.msk.bf16.mxu1 %vm295_vm1, %v902_v7  ;;  %v909_v14 = vld [vmem:[%s960_s20 + $0x30] sm:$0xff]   ;;  %v911_v16 = vld [vmem:[%s960_s20 + $0x38] sm:$0xff]  }
  0x15   : > { %v910_v15 = vld [vmem:[%s960_s20 + $0x70] sm:$0xff]   ;;  %v912_v17 = vld [vmem:[%s960_s20 + $0x78] sm:$0xff]  }
  0x1a   : > { %858 = vmatmul.mubr.msk.bf16.gmra.mrb[4].mxu0 %vm295_vm1, %v903_v8 }
  0x1b   : > { %874 = vmatmul.mubr.msk.bf16.gmra.mrb[4].mxu1 %vm295_vm1, %v904_v9  ;;  %861 = vmatprep.mubr.msk.bf16.mxu0 %vm295_vm1, %v905_v10 }
  0x1c   : > { %877 = vmatprep.mubr.msk.bf16.mxu1 %vm295_vm1, %v906_v11 }
  0x22   : > { %862 = vmatmul.mubr.msk.bf16.gmra.mrb[8].mxu0 %vm295_vm1, %v907_v12 }
  0x23   : > { %878 = vmatmul.mubr.msk.bf16.gmra.mrb[8].mxu1 %vm295_vm1, %v908_v13  ;;  %865 = vmatprep.mubr.msk.bf16.mxu0 %vm295_vm1, %v909_v14 }
  0x24   : > { %881 = vmatprep.mubr.msk.bf16.mxu1 %vm295_vm1, %v910_v15 }
  0x2a   : > { %866 = vmatmul.mubr.msk.bf16.gmra.mrb[12].mxu0 %vm295_vm1, %v911_v16 }
  0x2b   : > { %882 = vmatmul.mubr.msk.bf16.gmra.mrb[12].mxu1 %vm295_vm1, %v912_v17 }
  0xe5   : > { %v855_v19 = vpop.f32.mrb[0].mxu0 }
  0xe6   : > { %v391_v20 = vadd.f32 %v855_v19, %v997_v18  ;;  %v871_v21 = vpop.f32.mrb[0].mxu1  ;;  %v382_v22 = vpop.f32.mrb[1].mxu0 }
  0xe7   : > { %v455_v23 = vadd.f32 %v871_v21, %v997_v18  ;;  %v383_v24 = vadd.f32 %v997_v18, %v382_v22  ;;  %v446_v25 = vpop.f32.mrb[1].mxu1  ;;  %v856_v26 = vpop.f32.mrb[2].mxu0 }
  0xe8   : > { %v804_v27 = vpack.c.bf16 %v391_v20, %v391_v20  ;;  %v447_v28 = vadd.f32 %v997_v18, %v446_v25  ;;  %v394_v29 = vadd.f32 %v856_v26, %v997_v18  ;;  %v872_v30 = vpop.f32.mrb[2].mxu1  ;;  %v385_v31 = vpop.f32.mrb[3].mxu0 }
  0xe9   : > { %v820_v32 = vpack.c.bf16 %v455_v23, %v455_v23  ;;  %v802_v33 = vpack.c.bf16 %v383_v24, %v383_v24  ;;  %v458_v34 = vadd.f32 %v872_v30, %v997_v18  ;;  %v386_v35 = vadd.f32 %v997_v18, %v385_v31  ;;  %v449_v36 = vpop.f32.mrb[3].mxu1 }
  0xea   : > { %640 = vst.msk [vmem:[%s1005_s25 + $0x8] sm:$0xf] %vm637_vm2, %v804_v27  ;;  %v818_v37 = vpack.c.bf16 %v447_v28, %v447_v28  ;;  %v805_v38 = vpack.c.bf16 %v394_v29, %v394_v29  ;;  %v450_v39 = vadd.f32 %v997_v18, %v449_v36 }
  0xeb   : > { %656 = vst.msk [vmem:[%s1005_s25 + $0x48] sm:$0xf] %vm637_vm2, %v820_v32  ;;  %638 = vst.msk [vmem:[%s1005_s25] sm:$0xf] %vm637_vm2, %v802_v33  ;;  %v821_v40 = vpack.c.bf16 %v458_v34, %v458_v34  ;;  %v803_v41 = vpack.c.bf16 %v386_v35, %v386_v35 }
  0xec   : > { %654 = vst.msk [vmem:[%s1005_s25 + $0x40] sm:$0xf] %vm637_vm2, %v818_v37  ;;  %641 = vst.msk [vmem:[%s1005_s25 + $0xc] sm:$0xf] %vm637_vm2, %v805_v38  ;;  %v819_v42 = vpack.c.bf16 %v450_v39, %v450_v39 }
  0xed   : > { %657 = vst.msk [vmem:[%s1005_s25 + $0x4c] sm:$0xf] %vm637_vm2, %v821_v40  ;;  %639 = vst.msk [vmem:[%s1005_s25 + $0x4] sm:$0xf] %vm637_vm2, %v803_v41  ;;  %v859_v43 = vpop.f32.mrb[4].mxu0 }
  0xee   : > { %655 = vst.msk [vmem:[%s1005_s25 + $0x44] sm:$0xf] %vm637_vm2, %v819_v42  ;;  %v407_v44 = vadd.f32 %v859_v43, %v997_v18  ;;  %v875_v45 = vpop.f32.mrb[4].mxu1  ;;  %v398_v46 = vpop.f32.mrb[5].mxu0 }
  0xef   : > { %v471_v47 = vadd.f32 %v875_v45, %v997_v18  ;;  %v399_v48 = vadd.f32 %v997_v18, %v398_v46  ;;  %v462_v49 = vpop.f32.mrb[5].mxu1  ;;  %v860_v50 = vpop.f32.mrb[6].mxu0 }
  0xf0   : > { %v808_v51 = vpack.c.bf16 %v407_v44, %v407_v44  ;;  %v463_v52 = vadd.f32 %v997_v18, %v462_v49  ;;  %v410_v53 = vadd.f32 %v860_v50, %v997_v18  ;;  %v876_v54 = vpop.f32.mrb[6].mxu1  ;;  %v401_v55 = vpop.f32.mrb[7].mxu0 }
  0xf1   : > { %v824_v56 = vpack.c.bf16 %v471_v47, %v471_v47  ;;  %v806_v57 = vpack.c.bf16 %v399_v48, %v399_v48  ;;  %v474_v58 = vadd.f32 %v876_v54, %v997_v18  ;;  %v402_v59 = vadd.f32 %v997_v18, %v401_v55  ;;  %v465_v60 = vpop.f32.mrb[7].mxu1 }
  0xf2   : > { %644 = vst.msk [vmem:[%s1005_s25 + $0x18] sm:$0xf] %vm637_vm2, %v808_v51  ;;  %v822_v61 = vpack.c.bf16 %v463_v52, %v463_v52  ;;  %v809_v62 = vpack.c.bf16 %v410_v53, %v410_v53  ;;  %v466_v63 = vadd.f32 %v997_v18, %v465_v60 }
  0xf3   : > { %660 = vst.msk [vmem:[%s1005_s25 + $0x58] sm:$0xf] %vm637_vm2, %v824_v56  ;;  %642 = vst.msk [vmem:[%s1005_s25 + $0x10] sm:$0xf] %vm637_vm2, %v806_v57  ;;  %v825_v0 = vpack.c.bf16 %v474_v58, %v474_v58  ;;  %v807_v1 = vpack.c.bf16 %v402_v59, %v402_v59 }
  0xf4   : > { %658 = vst.msk [vmem:[%s1005_s25 + $0x50] sm:$0xf] %vm637_vm2, %v822_v61  ;;  %645 = vst.msk [vmem:[%s1005_s25 + $0x1c] sm:$0xf] %vm637_vm2, %v809_v62  ;;  %v823_v2 = vpack.c.bf16 %v466_v63, %v466_v63 }
  0xf5   : > { %661 = vst.msk [vmem:[%s1005_s25 + $0x5c] sm:$0xf] %vm637_vm2, %v825_v0  ;;  %643 = vst.msk [vmem:[%s1005_s25 + $0x14] sm:$0xf] %vm637_vm2, %v807_v1  ;;  %v863_v3 = vpop.f32.mrb[8].mxu0 }
  0xf6   : > { %659 = vst.msk [vmem:[%s1005_s25 + $0x54] sm:$0xf] %vm637_vm2, %v823_v2  ;;  %v423_v4 = vadd.f32 %v863_v3, %v997_v18  ;;  %v879_v5 = vpop.f32.mrb[8].mxu1  ;;  %v414_v6 = vpop.f32.mrb[9].mxu0 }
  0xf7   : > { %v487_v7 = vadd.f32 %v879_v5, %v997_v18  ;;  %v415_v8 = vadd.f32 %v997_v18, %v414_v6  ;;  %v478_v9 = vpop.f32.mrb[9].mxu1  ;;  %v864_v10 = vpop.f32.mrb[10].mxu0 }
  0xf8   : > { %v812_v11 = vpack.c.bf16 %v423_v4, %v423_v4  ;;  %v479_v12 = vadd.f32 %v997_v18, %v478_v9  ;;  %v426_v13 = vadd.f32 %v864_v10, %v997_v18  ;;  %v880_v14 = vpop.f32.mrb[10].mxu1  ;;  %v417_v15 = vpop.f32.mrb[11].mxu0 }
  0xf9   : > { %v828_v16 = vpack.c.bf16 %v487_v7, %v487_v7  ;;  %v810_v17 = vpack.c.bf16 %v415_v8, %v415_v8  ;;  %v490_v19 = vadd.f32 %v880_v14, %v997_v18  ;;  %v418_v20 = vadd.f32 %v997_v18, %v417_v15  ;;  %v481_v21 = vpop.f32.mrb[11].mxu1 }
  0xfa   : > { %648 = vst.msk [vmem:[%s1005_s25 + $0x28] sm:$0xf] %vm637_vm2, %v812_v11  ;;  %v826_v22 = vpack.c.bf16 %v479_v12, %v479_v12  ;;  %v813_v23 = vpack.c.bf16 %v426_v13, %v426_v13  ;;  %v482_v24 = vadd.f32 %v997_v18, %v481_v21 }
  0xfb   : > { %664 = vst.msk [vmem:[%s1005_s25 + $0x68] sm:$0xf] %vm637_vm2, %v828_v16  ;;  %646 = vst.msk [vmem:[%s1005_s25 + $0x20] sm:$0xf] %vm637_vm2, %v810_v17  ;;  %v829_v25 = vpack.c.bf16 %v490_v19, %v490_v19  ;;  %v811_v26 = vpack.c.bf16 %v418_v20, %v418_v20 }
  0xfc   : > { %662 = vst.msk [vmem:[%s1005_s25 + $0x60] sm:$0xf] %vm637_vm2, %v826_v22  ;;  %649 = vst.msk [vmem:[%s1005_s25 + $0x2c] sm:$0xf] %vm637_vm2, %v813_v23  ;;  %v827_v27 = vpack.c.bf16 %v482_v24, %v482_v24 }
  0xfd   : > { %665 = vst.msk [vmem:[%s1005_s25 + $0x6c] sm:$0xf] %vm637_vm2, %v829_v25  ;;  %647 = vst.msk [vmem:[%s1005_s25 + $0x24] sm:$0xf] %vm637_vm2, %v811_v26  ;;  %v867_v28 = vpop.f32.mrb[12].mxu0 }
  0xfe   : > { %663 = vst.msk [vmem:[%s1005_s25 + $0x64] sm:$0xf] %vm637_vm2, %v827_v27  ;;  %v439_v29 = vadd.f32 %v867_v28, %v997_v18  ;;  %v883_v30 = vpop.f32.mrb[12].mxu1  ;;  %v430_v31 = vpop.f32.mrb[13].mxu0 }
  0xff   : > { %v503_v32 = vadd.f32 %v883_v30, %v997_v18  ;;  %v431_v33 = vadd.f32 %v997_v18, %v430_v31  ;;  %v494_v34 = vpop.f32.mrb[13].mxu1  ;;  %v868_v35 = vpop.f32.mrb[14].mxu0 }
 0x100   : > { %v816_v36 = vpack.c.bf16 %v439_v29, %v439_v29  ;;  %v495_v37 = vadd.f32 %v997_v18, %v494_v34  ;;  %v442_v38 = vadd.f32 %v868_v35, %v997_v18  ;;  %v884_v39 = vpop.f32.mrb[14].mxu1  ;;  %v433_v40 = vpop.f32.mrb[15].mxu0 }
 0x101   : > { %v832_v41 = vpack.c.bf16 %v503_v32, %v503_v32  ;;  %v814_v42 = vpack.c.bf16 %v431_v33, %v431_v33  ;;  %v506_v43 = vadd.f32 %v884_v39, %v997_v18  ;;  %v434_v44 = vadd.f32 %v997_v18, %v433_v40  ;;  %v497_v45 = vpop.f32.mrb[15].mxu1 }
 0x102   : > { %652 = vst.msk [vmem:[%s1005_s25 + $0x38] sm:$0xf] %vm637_vm2, %v816_v36  ;;  %v830_v46 = vpack.c.bf16 %v495_v37, %v495_v37  ;;  %v817_v47 = vpack.c.bf16 %v442_v38, %v442_v38  ;;  %v498_v48 = vadd.f32 %v997_v18, %v497_v45 }
 0x103   : > { %668 = vst.msk [vmem:[%s1005_s25 + $0x78] sm:$0xf] %vm637_vm2, %v832_v41  ;;  %650 = vst.msk [vmem:[%s1005_s25 + $0x30] sm:$0xf] %vm637_vm2, %v814_v42  ;;  %v833_v49 = vpack.c.bf16 %v506_v43, %v506_v43  ;;  %v815_v50 = vpack.c.bf16 %v434_v44, %v434_v44 }
 0x104   : > { %666 = vst.msk [vmem:[%s1005_s25 + $0x70] sm:$0xf] %vm637_vm2, %v830_v46  ;;  %653 = vst.msk [vmem:[%s1005_s25 + $0x3c] sm:$0xf] %vm637_vm2, %v817_v47  ;;  %v831_v51 = vpack.c.bf16 %v498_v48, %v498_v48 }
 0x105   : > { %669 = vst.msk [vmem:[%s1005_s25 + $0x7c] sm:$0xf] %vm637_vm2, %v833_v49  ;;  %651 = vst.msk [vmem:[%s1005_s25 + $0x34] sm:$0xf] %vm637_vm2, %v815_v50 }
 0x106   : > { %667 = vst.msk [vmem:[%s1005_s25 + $0x74] sm:$0xf] %vm637_vm2, %v831_v51 }
 0x107 PF: > { %s13_s12 = sadd.s32 1, %s919_s12  }
 0x108   : > { %p10_p4 = scmp.ge.s32.totalorder %s13_s12, 4  }
 0x10a   :  { %12 = sbr.rel (!%p10_p4) target bundleno = 1 (0x1), region = 62 }

// kernel: tile.23
= control target key start
LH: loop header
LB: loop body
LE: loop exit
PB: predicated region body
PF: predicated region fallthrough
CT: control target
= control target key end

     0   :  { %s22_s0 = inlined_call_operand.vmem [shape: f32[8], index: 0, kind: input, shape index: {}]   ;;  %s23_s1 = inlined_call_operand.vmem [shape: f32[8,8], index: 1, kind: output, shape index: {}]  }
   0x1   :  { %v4_v0 = vld [vmem:[%s22_s0] ss:$0 sm:$0xff] }
   0x2   :  { %5 = vst [vmem:[%s23_s1] sm:$0xff] %v4_v0 }

// kernel: mul.53
= control target key start
LH: loop header
LB: loop body
LE: loop exit
PB: predicated region body
PF: predicated region fallthrough
CT: control target
= control target key end

     0   :  { %s67_s10 = smov 56   ;;  %s68_s11 = smov 40   ;;  %vm3_vm0 = vcmask 64512   ;;  %vm9_vm1 = vcmask 523712   ;;  %vm15_vm2 = vcmask 458112   ;;  %vm21_vm3 = vcmask 392512   ;;  %s111_s0 = inlined_call_operand.vmem [shape: f32[8,8], index: 0, kind: input, shape index: {}]   ;;  %s112_s1 = inlined_call_operand.vmem [shape: f32[64], index: 1, kind: output, shape index: {}]  }
   0x1   :  { %v53_v0 = vld [vmem:[%s111_s0 + $0x7] sm:$0x1]   ;;  %v55_v1 = vld [vmem:[%s111_s0 + $0x5] sm:$0x1]   ;;  %v54_v2 = vld [vmem:[%s111_s0 + $0x6] sm:$0x1]  }
   0x2   :  { %7 = vrot.lane.b32.xlu0 %v53_v0, %s67_s10  ;;  %19 = vrot.lane.b32.xlu1 %v55_v1, %s68_s11  ;;  %v56_v3 = vld [vmem:[%s111_s0 + $0x4] sm:$0x1]   ;;  %v2_v4 = vld [vmem:[%s111_s0] sm:$0x1]   ;;  %s69_s18 = smov 48   ;;  %s70_s19 = smov 32  }
   0x3   :  { %4 = vst.msk [vmem:[#allocation0] sm:$0x1] %vm3_vm0, %v2_v4   ;;  %v57_v5 = vld [vmem:[%s111_s0 + $0x3] sm:$0x1]   ;;  %v58_v6 = vld [vmem:[%s111_s0 + $0x2] sm:$0x1]  }
   0x4   :  { %s71_s24 = smov 24   ;;  %s72_s25 = smov 16   ;;  %v59_v7 = vld [vmem:[%s111_s0 + $0x1] sm:$0x1]   ;;  %vm27_vm4 = vcmask 326912   ;;  %vm33_vm5 = vcmask 261312  }
   0x5   :  { %s73_s0 = smov 8   ;;  %vm39_vm6 = vcmask 195712   ;;  %vm45_vm7 = vcmask 130112  }
   0x6   :  { %13 = vrot.lane.b32.xlu0 %v54_v2, %s69_s18  ;;  %25 = vrot.lane.b32.xlu1 %v56_v3, %s70_s19 }
   0xa   :  { %31 = vrot.lane.b32.xlu0 %v57_v5, %s71_s24  ;;  %37 = vrot.lane.b32.xlu1 %v58_v6, %s72_s25 }
   0xe   :  { %43 = vrot.lane.b32.xlu0 %v59_v7, %s73_s0 }
  0x74   :  { %v8_v8 = vpop.permute.xlu0 %7   ;;  %v20_v9 = vpop.permute.xlu1 %19  }
  0x75   :  { %10 = vst.msk [vmem:[#allocation0] sm:$0x1] %vm9_vm1, %v8_v8  }
  0x78   :  { %v14_v10 = vpop.permute.xlu0 %13   ;;  %v26_v11 = vpop.permute.xlu1 %25  }
  0x79   :  { %16 = vst.msk [vmem:[#allocation0] sm:$0x1] %vm15_vm2, %v14_v10  }
  0x7a   :  { %22 = vst.msk [vmem:[#allocation0] sm:$0x1] %vm21_vm3, %v20_v9  }
  0x7b   :  { %28 = vst.msk [vmem:[#allocation0] sm:$0x1] %vm27_vm4, %v26_v11  }
  0x7c   :  { %v32_v12 = vpop.permute.xlu0 %31   ;;  %v38_v13 = vpop.permute.xlu1 %37  }
  0x7d   :  { %34 = vst.msk [vmem:[#allocation0] sm:$0x1] %vm33_vm5, %v32_v12  }
  0x7e   :  { %40 = vst.msk [vmem:[#allocation0] sm:$0x1] %vm39_vm6, %v38_v13  }
  0x80   :  { %v44_v14 = vpop.permute.xlu0 %43  }
  0x81   :  { %46 = vst.msk [vmem:[#allocation0] sm:$0x1] %vm45_vm7, %v44_v14  }
  0x88   :  { %v50_v15 = vld [vmem:[#allocation0] sm:$0x1] }
  0x89   :  { %52 = vst [vmem:[%s112_s1] sm:$0x1] %v50_v15 }

// kernel: tile.29
= control target key start
LH: loop header
LB: loop body
LE: loop exit
PB: predicated region body
PF: predicated region fallthrough
CT: control target
= control target key end

     0   :  { %s67_s10 = smov 56   ;;  %s68_s11 = smov 40   ;;  %vm3_vm0 = vcmask 64512   ;;  %vm9_vm1 = vcmask 523712   ;;  %vm15_vm2 = vcmask 458112   ;;  %vm21_vm3 = vcmask 392512   ;;  %s111_s0 = inlined_call_operand.vmem [shape: f32[8,8], index: 0, kind: input, shape index: {}]   ;;  %s112_s1 = inlined_call_operand.vmem [shape: f32[1,64], index: 1, kind: output, shape index: {}]  }
   0x1   :  { %v53_v0 = vld [vmem:[%s111_s0 + $0x7] sm:$0x1]   ;;  %v55_v1 = vld [vmem:[%s111_s0 + $0x5] sm:$0x1]   ;;  %v54_v2 = vld [vmem:[%s111_s0 + $0x6] sm:$0x1]  }
   0x2   :  { %7 = vrot.lane.b32.xlu0 %v53_v0, %s67_s10  ;;  %19 = vrot.lane.b32.xlu1 %v55_v1, %s68_s11  ;;  %v56_v3 = vld [vmem:[%s111_s0 + $0x4] sm:$0x1]   ;;  %v2_v4 = vld [vmem:[%s111_s0] sm:$0x1]   ;;  %s69_s18 = smov 48   ;;  %s70_s19 = smov 32  }
   0x3   :  { %4 = vst.msk [vmem:[#allocation0] sm:$0x1] %vm3_vm0, %v2_v4   ;;  %v57_v5 = vld [vmem:[%s111_s0 + $0x3] sm:$0x1]   ;;  %v58_v6 = vld [vmem:[%s111_s0 + $0x2] sm:$0x1]  }
   0x4   :  { %s71_s24 = smov 24   ;;  %s72_s25 = smov 16   ;;  %v59_v7 = vld [vmem:[%s111_s0 + $0x1] sm:$0x1]   ;;  %vm27_vm4 = vcmask 326912   ;;  %vm33_vm5 = vcmask 261312  }
   0x5   :  { %s73_s0 = smov 8   ;;  %vm39_vm6 = vcmask 195712   ;;  %vm45_vm7 = vcmask 130112  }
   0x6   :  { %13 = vrot.lane.b32.xlu0 %v54_v2, %s69_s18  ;;  %25 = vrot.lane.b32.xlu1 %v56_v3, %s70_s19 }
   0xa   :  { %31 = vrot.lane.b32.xlu0 %v57_v5, %s71_s24  ;;  %37 = vrot.lane.b32.xlu1 %v58_v6, %s72_s25 }
   0xe   :  { %43 = vrot.lane.b32.xlu0 %v59_v7, %s73_s0 }
  0x74   :  { %v8_v8 = vpop.permute.xlu0 %7   ;;  %v20_v9 = vpop.permute.xlu1 %19  }
  0x75   :  { %10 = vst.msk [vmem:[#allocation0] sm:$0x1] %vm9_vm1, %v8_v8  }
  0x78   :  { %v14_v10 = vpop.permute.xlu0 %13   ;;  %v26_v11 = vpop.permute.xlu1 %25  }
  0x79   :  { %16 = vst.msk [vmem:[#allocation0] sm:$0x1] %vm15_vm2, %v14_v10  }
  0x7a   :  { %22 = vst.msk [vmem:[#allocation0] sm:$0x1] %vm21_vm3, %v20_v9  }
  0x7b   :  { %28 = vst.msk [vmem:[#allocation0] sm:$0x1] %vm27_vm4, %v26_v11  }
  0x7c   :  { %v32_v12 = vpop.permute.xlu0 %31   ;;  %v38_v13 = vpop.permute.xlu1 %37  }
  0x7d   :  { %34 = vst.msk [vmem:[#allocation0] sm:$0x1] %vm33_vm5, %v32_v12  }
  0x7e   :  { %40 = vst.msk [vmem:[#allocation0] sm:$0x1] %vm39_vm6, %v38_v13  }
  0x80   :  { %v44_v14 = vpop.permute.xlu0 %43  }
  0x81   :  { %46 = vst.msk [vmem:[#allocation0] sm:$0x1] %vm45_vm7, %v44_v14  }
  0x88   :  { %v50_v15 = vld [vmem:[#allocation0] sm:$0x1] }
  0x89   :  { %52 = vst [vmem:[%s112_s1] sm:$0x1] %v50_v15 }

// kernel: hourglass_forward.13
= control target key start
LH: loop header
LB: loop body
LE: loop exit
PB: predicated region body
PF: predicated region fallthrough
CT: control target
= control target key end

     0   :  { %s587_s15 = smov 0   ;;  %s639_s0 = inlined_call_operand.vmem [shape: bf16[64,128], index: 0, kind: input, shape index: {}]   ;;  %s640_s1 = inlined_call_operand.vmem [shape: bf16[128,64], index: 1, kind: input, shape index: {}]   ;;  %s641_s2 = inlined_call_operand.vmem [shape: f32[1,64], index: 2, kind: input, shape index: {}]   ;;  %s642_s3 = inlined_call_operand.vmem [shape: bf16[64,64], index: 3, kind: input, shape index: {}]   ;;  %s643_s4 = inlined_call_operand.vmem [shape: bf16[64,64], index: 4, kind: output, shape index: {}]  }
   0x1 LB: > { %s465_s16 = sadd.s32 4294967295, %s560_s15   ;;  %p469_p0 = scmp.ge.s32.totalorder %s560_s15, 1  ;;  %s560_s15 = sphi %s587_s15, %s14_s15  }
   0x2   : > { %p174_p1 = scmp.lt.s32.totalorder %s560_s15, 3 }
   0x4   : > { %p175_p2 = pnand %p469_p0, %p174_p1 }
   0x5   : > { %v544_v0 = vld [vmem:[%s640_s1] sm:$0xff] (!%p175_p2)   ;;  %s470_s19 = sshll.u32 (!%p175_p2), %s465_s16, 2  ;;  %v545_v1 = vld [vmem:[%s640_s1 + $0x8] sm:$0xff] (!%p175_p2)   ;;  %v546_v2 = vld [vmem:[%s640_s1 + $0x10] sm:$0xff] (!%p175_p2)   ;;  %vm392_vm0 = vcmask (!%p175_p2), 519168  }
   0x6   : > { %178 = sbr.rel (%p175_p2) target bundleno = 262 (0x106), region = 36  ;;  %p206_p3 = scmp.lt.s32.totalorder (!%p175_p2), %s470_s19, 7  ;;  %516 = vmatprep.subr.bf16.mxu0 (!%p175_p2), %v544_v0  ;;  %v547_v3 = vld [vmem:[%s640_s1 + $0x18] sm:$0xff] (!%p175_p2)   ;;  %v548_v5 = vld [vmem:[%s640_s1 + $0x20] sm:$0xff] (!%p175_p2)   ;;  %v549_v6 = vld [vmem:[%s640_s1 + $0x28] sm:$0xff] (!%p175_p2)  }
   0x7   : > { %517 = vmatpush3.bf16.msra.mxu0 (!%p175_p2), %v544_v0  ;;  %v550_v7 = vld [vmem:[%s640_s1 + $0x30] sm:$0xff] (!%p175_p2)   ;;  %v551_v8 = vld [vmem:[%s640_s1 + $0x38] sm:$0xff] (!%p175_p2)   ;;  %v476_v12 = vld [vmem:[%s641_s2] ss:$0 sm:$0xff] (!%p175_p2) }
   0x8   : > { %518 = vmatprep.subr.bf16.mxu0 (!%p175_p2), %v545_v1 }
   0xb   : > { %519 = vmatpush3.bf16.msra.mxu0 (!%p175_p2), %v545_v1 }
   0xc   : > { %520 = vmatprep.subr.bf16.mxu0 (!%p175_p2), %v546_v2 }
   0xd   : > { %s645_s19 = smov (!%p206_p3, %s470_s19), 7 }
   0xe   : > { %s604_s24 = sshll.u32 %s645_s19, 2 }
   0xf   : > { %s209_s27 = scalar_lea.vmem %s639_s0, %s604_s24  ;;  %521 = vmatpush3.bf16.msra.mxu0 %v546_v2  ;;  %s215_s14 = scalar_lea.vmem %s642_s3, %s604_s24 }
  0x10   : > { %v552_v4 = vld [vmem:[%s209_s27] sm:$0xff]   ;;  %522 = vmatprep.subr.bf16.mxu0 %v547_v3  ;;  %v553_v9 = vld [vmem:[%s209_s27 + $0x8] sm:$0xff]   ;;  %s221_s20 = scalar_lea.vmem %s643_s4, %s604_s24 }
  0x11   : > { %532 = vmatprep.mubr.bf16.mxu0 %v552_v4  ;;  %v505_v10 = vld [vmem:[%s215_s14 + $0x8] sm:$0xff]   ;;  %v498_v11 = vld [vmem:[%s215_s14] sm:$0xff]  }
  0x12   : > { %v503_v13 = vunpack.c.l.bf16 %v505_v10  ;;  %v499_v15 = vunpack.c.l.bf16 %v498_v11  ;;  %v504_v18 = vunpack.c.h.bf16 %v505_v10  ;;  %v500_v21 = vunpack.c.h.bf16 %v498_v11 }
  0x13   : > { %523 = vmatpush3.bf16.msra.mxu0 %v547_v3 }
  0x14   : > { %524 = vmatprep.subr.bf16.mxu0 %v548_v5 }
  0x17   : > { %525 = vmatpush3.bf16.msra.mxu0 %v548_v5 }
  0x18   : > { %526 = vmatprep.subr.bf16.mxu0 %v549_v6 }
  0x1b   : > { %527 = vmatpush3.bf16.msra.mxu0 %v549_v6 }
  0x1c   : > { %528 = vmatprep.subr.bf16.mxu0 %v550_v7 }
  0x1f   : > { %529 = vmatpush3.bf16.msra.mxu0 %v550_v7 }
  0x20   : > { %530 = vmatprep.subr.bf16.mxu0 %v551_v8 }
  0x23   : > { %531 = vmatpush3.bf16.msra.mxu0 %v551_v8 }
  0x26   : > { %533 = vmatmul.mubr.bf16.vlgmr.msra.gmra.mrb[0].mxu0 %v553_v9 }
  0xf9   : > { %v534_v14 = vpop.f32.mrb[0].mxu0 }
  0xfa   : > { %v354_v16 = vadd.f32 %v534_v14, %v476_v12  ;;  %v345_v17 = vpop.f32.mrb[1].mxu0 }
  0xfb   : > { %v346_v19 = vadd.f32 %v476_v12, %v345_v17  ;;  %v535_v20 = vpop.f32.mrb[2].mxu0 }
  0xfc   : > { %v370_v22 = vadd.f32 %v503_v13, %v354_v16  ;;  %v357_v23 = vadd.f32 %v535_v20, %v476_v12  ;;  %v348_v24 = vpop.f32.mrb[3].mxu0 }
  0xfd   : > { %v368_v25 = vadd.f32 %v499_v15, %v346_v19  ;;  %v349_v26 = vadd.f32 %v476_v12, %v348_v24 }
  0xfe   : > { %v371_v27 = vadd.f32 %v504_v18, %v357_v23  ;;  %v374_v30 = vmax.f32 %v370_v22, 0.0 }
  0xff   : > { %v372_v28 = vmax.f32 %v368_v25, 0.0  ;;  %v369_v29 = vadd.f32 %v500_v21, %v349_v26 }
 0x100   : > { %v375_v32 = vmax.f32 %v371_v27, 0.0  ;;  %v495_v35 = vpack.c.bf16 %v374_v30, %v374_v30 }
 0x101   : > { %v493_v31 = vpack.c.bf16 %v372_v28, %v372_v28  ;;  %v373_v33 = vmax.f32 %v369_v29, 0.0 }
 0x102   : > { %v496_v36 = vpack.c.bf16 %v375_v32, %v375_v32  ;;  %395 = vst.msk [vmem:[%s221_s20 + $0x8] sm:$0xf] %vm392_vm0, %v495_v35 }
 0x103   : > { %393 = vst.msk [vmem:[%s221_s20] sm:$0xf] %vm392_vm0, %v493_v31  ;;  %v494_v34 = vpack.c.bf16 %v373_v33, %v373_v33 }
 0x104   : > { %396 = vst.msk [vmem:[%s221_s20 + $0xc] sm:$0xf] %vm392_vm0, %v496_v36 }
 0x105   : > { %394 = vst.msk [vmem:[%s221_s20 + $0x4] sm:$0xf] %vm392_vm0, %v494_v34 }
 0x106 PF: > { %s14_s15 = sadd.s32 1, %s560_s15  }
 0x107   : > { %p11_p4 = scmp.ge.s32.totalorder %s14_s15, 4  }
 0x109   :  { %13 = sbr.rel (!%p11_p4) target bundleno = 1 (0x1), region = 69 }

// kernel: tile.33
= control target key start
LH: loop header
LB: loop body
LE: loop exit
PB: predicated region body
PF: predicated region fallthrough
CT: control target
= control target key end

     0   :  { %s22_s0 = inlined_call_operand.vmem [shape: f32[4], index: 0, kind: input, shape index: {}]   ;;  %s23_s1 = inlined_call_operand.vmem [shape: f32[8,4], index: 1, kind: output, shape index: {}]  }
   0x1   :  { %v4_v0 = vld [vmem:[%s22_s0] ss:$0 sm:$0xff] }
   0x2   :  { %5 = vst [vmem:[%s23_s1] sm:$0xff] %v4_v0 }

// kernel: mul.61
= control target key start
LH: loop header
LB: loop body
LE: loop exit
PB: predicated region body
PF: predicated region fallthrough
CT: control target
= control target key end

     0   :  { %s67_s10 = smov 28   ;;  %s68_s11 = smov 20   ;;  %vm3_vm0 = vcmask 31744   ;;  %vm9_vm1 = vcmask 261344   ;;  %vm15_vm2 = vcmask 228544   ;;  %vm21_vm3 = vcmask 195744   ;;  %s111_s0 = inlined_call_operand.vmem [shape: f32[8,4], index: 0, kind: input, shape index: {}]   ;;  %s112_s1 = inlined_call_operand.vmem [shape: f32[32], index: 1, kind: output, shape index: {}]  }
   0x1   :  { %v53_v0 = vld [vmem:[%s111_s0 + $0x7] sm:$0x1]   ;;  %v55_v1 = vld [vmem:[%s111_s0 + $0x5] sm:$0x1]   ;;  %v54_v2 = vld [vmem:[%s111_s0 + $0x6] sm:$0x1]  }
   0x2   :  { %7 = vrot.lane.b32.xlu0 %v53_v0, %s67_s10  ;;  %19 = vrot.lane.b32.xlu1 %v55_v1, %s68_s11  ;;  %v56_v3 = vld [vmem:[%s111_s0 + $0x4] sm:$0x1]   ;;  %v2_v4 = vld [vmem:[%s111_s0] sm:$0x1]   ;;  %s69_s18 = smov 24   ;;  %s70_s19 = smov 16  }
   0x3   :  { %4 = vst.msk [vmem:[#allocation0] sm:$0x1] %vm3_vm0, %v2_v4   ;;  %v57_v5 = vld [vmem:[%s111_s0 + $0x3] sm:$0x1]   ;;  %v58_v6 = vld [vmem:[%s111_s0 + $0x2] sm:$0x1]  }
   0x4   :  { %s71_s24 = smov 12   ;;  %s72_s25 = smov 8   ;;  %v59_v7 = vld [vmem:[%s111_s0 + $0x1] sm:$0x1]   ;;  %vm27_vm4 = vcmask 162944   ;;  %vm33_vm5 = vcmask 130144  }
   0x5   :  { %s73_s0 = smov 4   ;;  %vm39_vm6 = vcmask 97344   ;;  %vm45_vm7 = vcmask 64544  }
   0x6   :  { %13 = vrot.lane.b32.xlu0 %v54_v2, %s69_s18  ;;  %25 = vrot.lane.b32.xlu1 %v56_v3, %s70_s19 }
   0xa   :  { %31 = vrot.lane.b32.xlu0 %v57_v5, %s71_s24  ;;  %37 = vrot.lane.b32.xlu1 %v58_v6, %s72_s25 }
   0xe   :  { %43 = vrot.lane.b32.xlu0 %v59_v7, %s73_s0 }
  0x74   :  { %v8_v8 = vpop.permute.xlu0 %7   ;;  %v20_v9 = vpop.permute.xlu1 %19  }
  0x75   :  { %10 = vst.msk [vmem:[#allocation0] sm:$0x1] %vm9_vm1, %v8_v8  }
  0x78   :  { %v14_v10 = vpop.permute.xlu0 %13   ;;  %v26_v11 = vpop.permute.xlu1 %25  }
  0x79   :  { %16 = vst.msk [vmem:[#allocation0] sm:$0x1] %vm15_vm2, %v14_v10  }
  0x7a   :  { %22 = vst.msk [vmem:[#allocation0] sm:$0x1] %vm21_vm3, %v20_v9  }
  0x7b   :  { %28 = vst.msk [vmem:[#allocation0] sm:$0x1] %vm27_vm4, %v26_v11  }
  0x7c   :  { %v32_v12 = vpop.permute.xlu0 %31   ;;  %v38_v13 = vpop.permute.xlu1 %37  }
  0x7d   :  { %34 = vst.msk [vmem:[#allocation0] sm:$0x1] %vm33_vm5, %v32_v12  }
  0x7e   :  { %40 = vst.msk [vmem:[#allocation0] sm:$0x1] %vm39_vm6, %v38_v13  }
  0x80   :  { %v44_v14 = vpop.permute.xlu0 %43  }
  0x81   :  { %46 = vst.msk [vmem:[#allocation0] sm:$0x1] %vm45_vm7, %v44_v14  }
  0x88   :  { %v50_v15 = vld [vmem:[#allocation0] sm:$0x1] }
  0x89   :  { %52 = vst [vmem:[%s112_s1] sm:$0x1] %v50_v15 }

// kernel: hourglass_forward.14
= control target key start
LH: loop header
LB: loop body
LE: loop exit
PB: predicated region body
PF: predicated region fallthrough
CT: control target
= control target key end

     0   :  { %s2765_s12 = smov 0   ;;  %s3313_s0 = inlined_call_operand.vmem [shape: bf16[4096,4], index: 0, kind: input, shape index: {}]   ;;  %s3314_s1 = inlined_call_operand.vmem [shape: bf16[4,4], index: 1, kind: input, shape index: {}]   ;;  %s3315_s2 = inlined_call_operand.vmem [shape: f32[1,4], index: 2, kind: input, shape index: {}]   ;;  %s3316_s3 = inlined_call_operand.vmem [shape: bf16[4096,4], index: 3, kind: output, shape index: {}]  }
   0x1 LB: > { %s2070_s13 = sadd.s32 4294967295, %s2743_s12   ;;  %p2074_p0 = scmp.ge.s32.totalorder %s2743_s12, 1  ;;  %s2743_s12 = sphi %s2765_s12, %s13_s12  }
   0x2   : > { %p138_p1 = scmp.lt.s32.totalorder %s2743_s12, 5 }
   0x4   : > { %p139_p2 = pnand %p2074_p0, %p138_p1 }
   0x5   : > { %v303_v0 = vld [vmem:[%s3314_s1] sm:$0x3] (!%p139_p2)  ;;  %vm824_vm0 = vcmask (!%p139_p2), 1041408   ;;  %s2075_s16 = sshll.u32 (!%p139_p2), %s2070_s13, 7  ;;  %vm631_vm1 = vcmask (!%p139_p2), 31744   ;;  %vm1885_vm2 = vcmask (!%p139_p2), 27648  }
   0x6   : > { %142 = sbr.rel (%p139_p2) target bundleno = 359 (0x167), region = 32  ;;  %2663 = vmatprep.subr.msk.bf16.mxu0 (!%p139_p2), %vm824_vm0, %v303_v0  ;;  %2664 = vmatprep.subr.msk.bf16.mxu1 (!%p139_p2), %vm824_vm0, %v303_v0  ;;  %v826_v1 = vsel (!%p139_p2), %vm824_vm0, %v303_v0, 0  ;;  %p163_p3 = scmp.lt.s32.totalorder (!%p139_p2), %s2075_s16, 511 }
   0x7   : > { %2532 = vmatpush3.bf16.msra.mxu0 (!%p139_p2), %v826_v1  ;;  %2662 = vmatpush3.bf16.msra.mxu1 (!%p139_p2), %v826_v1 }
   0xd   : > { %s3318_s16 = smov (!%p163_p3, %s2075_s16), 511 }
   0xe   : > { %s2076_s17 = sshll.u32 %s3318_s16, 2 }
   0xf   : > { %s2784_s20 = scalar_lea.vmem %s3313_s0, %s2076_s17  ;;  %s2925_s25 = scalar_lea.vmem %s3316_s3, %s2076_s17 }
  0x10   : > { %v2673_v2 = vld [vmem:[%s2784_s20] sm:$0xff]   ;;  %v2675_v4 = vld [vmem:[%s2784_s20 + $0x8] sm:$0xff]   ;;  %v2677_v6 = vld [vmem:[%s2784_s20 + $0x10] sm:$0xff]  }
  0x11   : > { %v2674_v3 = vld [vmem:[%s2784_s20 + $0x100] sm:$0xff]   ;;  %2533 = vmatprep.mubr.msk.bf16.mxu0 %vm631_vm1, %v2673_v2  ;;  %v2676_v5 = vld [vmem:[%s2784_s20 + $0x108] sm:$0xff]   ;;  %v2678_v7 = vld [vmem:[%s2784_s20 + $0x110] sm:$0xff]  }
  0x12   : > { %2597 = vmatprep.mubr.msk.bf16.mxu1 %vm631_vm1, %v2674_v3  ;;  %2534 = vmatmul.mubr.msk.bf16.vlgmr.msra.gmra.mrb[0].mxu0 %vm631_vm1, %v2675_v4  ;;  %v2679_v8 = vld [vmem:[%s2784_s20 + $0x18] sm:$0xff]   ;;  %v2681_v10 = vld [vmem:[%s2784_s20 + $0x20] sm:$0xff]   ;;  %v2683_v12 = vld [vmem:[%s2784_s20 + $0x28] sm:$0xff]  }
  0x13   : > { %2598 = vmatmul.mubr.msk.bf16.vlgmr.msra.gmra.mrb[0].mxu1 %vm631_vm1, %v2676_v5  ;;  %2537 = vmatprep.mubr.msk.bf16.mxu0 %vm631_vm1, %v2677_v6  ;;  %v2680_v9 = vld [vmem:[%s2784_s20 + $0x118] sm:$0xff]   ;;  %v2682_v11 = vld [vmem:[%s2784_s20 + $0x120] sm:$0xff]   ;;  %v2684_v13 = vld [vmem:[%s2784_s20 + $0x128] sm:$0xff]  }
  0x14   : > { %2601 = vmatprep.mubr.msk.bf16.mxu1 %vm631_vm1, %v2678_v7  ;;  %v2685_v14 = vld [vmem:[%s2784_s20 + $0x30] sm:$0xff]   ;;  %v2687_v16 = vld [vmem:[%s2784_s20 + $0x38] sm:$0xff]   ;;  %v2689_v18 = vld [vmem:[%s2784_s20 + $0x40] sm:$0xff]  }
  0x15   : > { %v2686_v15 = vld [vmem:[%s2784_s20 + $0x130] sm:$0xff]   ;;  %v2688_v17 = vld [vmem:[%s2784_s20 + $0x138] sm:$0xff]   ;;  %v2690_v19 = vld [vmem:[%s2784_s20 + $0x140] sm:$0xff]  }
  0x16   : > { %v2691_v20 = vld [vmem:[%s2784_s20 + $0x48] sm:$0xff]   ;;  %v2693_v22 = vld [vmem:[%s2784_s20 + $0x50] sm:$0xff]   ;;  %v2695_v24 = vld [vmem:[%s2784_s20 + $0x58] sm:$0xff]  }
  0x17   : > { %v2692_v21 = vld [vmem:[%s2784_s20 + $0x148] sm:$0xff]   ;;  %v2694_v23 = vld [vmem:[%s2784_s20 + $0x150] sm:$0xff]   ;;  %v2696_v25 = vld [vmem:[%s2784_s20 + $0x158] sm:$0xff]  }
  0x18   : > { %v2697_v26 = vld [vmem:[%s2784_s20 + $0x60] sm:$0xff]   ;;  %v2699_v28 = vld [vmem:[%s2784_s20 + $0x68] sm:$0xff]   ;;  %v2701_v30 = vld [vmem:[%s2784_s20 + $0x70] sm:$0xff]  }
  0x19   : > { %v2698_v27 = vld [vmem:[%s2784_s20 + $0x160] sm:$0xff]   ;;  %v2700_v29 = vld [vmem:[%s2784_s20 + $0x168] sm:$0xff]   ;;  %v2702_v31 = vld [vmem:[%s2784_s20 + $0x170] sm:$0xff]  }
  0x1a   : > { %2538 = vmatmul.mubr.msk.bf16.gmra.mrb[4].mxu0 %vm631_vm1, %v2679_v8  ;;  %v2703_v32 = vld [vmem:[%s2784_s20 + $0x78] sm:$0xff]   ;;  %v2705_v34 = vld [vmem:[%s2784_s20 + $0x80] sm:$0xff]   ;;  %v2707_v36 = vld [vmem:[%s2784_s20 + $0x88] sm:$0xff]  }
  0x1b   : > { %2602 = vmatmul.mubr.msk.bf16.gmra.mrb[4].mxu1 %vm631_vm1, %v2680_v9  ;;  %2541 = vmatprep.mubr.msk.bf16.mxu0 %vm631_vm1, %v2681_v10  ;;  %v2704_v33 = vld [vmem:[%s2784_s20 + $0x178] sm:$0xff]   ;;  %v2706_v35 = vld [vmem:[%s2784_s20 + $0x180] sm:$0xff]   ;;  %v2708_v37 = vld [vmem:[%s2784_s20 + $0x188] sm:$0xff]  }
  0x1c   : > { %2605 = vmatprep.mubr.msk.bf16.mxu1 %vm631_vm1, %v2682_v11  ;;  %v2709_v38 = vld [vmem:[%s2784_s20 + $0x90] sm:$0xff]   ;;  %v2711_v40 = vld [vmem:[%s2784_s20 + $0x98] sm:$0xff]   ;;  %v2713_v42 = vld [vmem:[%s2784_s20 + $0xa0] sm:$0xff]  }
  0x1d   : > { %v2710_v39 = vld [vmem:[%s2784_s20 + $0x190] sm:$0xff]   ;;  %v2712_v41 = vld [vmem:[%s2784_s20 + $0x198] sm:$0xff]   ;;  %v2714_v43 = vld [vmem:[%s2784_s20 + $0x1a0] sm:$0xff]  }
  0x1e   : > { %v2715_v44 = vld [vmem:[%s2784_s20 + $0xa8] sm:$0xff]   ;;  %v2717_v46 = vld [vmem:[%s2784_s20 + $0xb0] sm:$0xff]   ;;  %v2719_v48 = vld [vmem:[%s2784_s20 + $0xb8] sm:$0xff]  }
  0x1f   : > { %v2716_v45 = vld [vmem:[%s2784_s20 + $0x1a8] sm:$0xff]   ;;  %v2718_v47 = vld [vmem:[%s2784_s20 + $0x1b0] sm:$0xff]   ;;  %v2720_v49 = vld [vmem:[%s2784_s20 + $0x1b8] sm:$0xff]  }
  0x20   : > { %v2721_v50 = vld [vmem:[%s2784_s20 + $0xc0] sm:$0xff]   ;;  %v2723_v52 = vld [vmem:[%s2784_s20 + $0xc8] sm:$0xff]   ;;  %v2725_v54 = vld [vmem:[%s2784_s20 + $0xd0] sm:$0xff]  }
  0x21   : > { %v2722_v51 = vld [vmem:[%s2784_s20 + $0x1c0] sm:$0xff]   ;;  %v2724_v53 = vld [vmem:[%s2784_s20 + $0x1c8] sm:$0xff]   ;;  %v2726_v55 = vld [vmem:[%s2784_s20 + $0x1d0] sm:$0xff]  }
  0x22   : > { %2542 = vmatmul.mubr.msk.bf16.gmra.mrb[8].mxu0 %vm631_vm1, %v2683_v12  ;;  %v2727_v56 = vld [vmem:[%s2784_s20 + $0xd8] sm:$0xff]   ;;  %v2729_v58 = vld [vmem:[%s2784_s20 + $0xe0] sm:$0xff]   ;;  %v2731_v60 = vld [vmem:[%s2784_s20 + $0xe8] sm:$0xff]  }
  0x23   : > { %2606 = vmatmul.mubr.msk.bf16.gmra.mrb[8].mxu1 %vm631_vm1, %v2684_v13  ;;  %2545 = vmatprep.mubr.msk.bf16.mxu0 %vm631_vm1, %v2685_v14  ;;  %v2728_v57 = vld [vmem:[%s2784_s20 + $0x1d8] sm:$0xff]   ;;  %v2730_v59 = vld [vmem:[%s2784_s20 + $0x1e0] sm:$0xff]   ;;  %v2732_v61 = vld [vmem:[%s2784_s20 + $0x1e8] sm:$0xff]  }
  0x24   : > { %2609 = vmatprep.mubr.msk.bf16.mxu1 %vm631_vm1, %v2686_v15  ;;  %v2733_v62 = vld [vmem:[%s2784_s20 + $0xf0] sm:$0xff]   ;;  %v2735_v0 = vld [vmem:[%s2784_s20 + $0xf8] sm:$0xff]   ;;  %v2917_v2 = vld [vmem:[%s3315_s2] ss:$0 sm:$0xff] }
  0x25   : > { %v2734_v63 = vld [vmem:[%s2784_s20 + $0x1f0] sm:$0xff]   ;;  %v2736_v1 = vld [vmem:[%s2784_s20 + $0x1f8] sm:$0xff]  }
  0x2a   : > { %2546 = vmatmul.mubr.msk.bf16.gmra.mrb[12].mxu0 %vm631_vm1, %v2687_v16 }
  0x2b   : > { %2610 = vmatmul.mubr.msk.bf16.gmra.mrb[12].mxu1 %vm631_vm1, %v2688_v17  ;;  %2549 = vmatprep.mubr.msk.bf16.mxu0 %vm631_vm1, %v2689_v18 }
  0x2c   : > { %2613 = vmatprep.mubr.msk.bf16.mxu1 %vm631_vm1, %v2690_v19 }
  0x32   : > { %2550 = vmatmul.mubr.msk.bf16.gmra.mrb[16].mxu0 %vm631_vm1, %v2691_v20 }
  0x33   : > { %2614 = vmatmul.mubr.msk.bf16.gmra.mrb[16].mxu1 %vm631_vm1, %v2692_v21  ;;  %2553 = vmatprep.mubr.msk.bf16.mxu0 %vm631_vm1, %v2693_v22 }
  0x34   : > { %2617 = vmatprep.mubr.msk.bf16.mxu1 %vm631_vm1, %v2694_v23 }
  0x3a   : > { %2554 = vmatmul.mubr.msk.bf16.gmra.mrb[20].mxu0 %vm631_vm1, %v2695_v24 }
  0x3b   : > { %2618 = vmatmul.mubr.msk.bf16.gmra.mrb[20].mxu1 %vm631_vm1, %v2696_v25  ;;  %2557 = vmatprep.mubr.msk.bf16.mxu0 %vm631_vm1, %v2697_v26 }
  0x3c   : > { %2621 = vmatprep.mubr.msk.bf16.mxu1 %vm631_vm1, %v2698_v27 }
  0x42   : > { %2558 = vmatmul.mubr.msk.bf16.gmra.mrb[24].mxu0 %vm631_vm1, %v2699_v28 }
  0x43   : > { %2622 = vmatmul.mubr.msk.bf16.gmra.mrb[24].mxu1 %vm631_vm1, %v2700_v29  ;;  %2561 = vmatprep.mubr.msk.bf16.mxu0 %vm631_vm1, %v2701_v30 }
  0x44   : > { %2625 = vmatprep.mubr.msk.bf16.mxu1 %vm631_vm1, %v2702_v31 }
  0x4a   : > { %2562 = vmatmul.mubr.msk.bf16.gmra.mrb[28].mxu0 %vm631_vm1, %v2703_v32 }
  0x4b   : > { %2626 = vmatmul.mubr.msk.bf16.gmra.mrb[28].mxu1 %vm631_vm1, %v2704_v33  ;;  %2565 = vmatprep.mubr.msk.bf16.mxu0 %vm631_vm1, %v2705_v34 }
  0x4c   : > { %2629 = vmatprep.mubr.msk.bf16.mxu1 %vm631_vm1, %v2706_v35 }
  0x52   : > { %2566 = vmatmul.mubr.msk.bf16.gmra.mrb[32].mxu0 %vm631_vm1, %v2707_v36 }
  0x53   : > { %2630 = vmatmul.mubr.msk.bf16.gmra.mrb[32].mxu1 %vm631_vm1, %v2708_v37  ;;  %2569 = vmatprep.mubr.msk.bf16.mxu0 %vm631_vm1, %v2709_v38 }
  0x54   : > { %2633 = vmatprep.mubr.msk.bf16.mxu1 %vm631_vm1, %v2710_v39 }
  0x5a   : > { %2570 = vmatmul.mubr.msk.bf16.gmra.mrb[36].mxu0 %vm631_vm1, %v2711_v40 }
  0x5b   : > { %2634 = vmatmul.mubr.msk.bf16.gmra.mrb[36].mxu1 %vm631_vm1, %v2712_v41  ;;  %2573 = vmatprep.mubr.msk.bf16.mxu0 %vm631_vm1, %v2713_v42 }
  0x5c   : > { %2637 = vmatprep.mubr.msk.bf16.mxu1 %vm631_vm1, %v2714_v43 }
  0x62   : > { %2574 = vmatmul.mubr.msk.bf16.gmra.mrb[40].mxu0 %vm631_vm1, %v2715_v44 }
  0x63   : > { %2638 = vmatmul.mubr.msk.bf16.gmra.mrb[40].mxu1 %vm631_vm1, %v2716_v45  ;;  %2577 = vmatprep.mubr.msk.bf16.mxu0 %vm631_vm1, %v2717_v46 }
  0x64   : > { %2641 = vmatprep.mubr.msk.bf16.mxu1 %vm631_vm1, %v2718_v47 }
  0x6a   : > { %2578 = vmatmul.mubr.msk.bf16.gmra.mrb[44].mxu0 %vm631_vm1, %v2719_v48 }
  0x6b   : > { %2642 = vmatmul.mubr.msk.bf16.gmra.mrb[44].mxu1 %vm631_vm1, %v2720_v49  ;;  %2581 = vmatprep.mubr.msk.bf16.mxu0 %vm631_vm1, %v2721_v50 }
  0x6c   : > { %2645 = vmatprep.mubr.msk.bf16.mxu1 %vm631_vm1, %v2722_v51 }
  0x72   : > { %2582 = vmatmul.mubr.msk.bf16.gmra.mrb[48].mxu0 %vm631_vm1, %v2723_v52 }
  0x73   : > { %2646 = vmatmul.mubr.msk.bf16.gmra.mrb[48].mxu1 %vm631_vm1, %v2724_v53  ;;  %2585 = vmatprep.mubr.msk.bf16.mxu0 %vm631_vm1, %v2725_v54 }
  0x74   : > { %2649 = vmatprep.mubr.msk.bf16.mxu1 %vm631_vm1, %v2726_v55 }
  0x7a   : > { %2586 = vmatmul.mubr.msk.bf16.gmra.mrb[52].mxu0 %vm631_vm1, %v2727_v56 }
  0x7b   : > { %2650 = vmatmul.mubr.msk.bf16.gmra.mrb[52].mxu1 %vm631_vm1, %v2728_v57  ;;  %2589 = vmatprep.mubr.msk.bf16.mxu0 %vm631_vm1, %v2729_v58 }
  0x7c   : > { %2653 = vmatprep.mubr.msk.bf16.mxu1 %vm631_vm1, %v2730_v59 }
  0x82   : > { %2590 = vmatmul.mubr.msk.bf16.gmra.mrb[56].mxu0 %vm631_vm1, %v2731_v60 }
  0x83   : > { %2654 = vmatmul.mubr.msk.bf16.gmra.mrb[56].mxu1 %vm631_vm1, %v2732_v61  ;;  %2593 = vmatprep.mubr.msk.bf16.mxu0 %vm631_vm1, %v2733_v62 }
  0x84   : > { %2657 = vmatprep.mubr.msk.bf16.mxu1 %vm631_vm1, %v2734_v63 }
  0x8a   : > { %2594 = vmatmul.mubr.msk.bf16.gmra.mrb[60].mxu0 %vm631_vm1, %v2735_v0 }
  0x8b   : > { %2658 = vmatmul.mubr.msk.bf16.gmra.mrb[60].mxu1 %vm631_vm1, %v2736_v1 }
  0xe5   : > { %v2535_v3 = vpop.f32.mrb[0].mxu0 }
  0xe6   : > { %v871_v4 = vadd.f32 %v2535_v3, %v2917_v2  ;;  %v2599_v5 = vpop.f32.mrb[0].mxu1  ;;  %v862_v6 = vpop.f32.mrb[1].mxu0 }
  0xe7   : > { %v1127_v7 = vadd.f32 %v2599_v5, %v2917_v2  ;;  %v863_v8 = vadd.f32 %v2917_v2, %v862_v6  ;;  %v1118_v9 = vpop.f32.mrb[1].mxu1  ;;  %v2536_v10 = vpop.f32.mrb[2].mxu0 }
  0xe8   : > { %v2340_v11 = vpack.c.bf16 %v871_v4, %v871_v4  ;;  %v1119_v12 = vadd.f32 %v2917_v2, %v1118_v9  ;;  %v874_v13 = vadd.f32 %v2536_v10, %v2917_v2  ;;  %v2600_v14 = vpop.f32.mrb[2].mxu1  ;;  %v865_v15 = vpop.f32.mrb[3].mxu0 }
  0xe9   : > { %v2404_v16 = vpack.c.bf16 %v1127_v7, %v1127_v7  ;;  %v2338_v17 = vpack.c.bf16 %v863_v8, %v863_v8  ;;  %v1130_v18 = vadd.f32 %v2600_v14, %v2917_v2  ;;  %v866_v19 = vadd.f32 %v2917_v2, %v865_v15  ;;  %v1121_v20 = vpop.f32.mrb[3].mxu1 }
  0xea   : > { %1888 = vst.msk [vmem:[%s2925_s25 + $0x8] sm:$0xf] %vm1885_vm2, %v2340_v11  ;;  %v2402_v21 = vpack.c.bf16 %v1119_v12, %v1119_v12  ;;  %v2341_v22 = vpack.c.bf16 %v874_v13, %v874_v13  ;;  %v1122_v23 = vadd.f32 %v2917_v2, %v1121_v20 }
  0xeb   : > { %1952 = vst.msk [vmem:[%s2925_s25 + $0x108] sm:$0xf] %vm1885_vm2, %v2404_v16  ;;  %1886 = vst.msk [vmem:[%s2925_s25] sm:$0xf] %vm1885_vm2, %v2338_v17  ;;  %v2405_v24 = vpack.c.bf16 %v1130_v18, %v1130_v18  ;;  %v2339_v25 = vpack.c.bf16 %v866_v19, %v866_v19 }
  0xec   : > { %1950 = vst.msk [vmem:[%s2925_s25 + $0x100] sm:$0xf] %vm1885_vm2, %v2402_v21  ;;  %1889 = vst.msk [vmem:[%s2925_s25 + $0xc] sm:$0xf] %vm1885_vm2, %v2341_v22  ;;  %v2403_v26 = vpack.c.bf16 %v1122_v23, %v1122_v23 }
  0xed   : > { %1953 = vst.msk [vmem:[%s2925_s25 + $0x10c] sm:$0xf] %vm1885_vm2, %v2405_v24  ;;  %1887 = vst.msk [vmem:[%s2925_s25 + $0x4] sm:$0xf] %vm1885_vm2, %v2339_v25  ;;  %v2539_v27 = vpop.f32.mrb[4].mxu0 }
  0xee   : > { %1951 = vst.msk [vmem:[%s2925_s25 + $0x104] sm:$0xf] %vm1885_vm2, %v2403_v26  ;;  %v887_v28 = vadd.f32 %v2539_v27, %v2917_v2  ;;  %v2603_v29 = vpop.f32.mrb[4].mxu1  ;;  %v878_v30 = vpop.f32.mrb[5].mxu0 }
  0xef   : > { %v1143_v31 = vadd.f32 %v2603_v29, %v2917_v2  ;;  %v879_v32 = vadd.f32 %v2917_v2, %v878_v30  ;;  %v1134_v33 = vpop.f32.mrb[5].mxu1  ;;  %v2540_v34 = vpop.f32.mrb[6].mxu0 }
  0xf0   : > { %v2344_v35 = vpack.c.bf16 %v887_v28, %v887_v28  ;;  %v1135_v36 = vadd.f32 %v2917_v2, %v1134_v33  ;;  %v890_v37 = vadd.f32 %v2540_v34, %v2917_v2  ;;  %v2604_v38 = vpop.f32.mrb[6].mxu1  ;;  %v881_v39 = vpop.f32.mrb[7].mxu0 }
  0xf1   : > { %v2408_v40 = vpack.c.bf16 %v1143_v31, %v1143_v31  ;;  %v2342_v41 = vpack.c.bf16 %v879_v32, %v879_v32  ;;  %v1146_v42 = vadd.f32 %v2604_v38, %v2917_v2  ;;  %v882_v43 = vadd.f32 %v2917_v2, %v881_v39  ;;  %v1137_v44 = vpop.f32.mrb[7].mxu1 }
  0xf2   : > { %1892 = vst.msk [vmem:[%s2925_s25 + $0x18] sm:$0xf] %vm1885_vm2, %v2344_v35  ;;  %v2406_v45 = vpack.c.bf16 %v1135_v36, %v1135_v36  ;;  %v2345_v46 = vpack.c.bf16 %v890_v37, %v890_v37  ;;  %v1138_v47 = vadd.f32 %v2917_v2, %v1137_v44 }
  0xf3   : > { %1956 = vst.msk [vmem:[%s2925_s25 + $0x118] sm:$0xf] %vm1885_vm2, %v2408_v40  ;;  %1890 = vst.msk [vmem:[%s2925_s25 + $0x10] sm:$0xf] %vm1885_vm2, %v2342_v41  ;;  %v2409_v48 = vpack.c.bf16 %v1146_v42, %v1146_v42  ;;  %v2343_v49 = vpack.c.bf16 %v882_v43, %v882_v43 }
  0xf4   : > { %1954 = vst.msk [vmem:[%s2925_s25 + $0x110] sm:$0xf] %vm1885_vm2, %v2406_v45  ;;  %1893 = vst.msk [vmem:[%s2925_s25 + $0x1c] sm:$0xf] %vm1885_vm2, %v2345_v46  ;;  %v2407_v50 = vpack.c.bf16 %v1138_v47, %v1138_v47 }
  0xf5   : > { %1957 = vst.msk [vmem:[%s2925_s25 + $0x11c] sm:$0xf] %vm1885_vm2, %v2409_v48  ;;  %1891 = vst.msk [vmem:[%s2925_s25 + $0x14] sm:$0xf] %vm1885_vm2, %v2343_v49  ;;  %v2543_v51 = vpop.f32.mrb[8].mxu0 }
  0xf6   : > { %1955 = vst.msk [vmem:[%s2925_s25 + $0x114] sm:$0xf] %vm1885_vm2, %v2407_v50  ;;  %v903_v52 = vadd.f32 %v2543_v51, %v2917_v2  ;;  %v2607_v53 = vpop.f32.mrb[8].mxu1  ;;  %v894_v54 = vpop.f32.mrb[9].mxu0 }
  0xf7   : > { %v1159_v55 = vadd.f32 %v2607_v53, %v2917_v2  ;;  %v895_v56 = vadd.f32 %v2917_v2, %v894_v54  ;;  %v1150_v57 = vpop.f32.mrb[9].mxu1  ;;  %v2544_v58 = vpop.f32.mrb[10].mxu0 }
  0xf8   : > { %v2348_v59 = vpack.c.bf16 %v903_v52, %v903_v52  ;;  %v1151_v60 = vadd.f32 %v2917_v2, %v1150_v57  ;;  %v906_v61 = vadd.f32 %v2544_v58, %v2917_v2  ;;  %v2608_v62 = vpop.f32.mrb[10].mxu1  ;;  %v897_v63 = vpop.f32.mrb[11].mxu0 }
  0xf9   : > { %v2412_v0 = vpack.c.bf16 %v1159_v55, %v1159_v55  ;;  %v2346_v1 = vpack.c.bf16 %v895_v56, %v895_v56  ;;  %v1162_v3 = vadd.f32 %v2608_v62, %v2917_v2  ;;  %v898_v4 = vadd.f32 %v2917_v2, %v897_v63  ;;  %v1153_v5 = vpop.f32.mrb[11].mxu1 }
  0xfa   : > { %1896 = vst.msk [vmem:[%s2925_s25 + $0x28] sm:$0xf] %vm1885_vm2, %v2348_v59  ;;  %v2410_v6 = vpack.c.bf16 %v1151_v60, %v1151_v60  ;;  %v2349_v7 = vpack.c.bf16 %v906_v61, %v906_v61  ;;  %v1154_v8 = vadd.f32 %v2917_v2, %v1153_v5 }
  0xfb   : > { %1960 = vst.msk [vmem:[%s2925_s25 + $0x128] sm:$0xf] %vm1885_vm2, %v2412_v0  ;;  %1894 = vst.msk [vmem:[%s2925_s25 + $0x20] sm:$0xf] %vm1885_vm2, %v2346_v1  ;;  %v2413_v9 = vpack.c.bf16 %v1162_v3, %v1162_v3  ;;  %v2347_v10 = vpack.c.bf16 %v898_v4, %v898_v4 }
  0xfc   : > { %1958 = vst.msk [vmem:[%s2925_s25 + $0x120] sm:$0xf] %vm1885_vm2, %v2410_v6  ;;  %1897 = vst.msk [vmem:[%s2925_s25 + $0x2c] sm:$0xf] %vm1885_vm2, %v2349_v7  ;;  %v2411_v11 = vpack.c.bf16 %v1154_v8, %v1154_v8 }
  0xfd   : > { %1961 = vst.msk [vmem:[%s2925_s25 + $0x12c] sm:$0xf] %vm1885_vm2, %v2413_v9  ;;  %1895 = vst.msk [vmem:[%s2925_s25 + $0x24] sm:$0xf] %vm1885_vm2, %v2347_v10  ;;  %v2547_v12 = vpop.f32.mrb[12].mxu0 }
  0xfe   : > { %1959 = vst.msk [vmem:[%s2925_s25 + $0x124] sm:$0xf] %vm1885_vm2, %v2411_v11  ;;  %v919_v13 = vadd.f32 %v2547_v12, %v2917_v2  ;;  %v2611_v14 = vpop.f32.mrb[12].mxu1  ;;  %v910_v15 = vpop.f32.mrb[13].mxu0 }
  0xff   : > { %v1175_v16 = vadd.f32 %v2611_v14, %v2917_v2  ;;  %v911_v17 = vadd.f32 %v2917_v2, %v910_v15  ;;  %v1166_v18 = vpop.f32.mrb[13].mxu1  ;;  %v2548_v19 = vpop.f32.mrb[14].mxu0 }
 0x100   : > { %v2352_v20 = vpack.c.bf16 %v919_v13, %v919_v13  ;;  %v1167_v21 = vadd.f32 %v2917_v2, %v1166_v18  ;;  %v922_v22 = vadd.f32 %v2548_v19, %v2917_v2  ;;  %v2612_v23 = vpop.f32.mrb[14].mxu1  ;;  %v913_v24 = vpop.f32.mrb[15].mxu0 }
 0x101   : > { %v2416_v25 = vpack.c.bf16 %v1175_v16, %v1175_v16  ;;  %v2350_v26 = vpack.c.bf16 %v911_v17, %v911_v17  ;;  %v1178_v27 = vadd.f32 %v2612_v23, %v2917_v2  ;;  %v914_v28 = vadd.f32 %v2917_v2, %v913_v24  ;;  %v1169_v29 = vpop.f32.mrb[15].mxu1 }
 0x102   : > { %1900 = vst.msk [vmem:[%s2925_s25 + $0x38] sm:$0xf] %vm1885_vm2, %v2352_v20  ;;  %v2414_v30 = vpack.c.bf16 %v1167_v21, %v1167_v21  ;;  %v2353_v31 = vpack.c.bf16 %v922_v22, %v922_v22  ;;  %v1170_v32 = vadd.f32 %v2917_v2, %v1169_v29 }
 0x103   : > { %1964 = vst.msk [vmem:[%s2925_s25 + $0x138] sm:$0xf] %vm1885_vm2, %v2416_v25  ;;  %1898 = vst.msk [vmem:[%s2925_s25 + $0x30] sm:$0xf] %vm1885_vm2, %v2350_v26  ;;  %v2417_v33 = vpack.c.bf16 %v1178_v27, %v1178_v27  ;;  %v2351_v34 = vpack.c.bf16 %v914_v28, %v914_v28 }
 0x104   : > { %1962 = vst.msk [vmem:[%s2925_s25 + $0x130] sm:$0xf] %vm1885_vm2, %v2414_v30  ;;  %1901 = vst.msk [vmem:[%s2925_s25 + $0x3c] sm:$0xf] %vm1885_vm2, %v2353_v31  ;;  %v2415_v35 = vpack.c.bf16 %v1170_v32, %v1170_v32 }
 0x105   : > { %1965 = vst.msk [vmem:[%s2925_s25 + $0x13c] sm:$0xf] %vm1885_vm2, %v2417_v33  ;;  %1899 = vst.msk [vmem:[%s2925_s25 + $0x34] sm:$0xf] %vm1885_vm2, %v2351_v34  ;;  %v2551_v36 = vpop.f32.mrb[16].mxu0 }
 0x106   : > { %1963 = vst.msk [vmem:[%s2925_s25 + $0x134] sm:$0xf] %vm1885_vm2, %v2415_v35  ;;  %v935_v37 = vadd.f32 %v2551_v36, %v2917_v2  ;;  %v2615_v38 = vpop.f32.mrb[16].mxu1  ;;  %v926_v39 = vpop.f32.mrb[17].mxu0 }
 0x107   : > { %v1191_v40 = vadd.f32 %v2615_v38, %v2917_v2  ;;  %v927_v41 = vadd.f32 %v2917_v2, %v926_v39  ;;  %v1182_v42 = vpop.f32.mrb[17].mxu1  ;;  %v2552_v43 = vpop.f32.mrb[18].mxu0 }
 0x108   : > { %v2356_v44 = vpack.c.bf16 %v935_v37, %v935_v37  ;;  %v1183_v45 = vadd.f32 %v2917_v2, %v1182_v42  ;;  %v938_v46 = vadd.f32 %v2552_v43, %v2917_v2  ;;  %v2616_v47 = vpop.f32.mrb[18].mxu1  ;;  %v929_v48 = vpop.f32.mrb[19].mxu0 }
 0x109   : > { %v2420_v49 = vpack.c.bf16 %v1191_v40, %v1191_v40  ;;  %v2354_v50 = vpack.c.bf16 %v927_v41, %v927_v41  ;;  %v1194_v51 = vadd.f32 %v2616_v47, %v2917_v2  ;;  %v930_v52 = vadd.f32 %v2917_v2, %v929_v48  ;;  %v1185_v53 = vpop.f32.mrb[19].mxu1 }
 0x10a   : > { %1904 = vst.msk [vmem:[%s2925_s25 + $0x48] sm:$0xf] %vm1885_vm2, %v2356_v44  ;;  %v2418_v54 = vpack.c.bf16 %v1183_v45, %v1183_v45  ;;  %v2357_v55 = vpack.c.bf16 %v938_v46, %v938_v46  ;;  %v1186_v56 = vadd.f32 %v2917_v2, %v1185_v53 }
 0x10b   : > { %1968 = vst.msk [vmem:[%s2925_s25 + $0x148] sm:$0xf] %vm1885_vm2, %v2420_v49  ;;  %1902 = vst.msk [vmem:[%s2925_s25 + $0x40] sm:$0xf] %vm1885_vm2, %v2354_v50  ;;  %v2421_v57 = vpack.c.bf16 %v1194_v51, %v1194_v51  ;;  %v2355_v58 = vpack.c.bf16 %v930_v52, %v930_v52 }
 0x10c   : > { %1966 = vst.msk [vmem:[%s2925_s25 + $0x140] sm:$0xf] %vm1885_vm2, %v2418_v54  ;;  %1905 = vst.msk [vmem:[%s2925_s25 + $0x4c] sm:$0xf] %vm1885_vm2, %v2357_v55  ;;  %v2419_v59 = vpack.c.bf16 %v1186_v56, %v1186_v56 }
 0x10d   : > { %1969 = vst.msk [vmem:[%s2925_s25 + $0x14c] sm:$0xf] %vm1885_vm2, %v2421_v57  ;;  %1903 = vst.msk [vmem:[%s2925_s25 + $0x44] sm:$0xf] %vm1885_vm2, %v2355_v58  ;;  %v2555_v60 = vpop.f32.mrb[20].mxu0 }
 0x10e   : > { %1967 = vst.msk [vmem:[%s2925_s25 + $0x144] sm:$0xf] %vm1885_vm2, %v2419_v59  ;;  %v951_v61 = vadd.f32 %v2555_v60, %v2917_v2  ;;  %v2619_v62 = vpop.f32.mrb[20].mxu1  ;;  %v942_v63 = vpop.f32.mrb[21].mxu0 }
 0x10f   : > { %v1207_v0 = vadd.f32 %v2619_v62, %v2917_v2  ;;  %v943_v1 = vadd.f32 %v2917_v2, %v942_v63  ;;  %v1198_v3 = vpop.f32.mrb[21].mxu1  ;;  %v2556_v4 = vpop.f32.mrb[22].mxu0 }
 0x110   : > { %v2360_v5 = vpack.c.bf16 %v951_v61, %v951_v61  ;;  %v1199_v6 = vadd.f32 %v2917_v2, %v1198_v3  ;;  %v954_v7 = vadd.f32 %v2556_v4, %v2917_v2  ;;  %v2620_v8 = vpop.f32.mrb[22].mxu1  ;;  %v945_v9 = vpop.f32.mrb[23].mxu0 }
 0x111   : > { %v2424_v10 = vpack.c.bf16 %v1207_v0, %v1207_v0  ;;  %v2358_v11 = vpack.c.bf16 %v943_v1, %v943_v1  ;;  %v1210_v12 = vadd.f32 %v2620_v8, %v2917_v2  ;;  %v946_v13 = vadd.f32 %v2917_v2, %v945_v9  ;;  %v1201_v14 = vpop.f32.mrb[23].mxu1 }
 0x112   : > { %1908 = vst.msk [vmem:[%s2925_s25 + $0x58] sm:$0xf] %vm1885_vm2, %v2360_v5  ;;  %v2422_v15 = vpack.c.bf16 %v1199_v6, %v1199_v6  ;;  %v2361_v16 = vpack.c.bf16 %v954_v7, %v954_v7  ;;  %v1202_v17 = vadd.f32 %v2917_v2, %v1201_v14 }
 0x113   : > { %1972 = vst.msk [vmem:[%s2925_s25 + $0x158] sm:$0xf] %vm1885_vm2, %v2424_v10  ;;  %1906 = vst.msk [vmem:[%s2925_s25 + $0x50] sm:$0xf] %vm1885_vm2, %v2358_v11  ;;  %v2425_v18 = vpack.c.bf16 %v1210_v12, %v1210_v12  ;;  %v2359_v19 = vpack.c.bf16 %v946_v13, %v946_v13 }
 0x114   : > { %1970 = vst.msk [vmem:[%s2925_s25 + $0x150] sm:$0xf] %vm1885_vm2, %v2422_v15  ;;  %1909 = vst.msk [vmem:[%s2925_s25 + $0x5c] sm:$0xf] %vm1885_vm2, %v2361_v16  ;;  %v2423_v20 = vpack.c.bf16 %v1202_v17, %v1202_v17 }
 0x115   : > { %1973 = vst.msk [vmem:[%s2925_s25 + $0x15c] sm:$0xf] %vm1885_vm2, %v2425_v18  ;;  %1907 = vst.msk [vmem:[%s2925_s25 + $0x54] sm:$0xf] %vm1885_vm2, %v2359_v19  ;;  %v2559_v21 = vpop.f32.mrb[24].mxu0 }
 0x116   : > { %1971 = vst.msk [vmem:[%s2925_s25 + $0x154] sm:$0xf] %vm1885_vm2, %v2423_v20  ;;  %v967_v22 = vadd.f32 %v2559_v21, %v2917_v2  ;;  %v2623_v23 = vpop.f32.mrb[24].mxu1  ;;  %v958_v24 = vpop.f32.mrb[25].mxu0 }
 0x117   : > { %v1223_v25 = vadd.f32 %v2623_v23, %v2917_v2  ;;  %v959_v26 = vadd.f32 %v2917_v2, %v958_v24  ;;  %v1214_v27 = vpop.f32.mrb[25].mxu1  ;;  %v2560_v28 = vpop.f32.mrb[26].mxu0 }
 0x118   : > { %v2364_v29 = vpack.c.bf16 %v967_v22, %v967_v22  ;;  %v1215_v30 = vadd.f32 %v2917_v2, %v1214_v27  ;;  %v970_v31 = vadd.f32 %v2560_v28, %v2917_v2  ;;  %v2624_v32 = vpop.f32.mrb[26].mxu1  ;;  %v961_v33 = vpop.f32.mrb[27].mxu0 }
 0x119   : > { %v2428_v34 = vpack.c.bf16 %v1223_v25, %v1223_v25  ;;  %v2362_v35 = vpack.c.bf16 %v959_v26, %v959_v26  ;;  %v1226_v36 = vadd.f32 %v2624_v32, %v2917_v2  ;;  %v962_v37 = vadd.f32 %v2917_v2, %v961_v33  ;;  %v1217_v38 = vpop.f32.mrb[27].mxu1 }
 0x11a   : > { %1912 = vst.msk [vmem:[%s2925_s25 + $0x68] sm:$0xf] %vm1885_vm2, %v2364_v29  ;;  %v2426_v39 = vpack.c.bf16 %v1215_v30, %v1215_v30  ;;  %v2365_v40 = vpack.c.bf16 %v970_v31, %v970_v31  ;;  %v1218_v41 = vadd.f32 %v2917_v2, %v1217_v38 }
 0x11b   : > { %1976 = vst.msk [vmem:[%s2925_s25 + $0x168] sm:$0xf] %vm1885_vm2, %v2428_v34  ;;  %1910 = vst.msk [vmem:[%s2925_s25 + $0x60] sm:$0xf] %vm1885_vm2, %v2362_v35  ;;  %v2429_v42 = vpack.c.bf16 %v1226_v36, %v1226_v36  ;;  %v2363_v43 = vpack.c.bf16 %v962_v37, %v962_v37 }
 0x11c   : > { %1974 = vst.msk [vmem:[%s2925_s25 + $0x160] sm:$0xf] %vm1885_vm2, %v2426_v39  ;;  %1913 = vst.msk [vmem:[%s2925_s25 + $0x6c] sm:$0xf] %vm1885_vm2, %v2365_v40  ;;  %v2427_v44 = vpack.c.bf16 %v1218_v41, %v1218_v41 }
 0x11d   : > { %1977 = vst.msk [vmem:[%s2925_s25 + $0x16c] sm:$0xf] %vm1885_vm2, %v2429_v42  ;;  %1911 = vst.msk [vmem:[%s2925_s25 + $0x64] sm:$0xf] %vm1885_vm2, %v2363_v43  ;;  %v2563_v45 = vpop.f32.mrb[28].mxu0 }
 0x11e   : > { %1975 = vst.msk [vmem:[%s2925_s25 + $0x164] sm:$0xf] %vm1885_vm2, %v2427_v44  ;;  %v983_v46 = vadd.f32 %v2563_v45, %v2917_v2  ;;  %v2627_v47 = vpop.f32.mrb[28].mxu1  ;;  %v974_v48 = vpop.f32.mrb[29].mxu0 }
 0x11f   : > { %v1239_v49 = vadd.f32 %v2627_v47, %v2917_v2  ;;  %v975_v50 = vadd.f32 %v2917_v2, %v974_v48  ;;  %v1230_v51 = vpop.f32.mrb[29].mxu1  ;;  %v2564_v52 = vpop.f32.mrb[30].mxu0 }
 0x120   : > { %v2368_v53 = vpack.c.bf16 %v983_v46, %v983_v46  ;;  %v1231_v54 = vadd.f32 %v2917_v2, %v1230_v51  ;;  %v986_v55 = vadd.f32 %v2564_v52, %v2917_v2  ;;  %v2628_v56 = vpop.f32.mrb[30].mxu1  ;;  %v977_v57 = vpop.f32.mrb[31].mxu0 }
 0x121   : > { %v2432_v58 = vpack.c.bf16 %v1239_v49, %v1239_v49  ;;  %v2366_v59 = vpack.c.bf16 %v975_v50, %v975_v50  ;;  %v1242_v60 = vadd.f32 %v2628_v56, %v2917_v2  ;;  %v978_v61 = vadd.f32 %v2917_v2, %v977_v57  ;;  %v1233_v62 = vpop.f32.mrb[31].mxu1 }
 0x122   : > { %1916 = vst.msk [vmem:[%s2925_s25 + $0x78] sm:$0xf] %vm1885_vm2, %v2368_v53  ;;  %v2430_v63 = vpack.c.bf16 %v1231_v54, %v1231_v54  ;;  %v2369_v0 = vpack.c.bf16 %v986_v55, %v986_v55  ;;  %v1234_v1 = vadd.f32 %v2917_v2, %v1233_v62 }
 0x123   : > { %1980 = vst.msk [vmem:[%s2925_s25 + $0x178] sm:$0xf] %vm1885_vm2, %v2432_v58  ;;  %1914 = vst.msk [vmem:[%s2925_s25 + $0x70] sm:$0xf] %vm1885_vm2, %v2366_v59  ;;  %v2433_v3 = vpack.c.bf16 %v1242_v60, %v1242_v60  ;;  %v2367_v4 = vpack.c.bf16 %v978_v61, %v978_v61 }
 0x124   : > { %1978 = vst.msk [vmem:[%s2925_s25 + $0x170] sm:$0xf] %vm1885_vm2, %v2430_v63  ;;  %1917 = vst.msk [vmem:[%s2925_s25 + $0x7c] sm:$0xf] %vm1885_vm2, %v2369_v0  ;;  %v2431_v5 = vpack.c.bf16 %v1234_v1, %v1234_v1 }
 0x125   : > { %1981 = vst.msk [vmem:[%s2925_s25 + $0x17c] sm:$0xf] %vm1885_vm2, %v2433_v3  ;;  %1915 = vst.msk [vmem:[%s2925_s25 + $0x74] sm:$0xf] %vm1885_vm2, %v2367_v4  ;;  %v2567_v6 = vpop.f32.mrb[32].mxu0 }
 0x126   : > { %1979 = vst.msk [vmem:[%s2925_s25 + $0x174] sm:$0xf] %vm1885_vm2, %v2431_v5  ;;  %v999_v7 = vadd.f32 %v2567_v6, %v2917_v2  ;;  %v2631_v8 = vpop.f32.mrb[32].mxu1  ;;  %v990_v9 = vpop.f32.mrb[33].mxu0 }
 0x127   : > { %v1255_v10 = vadd.f32 %v2631_v8, %v2917_v2  ;;  %v991_v11 = vadd.f32 %v2917_v2, %v990_v9  ;;  %v1246_v12 = vpop.f32.mrb[33].mxu1  ;;  %v2568_v13 = vpop.f32.mrb[34].mxu0 }
 0x128   : > { %v2372_v14 = vpack.c.bf16 %v999_v7, %v999_v7  ;;  %v1247_v15 = vadd.f32 %v2917_v2, %v1246_v12  ;;  %v1002_v16 = vadd.f32 %v2568_v13, %v2917_v2  ;;  %v2632_v17 = vpop.f32.mrb[34].mxu1  ;;  %v993_v18 = vpop.f32.mrb[35].mxu0 }
 0x129   : > { %v2436_v19 = vpack.c.bf16 %v1255_v10, %v1255_v10  ;;  %v2370_v20 = vpack.c.bf16 %v991_v11, %v991_v11  ;;  %v1258_v21 = vadd.f32 %v2632_v17, %v2917_v2  ;;  %v994_v22 = vadd.f32 %v2917_v2, %v993_v18  ;;  %v1249_v23 = vpop.f32.mrb[35].mxu1 }
 0x12a   : > { %1920 = vst.msk [vmem:[%s2925_s25 + $0x88] sm:$0xf] %vm1885_vm2, %v2372_v14  ;;  %v2434_v24 = vpack.c.bf16 %v1247_v15, %v1247_v15  ;;  %v2373_v25 = vpack.c.bf16 %v1002_v16, %v1002_v16  ;;  %v1250_v26 = vadd.f32 %v2917_v2, %v1249_v23 }
 0x12b   : > { %1984 = vst.msk [vmem:[%s2925_s25 + $0x188] sm:$0xf] %vm1885_vm2, %v2436_v19  ;;  %1918 = vst.msk [vmem:[%s2925_s25 + $0x80] sm:$0xf] %vm1885_vm2, %v2370_v20  ;;  %v2437_v27 = vpack.c.bf16 %v1258_v21, %v1258_v21  ;;  %v2371_v28 = vpack.c.bf16 %v994_v22, %v994_v22 }
 0x12c   : > { %1982 = vst.msk [vmem:[%s2925_s25 + $0x180] sm:$0xf] %vm1885_vm2, %v2434_v24  ;;  %1921 = vst.msk [vmem:[%s2925_s25 + $0x8c] sm:$0xf] %vm1885_vm2, %v2373_v25  ;;  %v2435_v29 = vpack.c.bf16 %v1250_v26, %v1250_v26 }
 0x12d   : > { %1985 = vst.msk [vmem:[%s2925_s25 + $0x18c] sm:$0xf] %vm1885_vm2, %v2437_v27  ;;  %1919 = vst.msk [vmem:[%s2925_s25 + $0x84] sm:$0xf] %vm1885_vm2, %v2371_v28  ;;  %v2571_v30 = vpop.f32.mrb[36].mxu0 }
 0x12e   : > { %1983 = vst.msk [vmem:[%s2925_s25 + $0x184] sm:$0xf] %vm1885_vm2, %v2435_v29  ;;  %v1015_v31 = vadd.f32 %v2571_v30, %v2917_v2  ;;  %v2635_v32 = vpop.f32.mrb[36].mxu1  ;;  %v1006_v33 = vpop.f32.mrb[37].mxu0 }
 0x12f   : > { %v1271_v34 = vadd.f32 %v2635_v32, %v2917_v2  ;;  %v1007_v35 = vadd.f32 %v2917_v2, %v1006_v33  ;;  %v1262_v36 = vpop.f32.mrb[37].mxu1  ;;  %v2572_v37 = vpop.f32.mrb[38].mxu0 }
 0x130   : > { %v2376_v38 = vpack.c.bf16 %v1015_v31, %v1015_v31  ;;  %v1263_v39 = vadd.f32 %v2917_v2, %v1262_v36  ;;  %v1018_v40 = vadd.f32 %v2572_v37, %v2917_v2  ;;  %v2636_v41 = vpop.f32.mrb[38].mxu1  ;;  %v1009_v42 = vpop.f32.mrb[39].mxu0 }
 0x131   : > { %v2440_v43 = vpack.c.bf16 %v1271_v34, %v1271_v34  ;;  %v2374_v44 = vpack.c.bf16 %v1007_v35, %v1007_v35  ;;  %v1274_v45 = vadd.f32 %v2636_v41, %v2917_v2  ;;  %v1010_v46 = vadd.f32 %v2917_v2, %v1009_v42  ;;  %v1265_v47 = vpop.f32.mrb[39].mxu1 }
 0x132   : > { %1924 = vst.msk [vmem:[%s2925_s25 + $0x98] sm:$0xf] %vm1885_vm2, %v2376_v38  ;;  %v2438_v48 = vpack.c.bf16 %v1263_v39, %v1263_v39  ;;  %v2377_v49 = vpack.c.bf16 %v1018_v40, %v1018_v40  ;;  %v1266_v50 = vadd.f32 %v2917_v2, %v1265_v47 }
 0x133   : > { %1988 = vst.msk [vmem:[%s2925_s25 + $0x198] sm:$0xf] %vm1885_vm2, %v2440_v43  ;;  %1922 = vst.msk [vmem:[%s2925_s25 + $0x90] sm:$0xf] %vm1885_vm2, %v2374_v44  ;;  %v2441_v51 = vpack.c.bf16 %v1274_v45, %v1274_v45  ;;  %v2375_v52 = vpack.c.bf16 %v1010_v46, %v1010_v46 }
 0x134   : > { %1986 = vst.msk [vmem:[%s2925_s25 + $0x190] sm:$0xf] %vm1885_vm2, %v2438_v48  ;;  %1925 = vst.msk [vmem:[%s2925_s25 + $0x9c] sm:$0xf] %vm1885_vm2, %v2377_v49  ;;  %v2439_v53 = vpack.c.bf16 %v1266_v50, %v1266_v50 }
 0x135   : > { %1989 = vst.msk [vmem:[%s2925_s25 + $0x19c] sm:$0xf] %vm1885_vm2, %v2441_v51  ;;  %1923 = vst.msk [vmem:[%s2925_s25 + $0x94] sm:$0xf] %vm1885_vm2, %v2375_v52  ;;  %v2575_v54 = vpop.f32.mrb[40].mxu0 }
 0x136   : > { %1987 = vst.msk [vmem:[%s2925_s25 + $0x194] sm:$0xf] %vm1885_vm2, %v2439_v53  ;;  %v1031_v55 = vadd.f32 %v2575_v54, %v2917_v2  ;;  %v2639_v56 = vpop.f32.mrb[40].mxu1  ;;  %v1022_v57 = vpop.f32.mrb[41].mxu0 }
 0x137   : > { %v1287_v58 = vadd.f32 %v2639_v56, %v2917_v2  ;;  %v1023_v59 = vadd.f32 %v2917_v2, %v1022_v57  ;;  %v1278_v60 = vpop.f32.mrb[41].mxu1  ;;  %v2576_v61 = vpop.f32.mrb[42].mxu0 }
 0x138   : > { %v2380_v62 = vpack.c.bf16 %v1031_v55, %v1031_v55  ;;  %v1279_v63 = vadd.f32 %v2917_v2, %v1278_v60  ;;  %v1034_v0 = vadd.f32 %v2576_v61, %v2917_v2  ;;  %v2640_v1 = vpop.f32.mrb[42].mxu1  ;;  %v1025_v3 = vpop.f32.mrb[43].mxu0 }
 0x139   : > { %v2444_v4 = vpack.c.bf16 %v1287_v58, %v1287_v58  ;;  %v2378_v5 = vpack.c.bf16 %v1023_v59, %v1023_v59  ;;  %v1290_v6 = vadd.f32 %v2640_v1, %v2917_v2  ;;  %v1026_v7 = vadd.f32 %v2917_v2, %v1025_v3  ;;  %v1281_v8 = vpop.f32.mrb[43].mxu1 }
 0x13a   : > { %1928 = vst.msk [vmem:[%s2925_s25 + $0xa8] sm:$0xf] %vm1885_vm2, %v2380_v62  ;;  %v2442_v9 = vpack.c.bf16 %v1279_v63, %v1279_v63  ;;  %v2381_v10 = vpack.c.bf16 %v1034_v0, %v1034_v0  ;;  %v1282_v11 = vadd.f32 %v2917_v2, %v1281_v8 }
 0x13b   : > { %1992 = vst.msk [vmem:[%s2925_s25 + $0x1a8] sm:$0xf] %vm1885_vm2, %v2444_v4  ;;  %1926 = vst.msk [vmem:[%s2925_s25 + $0xa0] sm:$0xf] %vm1885_vm2, %v2378_v5  ;;  %v2445_v12 = vpack.c.bf16 %v1290_v6, %v1290_v6  ;;  %v2379_v13 = vpack.c.bf16 %v1026_v7, %v1026_v7 }
 0x13c   : > { %1990 = vst.msk [vmem:[%s2925_s25 + $0x1a0] sm:$0xf] %vm1885_vm2, %v2442_v9  ;;  %1929 = vst.msk [vmem:[%s2925_s25 + $0xac] sm:$0xf] %vm1885_vm2, %v2381_v10  ;;  %v2443_v14 = vpack.c.bf16 %v1282_v11, %v1282_v11 }
 0x13d   : > { %1993 = vst.msk [vmem:[%s2925_s25 + $0x1ac] sm:$0xf] %vm1885_vm2, %v2445_v12  ;;  %1927 = vst.msk [vmem:[%s2925_s25 + $0xa4] sm:$0xf] %vm1885_vm2, %v2379_v13  ;;  %v2579_v15 = vpop.f32.mrb[44].mxu0 }
 0x13e   : > { %1991 = vst.msk [vmem:[%s2925_s25 + $0x1a4] sm:$0xf] %vm1885_vm2, %v2443_v14  ;;  %v1047_v16 = vadd.f32 %v2579_v15, %v2917_v2  ;;  %v2643_v17 = vpop.f32.mrb[44].mxu1  ;;  %v1038_v18 = vpop.f32.mrb[45].mxu0 }
 0x13f   : > { %v1303_v19 = vadd.f32 %v2643_v17, %v2917_v2  ;;  %v1039_v20 = vadd.f32 %v2917_v2, %v1038_v18  ;;  %v1294_v21 = vpop.f32.mrb[45].mxu1  ;;  %v2580_v22 = vpop.f32.mrb[46].mxu0 }
 0x140   : > { %v2384_v23 = vpack.c.bf16 %v1047_v16, %v1047_v16  ;;  %v1295_v24 = vadd.f32 %v2917_v2, %v1294_v21  ;;  %v1050_v25 = vadd.f32 %v2580_v22, %v2917_v2  ;;  %v2644_v26 = vpop.f32.mrb[46].mxu1  ;;  %v1041_v27 = vpop.f32.mrb[47].mxu0 }
 0x141   : > { %v2448_v28 = vpack.c.bf16 %v1303_v19, %v1303_v19  ;;  %v2382_v29 = vpack.c.bf16 %v1039_v20, %v1039_v20  ;;  %v1306_v30 = vadd.f32 %v2644_v26, %v2917_v2  ;;  %v1042_v31 = vadd.f32 %v2917_v2, %v1041_v27  ;;  %v1297_v32 = vpop.f32.mrb[47].mxu1 }
 0x142   : > { %1932 = vst.msk [vmem:[%s2925_s25 + $0xb8] sm:$0xf] %vm1885_vm2, %v2384_v23  ;;  %v2446_v33 = vpack.c.bf16 %v1295_v24, %v1295_v24  ;;  %v2385_v34 = vpack.c.bf16 %v1050_v25, %v1050_v25  ;;  %v1298_v35 = vadd.f32 %v2917_v2, %v1297_v32 }
 0x143   : > { %1996 = vst.msk [vmem:[%s2925_s25 + $0x1b8] sm:$0xf] %vm1885_vm2, %v2448_v28  ;;  %1930 = vst.msk [vmem:[%s2925_s25 + $0xb0] sm:$0xf] %vm1885_vm2, %v2382_v29  ;;  %v2449_v36 = vpack.c.bf16 %v1306_v30, %v1306_v30  ;;  %v2383_v37 = vpack.c.bf16 %v1042_v31, %v1042_v31 }
 0x144   : > { %1994 = vst.msk [vmem:[%s2925_s25 + $0x1b0] sm:$0xf] %vm1885_vm2, %v2446_v33  ;;  %1933 = vst.msk [vmem:[%s2925_s25 + $0xbc] sm:$0xf] %vm1885_vm2, %v2385_v34  ;;  %v2447_v38 = vpack.c.bf16 %v1298_v35, %v1298_v35 }
 0x145   : > { %1997 = vst.msk [vmem:[%s2925_s25 + $0x1bc] sm:$0xf] %vm1885_vm2, %v2449_v36  ;;  %1931 = vst.msk [vmem:[%s2925_s25 + $0xb4] sm:$0xf] %vm1885_vm2, %v2383_v37  ;;  %v2583_v39 = vpop.f32.mrb[48].mxu0 }
 0x146   : > { %1995 = vst.msk [vmem:[%s2925_s25 + $0x1b4] sm:$0xf] %vm1885_vm2, %v2447_v38  ;;  %v1063_v40 = vadd.f32 %v2583_v39, %v2917_v2  ;;  %v2647_v41 = vpop.f32.mrb[48].mxu1  ;;  %v1054_v42 = vpop.f32.mrb[49].mxu0 }
 0x147   : > { %v1319_v43 = vadd.f32 %v2647_v41, %v2917_v2  ;;  %v1055_v44 = vadd.f32 %v2917_v2, %v1054_v42  ;;  %v1310_v45 = vpop.f32.mrb[49].mxu1  ;;  %v2584_v46 = vpop.f32.mrb[50].mxu0 }
 0x148   : > { %v2388_v47 = vpack.c.bf16 %v1063_v40, %v1063_v40  ;;  %v1311_v48 = vadd.f32 %v2917_v2, %v1310_v45  ;;  %v1066_v49 = vadd.f32 %v2584_v46, %v2917_v2  ;;  %v2648_v50 = vpop.f32.mrb[50].mxu1  ;;  %v1057_v51 = vpop.f32.mrb[51].mxu0 }
 0x149   : > { %v2452_v52 = vpack.c.bf16 %v1319_v43, %v1319_v43  ;;  %v2386_v53 = vpack.c.bf16 %v1055_v44, %v1055_v44  ;;  %v1322_v54 = vadd.f32 %v2648_v50, %v2917_v2  ;;  %v1058_v55 = vadd.f32 %v2917_v2, %v1057_v51  ;;  %v1313_v56 = vpop.f32.mrb[51].mxu1 }
 0x14a   : > { %1936 = vst.msk [vmem:[%s2925_s25 + $0xc8] sm:$0xf] %vm1885_vm2, %v2388_v47  ;;  %v2450_v57 = vpack.c.bf16 %v1311_v48, %v1311_v48  ;;  %v2389_v58 = vpack.c.bf16 %v1066_v49, %v1066_v49  ;;  %v1314_v59 = vadd.f32 %v2917_v2, %v1313_v56 }
 0x14b   : > { %2000 = vst.msk [vmem:[%s2925_s25 + $0x1c8] sm:$0xf] %vm1885_vm2, %v2452_v52  ;;  %1934 = vst.msk [vmem:[%s2925_s25 + $0xc0] sm:$0xf] %vm1885_vm2, %v2386_v53  ;;  %v2453_v60 = vpack.c.bf16 %v1322_v54, %v1322_v54  ;;  %v2387_v61 = vpack.c.bf16 %v1058_v55, %v1058_v55 }
 0x14c   : > { %1998 = vst.msk [vmem:[%s2925_s25 + $0x1c0] sm:$0xf] %vm1885_vm2, %v2450_v57  ;;  %1937 = vst.msk [vmem:[%s2925_s25 + $0xcc] sm:$0xf] %vm1885_vm2, %v2389_v58  ;;  %v2451_v62 = vpack.c.bf16 %v1314_v59, %v1314_v59 }
 0x14d   : > { %2001 = vst.msk [vmem:[%s2925_s25 + $0x1cc] sm:$0xf] %vm1885_vm2, %v2453_v60  ;;  %1935 = vst.msk [vmem:[%s2925_s25 + $0xc4] sm:$0xf] %vm1885_vm2, %v2387_v61  ;;  %v2587_v63 = vpop.f32.mrb[52].mxu0 }
 0x14e   : > { %1999 = vst.msk [vmem:[%s2925_s25 + $0x1c4] sm:$0xf] %vm1885_vm2, %v2451_v62  ;;  %v1079_v0 = vadd.f32 %v2587_v63, %v2917_v2  ;;  %v2651_v1 = vpop.f32.mrb[52].mxu1  ;;  %v1070_v3 = vpop.f32.mrb[53].mxu0 }
 0x14f   : > { %v1335_v4 = vadd.f32 %v2651_v1, %v2917_v2  ;;  %v1071_v5 = vadd.f32 %v2917_v2, %v1070_v3  ;;  %v1326_v6 = vpop.f32.mrb[53].mxu1  ;;  %v2588_v7 = vpop.f32.mrb[54].mxu0 }
 0x150   : > { %v2392_v8 = vpack.c.bf16 %v1079_v0, %v1079_v0  ;;  %v1327_v9 = vadd.f32 %v2917_v2, %v1326_v6  ;;  %v1082_v10 = vadd.f32 %v2588_v7, %v2917_v2  ;;  %v2652_v11 = vpop.f32.mrb[54].mxu1  ;;  %v1073_v12 = vpop.f32.mrb[55].mxu0 }
 0x151   : > { %v2456_v13 = vpack.c.bf16 %v1335_v4, %v1335_v4  ;;  %v2390_v14 = vpack.c.bf16 %v1071_v5, %v1071_v5  ;;  %v1338_v15 = vadd.f32 %v2652_v11, %v2917_v2  ;;  %v1074_v16 = vadd.f32 %v2917_v2, %v1073_v12  ;;  %v1329_v17 = vpop.f32.mrb[55].mxu1 }
 0x152   : > { %1940 = vst.msk [vmem:[%s2925_s25 + $0xd8] sm:$0xf] %vm1885_vm2, %v2392_v8  ;;  %v2454_v18 = vpack.c.bf16 %v1327_v9, %v1327_v9  ;;  %v2393_v19 = vpack.c.bf16 %v1082_v10, %v1082_v10  ;;  %v1330_v20 = vadd.f32 %v2917_v2, %v1329_v17 }
 0x153   : > { %2004 = vst.msk [vmem:[%s2925_s25 + $0x1d8] sm:$0xf] %vm1885_vm2, %v2456_v13  ;;  %1938 = vst.msk [vmem:[%s2925_s25 + $0xd0] sm:$0xf] %vm1885_vm2, %v2390_v14  ;;  %v2457_v21 = vpack.c.bf16 %v1338_v15, %v1338_v15  ;;  %v2391_v22 = vpack.c.bf16 %v1074_v16, %v1074_v16 }
 0x154   : > { %2002 = vst.msk [vmem:[%s2925_s25 + $0x1d0] sm:$0xf] %vm1885_vm2, %v2454_v18  ;;  %1941 = vst.msk [vmem:[%s2925_s25 + $0xdc] sm:$0xf] %vm1885_vm2, %v2393_v19  ;;  %v2455_v23 = vpack.c.bf16 %v1330_v20, %v1330_v20 }
 0x155   : > { %2005 = vst.msk [vmem:[%s2925_s25 + $0x1dc] sm:$0xf] %vm1885_vm2, %v2457_v21  ;;  %1939 = vst.msk [vmem:[%s2925_s25 + $0xd4] sm:$0xf] %vm1885_vm2, %v2391_v22  ;;  %v2591_v24 = vpop.f32.mrb[56].mxu0 }
 0x156   : > { %2003 = vst.msk [vmem:[%s2925_s25 + $0x1d4] sm:$0xf] %vm1885_vm2, %v2455_v23  ;;  %v1095_v25 = vadd.f32 %v2591_v24, %v2917_v2  ;;  %v2655_v26 = vpop.f32.mrb[56].mxu1  ;;  %v1086_v27 = vpop.f32.mrb[57].mxu0 }
 0x157   : > { %v1351_v28 = vadd.f32 %v2655_v26, %v2917_v2  ;;  %v1087_v29 = vadd.f32 %v2917_v2, %v1086_v27  ;;  %v1342_v30 = vpop.f32.mrb[57].mxu1  ;;  %v2592_v31 = vpop.f32.mrb[58].mxu0 }
 0x158   : > { %v2396_v32 = vpack.c.bf16 %v1095_v25, %v1095_v25  ;;  %v1343_v33 = vadd.f32 %v2917_v2, %v1342_v30  ;;  %v1098_v34 = vadd.f32 %v2592_v31, %v2917_v2  ;;  %v2656_v35 = vpop.f32.mrb[58].mxu1  ;;  %v1089_v36 = vpop.f32.mrb[59].mxu0 }
 0x159   : > { %v2460_v37 = vpack.c.bf16 %v1351_v28, %v1351_v28  ;;  %v2394_v38 = vpack.c.bf16 %v1087_v29, %v1087_v29  ;;  %v1354_v39 = vadd.f32 %v2656_v35, %v2917_v2  ;;  %v1090_v40 = vadd.f32 %v2917_v2, %v1089_v36  ;;  %v1345_v41 = vpop.f32.mrb[59].mxu1 }
 0x15a   : > { %1944 = vst.msk [vmem:[%s2925_s25 + $0xe8] sm:$0xf] %vm1885_vm2, %v2396_v32  ;;  %v2458_v42 = vpack.c.bf16 %v1343_v33, %v1343_v33  ;;  %v2397_v43 = vpack.c.bf16 %v1098_v34, %v1098_v34  ;;  %v1346_v44 = vadd.f32 %v2917_v2, %v1345_v41 }
 0x15b   : > { %2008 = vst.msk [vmem:[%s2925_s25 + $0x1e8] sm:$0xf] %vm1885_vm2, %v2460_v37  ;;  %1942 = vst.msk [vmem:[%s2925_s25 + $0xe0] sm:$0xf] %vm1885_vm2, %v2394_v38  ;;  %v2461_v45 = vpack.c.bf16 %v1354_v39, %v1354_v39  ;;  %v2395_v46 = vpack.c.bf16 %v1090_v40, %v1090_v40 }
 0x15c   : > { %2006 = vst.msk [vmem:[%s2925_s25 + $0x1e0] sm:$0xf] %vm1885_vm2, %v2458_v42  ;;  %1945 = vst.msk [vmem:[%s2925_s25 + $0xec] sm:$0xf] %vm1885_vm2, %v2397_v43  ;;  %v2459_v47 = vpack.c.bf16 %v1346_v44, %v1346_v44 }
 0x15d   : > { %2009 = vst.msk [vmem:[%s2925_s25 + $0x1ec] sm:$0xf] %vm1885_vm2, %v2461_v45  ;;  %1943 = vst.msk [vmem:[%s2925_s25 + $0xe4] sm:$0xf] %vm1885_vm2, %v2395_v46  ;;  %v2595_v48 = vpop.f32.mrb[60].mxu0 }
 0x15e   : > { %2007 = vst.msk [vmem:[%s2925_s25 + $0x1e4] sm:$0xf] %vm1885_vm2, %v2459_v47  ;;  %v1111_v49 = vadd.f32 %v2595_v48, %v2917_v2  ;;  %v2659_v50 = vpop.f32.mrb[60].mxu1  ;;  %v1102_v51 = vpop.f32.mrb[61].mxu0 }
 0x15f   : > { %v1367_v52 = vadd.f32 %v2659_v50, %v2917_v2  ;;  %v1103_v53 = vadd.f32 %v2917_v2, %v1102_v51  ;;  %v1358_v54 = vpop.f32.mrb[61].mxu1  ;;  %v2596_v55 = vpop.f32.mrb[62].mxu0 }
 0x160   : > { %v2400_v56 = vpack.c.bf16 %v1111_v49, %v1111_v49  ;;  %v1359_v57 = vadd.f32 %v2917_v2, %v1358_v54  ;;  %v1114_v58 = vadd.f32 %v2596_v55, %v2917_v2  ;;  %v2660_v59 = vpop.f32.mrb[62].mxu1  ;;  %v1105_v60 = vpop.f32.mrb[63].mxu0 }
 0x161   : > { %v2464_v61 = vpack.c.bf16 %v1367_v52, %v1367_v52  ;;  %v2398_v62 = vpack.c.bf16 %v1103_v53, %v1103_v53  ;;  %v1370_v63 = vadd.f32 %v2660_v59, %v2917_v2  ;;  %v1106_v0 = vadd.f32 %v2917_v2, %v1105_v60  ;;  %v1361_v1 = vpop.f32.mrb[63].mxu1 }
 0x162   : > { %1948 = vst.msk [vmem:[%s2925_s25 + $0xf8] sm:$0xf] %vm1885_vm2, %v2400_v56  ;;  %v2462_v3 = vpack.c.bf16 %v1359_v57, %v1359_v57  ;;  %v2401_v4 = vpack.c.bf16 %v1114_v58, %v1114_v58  ;;  %v1362_v5 = vadd.f32 %v2917_v2, %v1361_v1 }
 0x163   : > { %2012 = vst.msk [vmem:[%s2925_s25 + $0x1f8] sm:$0xf] %vm1885_vm2, %v2464_v61  ;;  %1946 = vst.msk [vmem:[%s2925_s25 + $0xf0] sm:$0xf] %vm1885_vm2, %v2398_v62  ;;  %v2465_v6 = vpack.c.bf16 %v1370_v63, %v1370_v63  ;;  %v2399_v7 = vpack.c.bf16 %v1106_v0, %v1106_v0 }
 0x164   : > { %2010 = vst.msk [vmem:[%s2925_s25 + $0x1f0] sm:$0xf] %vm1885_vm2, %v2462_v3  ;;  %1949 = vst.msk [vmem:[%s2925_s25 + $0xfc] sm:$0xf] %vm1885_vm2, %v2401_v4  ;;  %v2463_v8 = vpack.c.bf16 %v1362_v5, %v1362_v5 }
 0x165   : > { %2013 = vst.msk [vmem:[%s2925_s25 + $0x1fc] sm:$0xf] %vm1885_vm2, %v2465_v6  ;;  %1947 = vst.msk [vmem:[%s2925_s25 + $0xf4] sm:$0xf] %vm1885_vm2, %v2399_v7 }
 0x166   : > { %2011 = vst.msk [vmem:[%s2925_s25 + $0x1f4] sm:$0xf] %vm1885_vm2, %v2463_v8 }
 0x167 PF: > { %s13_s12 = sadd.s32 1, %s2743_s12  }
 0x168   : > { %p10_p4 = scmp.ge.s32.totalorder %s13_s12, 6  }
 0x16a   :  { %12 = sbr.rel (!%p10_p4) target bundleno = 1 (0x1), region = 62 }

// kernel: tile.39
= control target key start
LH: loop header
LB: loop body
LE: loop exit
PB: predicated region body
PF: predicated region fallthrough
CT: control target
= control target key end

     0   :  { %s67_s10 = smov 28   ;;  %s68_s11 = smov 20   ;;  %vm3_vm0 = vcmask 31744   ;;  %vm9_vm1 = vcmask 261344   ;;  %vm15_vm2 = vcmask 228544   ;;  %vm21_vm3 = vcmask 195744   ;;  %s111_s0 = inlined_call_operand.vmem [shape: f32[8,4], index: 0, kind: input, shape index: {}]   ;;  %s112_s1 = inlined_call_operand.vmem [shape: f32[1,32], index: 1, kind: output, shape index: {}]  }
   0x1   :  { %v53_v0 = vld [vmem:[%s111_s0 + $0x7] sm:$0x1]   ;;  %v55_v1 = vld [vmem:[%s111_s0 + $0x5] sm:$0x1]   ;;  %v54_v2 = vld [vmem:[%s111_s0 + $0x6] sm:$0x1]  }
   0x2   :  { %7 = vrot.lane.b32.xlu0 %v53_v0, %s67_s10  ;;  %19 = vrot.lane.b32.xlu1 %v55_v1, %s68_s11  ;;  %v56_v3 = vld [vmem:[%s111_s0 + $0x4] sm:$0x1]   ;;  %v2_v4 = vld [vmem:[%s111_s0] sm:$0x1]   ;;  %s69_s18 = smov 24   ;;  %s70_s19 = smov 16  }
   0x3   :  { %4 = vst.msk [vmem:[#allocation0] sm:$0x1] %vm3_vm0, %v2_v4   ;;  %v57_v5 = vld [vmem:[%s111_s0 + $0x3] sm:$0x1]   ;;  %v58_v6 = vld [vmem:[%s111_s0 + $0x2] sm:$0x1]  }
   0x4   :  { %s71_s24 = smov 12   ;;  %s72_s25 = smov 8   ;;  %v59_v7 = vld [vmem:[%s111_s0 + $0x1] sm:$0x1]   ;;  %vm27_vm4 = vcmask 162944   ;;  %vm33_vm5 = vcmask 130144  }
   0x5   :  { %s73_s0 = smov 4   ;;  %vm39_vm6 = vcmask 97344   ;;  %vm45_vm7 = vcmask 64544  }
   0x6   :  { %13 = vrot.lane.b32.xlu0 %v54_v2, %s69_s18  ;;  %25 = vrot.lane.b32.xlu1 %v56_v3, %s70_s19 }
   0xa   :  { %31 = vrot.lane.b32.xlu0 %v57_v5, %s71_s24  ;;  %37 = vrot.lane.b32.xlu1 %v58_v6, %s72_s25 }
   0xe   :  { %43 = vrot.lane.b32.xlu0 %v59_v7, %s73_s0 }
  0x74   :  { %v8_v8 = vpop.permute.xlu0 %7   ;;  %v20_v9 = vpop.permute.xlu1 %19  }
  0x75   :  { %10 = vst.msk [vmem:[#allocation0] sm:$0x1] %vm9_vm1, %v8_v8  }
  0x78   :  { %v14_v10 = vpop.permute.xlu0 %13   ;;  %v26_v11 = vpop.permute.xlu1 %25  }
  0x79   :  { %16 = vst.msk [vmem:[#allocation0] sm:$0x1] %vm15_vm2, %v14_v10  }
  0x7a   :  { %22 = vst.msk [vmem:[#allocation0] sm:$0x1] %vm21_vm3, %v20_v9  }
  0x7b   :  { %28 = vst.msk [vmem:[#allocation0] sm:$0x1] %vm27_vm4, %v26_v11  }
  0x7c   :  { %v32_v12 = vpop.permute.xlu0 %31   ;;  %v38_v13 = vpop.permute.xlu1 %37  }
  0x7d   :  { %34 = vst.msk [vmem:[#allocation0] sm:$0x1] %vm33_vm5, %v32_v12  }
  0x7e   :  { %40 = vst.msk [vmem:[#allocation0] sm:$0x1] %vm39_vm6, %v38_v13  }
  0x80   :  { %v44_v14 = vpop.permute.xlu0 %43  }
  0x81   :  { %46 = vst.msk [vmem:[#allocation0] sm:$0x1] %vm45_vm7, %v44_v14  }
  0x88   :  { %v50_v15 = vld [vmem:[#allocation0] sm:$0x1] }
  0x89   :  { %52 = vst [vmem:[%s112_s1] sm:$0x1] %v50_v15 }

// kernel: hourglass_forward.15
= control target key start
LH: loop header
LB: loop body
LE: loop exit
PB: predicated region body
PF: predicated region fallthrough
CT: control target
= control target key end

     0   :  { %s1072_s15 = smov 0   ;;  %s1267_s0 = inlined_call_operand.vmem [shape: bf16[512,64], index: 0, kind: input, shape index: {}]   ;;  %s1268_s1 = inlined_call_operand.vmem [shape: bf16[64,32], index: 1, kind: input, shape index: {}]   ;;  %s1269_s2 = inlined_call_operand.vmem [shape: f32[1,32], index: 2, kind: input, shape index: {}]   ;;  %s1270_s3 = inlined_call_operand.vmem [shape: bf16[512,32], index: 3, kind: input, shape index: {}]   ;;  %s1271_s4 = inlined_call_operand.vmem [shape: f32[512,32], index: 4, kind: output, shape index: {}]  }
   0x1 LB: > { %s814_s16 = sadd.s32 4294967295, %s1045_s15   ;;  %p818_p0 = scmp.ge.s32.totalorder %s1045_s15, 1  ;;  %s1045_s15 = sphi %s1072_s15, %s14_s15  }
   0x2   : > { %p174_p1 = scmp.lt.s32.totalorder %s1045_s15, 3 }
   0x4   : > { %p175_p2 = pnand %p818_p0, %p174_p1 }
   0x5   : > { %v1019_v0 = vld [vmem:[%s1268_s1] sm:$0xff] (!%p175_p2)   ;;  %s819_s19 = sshll.u32 (!%p175_p2), %s814_s16, 5  ;;  %v1020_v1 = vld [vmem:[%s1268_s1 + $0x8] sm:$0xff] (!%p175_p2)   ;;  %v1021_v2 = vld [vmem:[%s1268_s1 + $0x10] sm:$0xff] (!%p175_p2)   ;;  %vm375_vm0 = vcmask (!%p175_p2), 523264   ;;  %vm713_vm1 = vcmask (!%p175_p2), 261120  }
   0x6   : > { %178 = sbr.rel (%p175_p2) target bundleno = 268 (0x10c), region = 36  ;;  %p206_p3 = scmp.lt.s32.totalorder (!%p175_p2), %s819_s19, 63  ;;  %963 = vmatprep.subr.bf16.mxu0 (!%p175_p2), %v1019_v0  ;;  %1003 = vmatprep.subr.bf16.mxu1 (!%p175_p2), %v1019_v0  ;;  %v1022_v3 = vld [vmem:[%s1268_s1 + $0x18] sm:$0xff] (!%p175_p2)   ;;  %v1148_v24 = vld [vmem:[%s1269_s2] ss:$0 sm:$0xff] (!%p175_p2) }
   0x7   : > { %964 = vmatpush3.bf16.msra.mxu0 (!%p175_p2), %v1019_v0  ;;  %1007 = vmatpush3.bf16.msra.mxu1 (!%p175_p2), %v1019_v0 }
   0x8   : > { %965 = vmatprep.subr.bf16.mxu0 (!%p175_p2), %v1020_v1  ;;  %1004 = vmatprep.subr.bf16.mxu1 (!%p175_p2), %v1020_v1 }
   0xb   : > { %966 = vmatpush3.bf16.msra.mxu0 (!%p175_p2), %v1020_v1  ;;  %1008 = vmatpush3.bf16.msra.mxu1 (!%p175_p2), %v1020_v1 }
   0xc   : > { %967 = vmatprep.subr.bf16.mxu0 (!%p175_p2), %v1021_v2  ;;  %1005 = vmatprep.subr.bf16.mxu1 (!%p175_p2), %v1021_v2 }
   0xd   : > { %s1273_s19 = smov (!%p206_p3, %s819_s19), 63 }
   0xe   : > { %s820_s24 = sshll.u32 %s1273_s19, 2  ;;  %s824_s9 = sshll.u32 %s1273_s19, 3 }
   0xf   : > { %s1100_s29 = scalar_lea.vmem %s1267_s0, %s820_s24  ;;  %968 = vmatpush3.bf16.msra.mxu0 %v1021_v2  ;;  %1009 = vmatpush3.bf16.msra.mxu1 %v1021_v2  ;;  %s1139_s6 = scalar_lea.vmem %s1270_s3, %s820_s24 }
  0x10   : > { %v1023_v4 = vld [vmem:[%s1100_s29] sm:$0xff]   ;;  %969 = vmatprep.subr.bf16.mxu0 %v1022_v3  ;;  %1006 = vmatprep.subr.bf16.mxu1 %v1022_v3  ;;  %v1025_v6 = vld [vmem:[%s1100_s29 + $0x8] sm:$0xff]   ;;  %v1027_v8 = vld [vmem:[%s1100_s29 + $0x10] sm:$0xff]   ;;  %s1160_s12 = scalar_lea.vmem %s1271_s4, %s824_s9 }
  0x11   : > { %v1024_v5 = vld [vmem:[%s1100_s29 + $0x40] sm:$0xff]   ;;  %971 = vmatprep.mubr.msk.bf16.mxu0 %vm375_vm0, %v1023_v4  ;;  %v1026_v7 = vld [vmem:[%s1100_s29 + $0x48] sm:$0xff]   ;;  %v1028_v9 = vld [vmem:[%s1100_s29 + $0x50] sm:$0xff]  }
  0x12   : > { %987 = vmatprep.mubr.msk.bf16.mxu1 %vm375_vm0, %v1024_v5  ;;  %v1029_v10 = vld [vmem:[%s1100_s29 + $0x18] sm:$0xff]   ;;  %v1031_v12 = vld [vmem:[%s1100_s29 + $0x20] sm:$0xff]   ;;  %v1033_v14 = vld [vmem:[%s1100_s29 + $0x28] sm:$0xff]  }
  0x13   : > { %970 = vmatpush3.bf16.msra.mxu0 %v1022_v3  ;;  %1010 = vmatpush3.bf16.msra.mxu1 %v1022_v3  ;;  %v1030_v11 = vld [vmem:[%s1100_s29 + $0x58] sm:$0xff]   ;;  %v1032_v13 = vld [vmem:[%s1100_s29 + $0x60] sm:$0xff]   ;;  %v1034_v15 = vld [vmem:[%s1100_s29 + $0x68] sm:$0xff]  }
  0x14   : > { %v1035_v16 = vld [vmem:[%s1100_s29 + $0x30] sm:$0xff]   ;;  %v1037_v18 = vld [vmem:[%s1100_s29 + $0x38] sm:$0xff]   ;;  %v928_v20 = vld [vmem:[%s1139_s6 + $0x8] sm:$0xff]  }
  0x15   : > { %v1036_v17 = vld [vmem:[%s1100_s29 + $0x70] sm:$0xff]   ;;  %v1038_v19 = vld [vmem:[%s1100_s29 + $0x78] sm:$0xff]   ;;  %v936_v21 = vld [vmem:[%s1139_s6 + $0x48] sm:$0xff]   ;;  %v870_v25 = vunpack.c.l.bf16 %v928_v20  ;;  %v871_v31 = vunpack.c.h.bf16 %v928_v20 }
  0x16   : > { %972 = vmatmul.mubr.msk.bf16.vlgmr.msra.gmra.mrb[0].mxu0 %vm375_vm0, %v1025_v6  ;;  %988 = vmatmul.mubr.msk.bf16.vlgmr.msra.gmra.mrb[0].mxu1 %vm375_vm0, %v1026_v7  ;;  %v865_v22 = vld [vmem:[%s1139_s6] sm:$0xff]   ;;  %v902_v26 = vunpack.c.l.bf16 %v936_v21  ;;  %v903_v36 = vunpack.c.h.bf16 %v936_v21  ;;  %v930_v53 = vld [vmem:[%s1139_s6 + $0x18] sm:$0xff]   ;;  %v929_v59 = vld [vmem:[%s1139_s6 + $0x10] sm:$0xff]  }
  0x17   : > { %975 = vmatprep.mubr.msk.bf16.mxu0 %vm375_vm0, %v1027_v8  ;;  %991 = vmatprep.mubr.msk.bf16.mxu1 %vm375_vm0, %v1028_v9  ;;  %v935_v23 = vld [vmem:[%s1139_s6 + $0x40] sm:$0xff]   ;;  %v866_v29 = vunpack.c.l.bf16 %v865_v22  ;;  %v867_v37 = vunpack.c.h.bf16 %v865_v22  ;;  %v938_v54 = vld [vmem:[%s1139_s6 + $0x58] sm:$0xff]   ;;  %v937_v60 = vld [vmem:[%s1139_s6 + $0x50] sm:$0xff]   ;;  %v878_v3 = vunpack.c.l.bf16 %v930_v53  ;;  %v874_v9 = vunpack.c.l.bf16 %v929_v59 }
  0x18   : > { %v898_v30 = vunpack.c.l.bf16 %v935_v23  ;;  %v899_v42 = vunpack.c.h.bf16 %v935_v23  ;;  %v910_v4 = vunpack.c.l.bf16 %v938_v54  ;;  %v875_v21 = vunpack.c.h.bf16 %v929_v59 }
  0x19   : > { %v907_v22 = vunpack.c.h.bf16 %v937_v60 }
  0x1e   : > { %976 = vmatmul.mubr.msk.bf16.gmra.mrb[4].mxu0 %vm375_vm0, %v1029_v10  ;;  %992 = vmatmul.mubr.msk.bf16.gmra.mrb[4].mxu1 %vm375_vm0, %v1030_v11  ;;  %v906_v10 = vunpack.c.l.bf16 %v937_v60 }
  0x1f   : > { %979 = vmatprep.mubr.msk.bf16.mxu0 %vm375_vm0, %v1031_v12  ;;  %995 = vmatprep.mubr.msk.bf16.mxu1 %vm375_vm0, %v1032_v13 }
  0x26   : > { %980 = vmatmul.mubr.msk.bf16.gmra.mrb[8].mxu0 %vm375_vm0, %v1033_v14  ;;  %996 = vmatmul.mubr.msk.bf16.gmra.mrb[8].mxu1 %vm375_vm0, %v1034_v15  ;;  %v879_v15 = vunpack.c.h.bf16 %v930_v53 }
  0x27   : > { %983 = vmatprep.mubr.msk.bf16.mxu0 %vm375_vm0, %v1035_v16  ;;  %999 = vmatprep.mubr.msk.bf16.mxu1 %vm375_vm0, %v1036_v17  ;;  %v911_v16 = vunpack.c.h.bf16 %v938_v54 }
  0x2e   : > { %984 = vmatmul.mubr.msk.bf16.gmra.mrb[12].mxu0 %vm375_vm0, %v1037_v18  ;;  %1000 = vmatmul.mubr.msk.bf16.gmra.mrb[12].mxu1 %vm375_vm0, %v1038_v19 }
  0xe9   : > { %v973_v27 = vpop.f32.mrb[0].mxu0  ;;  %v989_v28 = vpop.f32.mrb[0].mxu1 }
  0xea   : > { %v467_v32 = vadd.f32 %v973_v27, %v1148_v24  ;;  %v531_v33 = vadd.f32 %v989_v28, %v1148_v24  ;;  %v458_v34 = vpop.f32.mrb[1].mxu0  ;;  %v522_v35 = vpop.f32.mrb[1].mxu1 }
  0xeb   : > { %v459_v38 = vadd.f32 %v1148_v24, %v458_v34  ;;  %v523_v39 = vadd.f32 %v1148_v24, %v522_v35  ;;  %v974_v40 = vpop.f32.mrb[2].mxu0  ;;  %v990_v41 = vpop.f32.mrb[2].mxu1  ;;  %v932_v34 = vld [vmem:[%s1139_s6 + $0x28] sm:$0xff]  }
  0xec   : > { %v651_v43 = vadd.f32 %v870_v25, %v467_v32  ;;  %v667_v44 = vadd.f32 %v902_v26, %v531_v33  ;;  %v470_v45 = vadd.f32 %v974_v40, %v1148_v24  ;;  %v534_v46 = vadd.f32 %v990_v41, %v1148_v24  ;;  %v461_v47 = vpop.f32.mrb[3].mxu0  ;;  %v525_v48 = vpop.f32.mrb[3].mxu1  ;;  %v940_v35 = vld [vmem:[%s1139_s6 + $0x68] sm:$0xff]   ;;  %v931_v40 = vld [vmem:[%s1139_s6 + $0x20] sm:$0xff]  }
  0xed   : > { %v649_v49 = vadd.f32 %v866_v29, %v459_v38  ;;  %v665_v50 = vadd.f32 %v898_v30, %v523_v39  ;;  %v462_v51 = vadd.f32 %v1148_v24, %v461_v47  ;;  %v526_v52 = vadd.f32 %v1148_v24, %v525_v48  ;;  %v939_v41 = vld [vmem:[%s1139_s6 + $0x60] sm:$0xff]  }
  0xee   : > { %v683_v55 = vmax.f32 %v651_v43, 0.0  ;;  %v699_v56 = vmax.f32 %v667_v44, 0.0  ;;  %v652_v57 = vadd.f32 %v871_v31, %v470_v45  ;;  %v668_v58 = vadd.f32 %v903_v36, %v534_v46 }
  0xef   : > { %v681_v61 = vmax.f32 %v649_v49, 0.0  ;;  %v697_v62 = vmax.f32 %v665_v50, 0.0  ;;  %v650_v63 = vadd.f32 %v867_v37, %v462_v51  ;;  %v666_v0 = vadd.f32 %v899_v42, %v526_v52 }
  0xf0   : > { %716 = vst.msk [vmem:[%s1160_s12 + $0x10] sm:$0xff] %vm713_vm1, %v683_v55  ;;  %732 = vst.msk [vmem:[%s1160_s12 + $0x90] sm:$0xff] %vm713_vm1, %v699_v56  ;;  %v684_v1 = vmax.f32 %v652_v57, 0.0  ;;  %v700_v2 = vmax.f32 %v668_v58, 0.0  ;;  %v886_v48 = vunpack.c.l.bf16 %v932_v34  ;;  %v918_v49 = vunpack.c.l.bf16 %v940_v35 }
  0xf1   : > { %714 = vst.msk [vmem:[%s1160_s12] sm:$0xff] %vm713_vm1, %v681_v61  ;;  %730 = vst.msk [vmem:[%s1160_s12 + $0x80] sm:$0xff] %vm713_vm1, %v697_v62  ;;  %v682_v5 = vmax.f32 %v650_v63, 0.0  ;;  %v698_v6 = vmax.f32 %v666_v0, 0.0  ;;  %v977_v7 = vpop.f32.mrb[4].mxu0  ;;  %v993_v8 = vpop.f32.mrb[4].mxu1  ;;  %v882_v54 = vunpack.c.l.bf16 %v931_v40  ;;  %v914_v55 = vunpack.c.l.bf16 %v939_v41 }
  0xf2   : > { %717 = vst.msk [vmem:[%s1160_s12 + $0x18] sm:$0xff] %vm713_vm1, %v684_v1  ;;  %733 = vst.msk [vmem:[%s1160_s12 + $0x98] sm:$0xff] %vm713_vm1, %v700_v2  ;;  %v483_v11 = vadd.f32 %v977_v7, %v1148_v24  ;;  %v547_v12 = vadd.f32 %v993_v8, %v1148_v24  ;;  %v474_v13 = vpop.f32.mrb[5].mxu0  ;;  %v538_v14 = vpop.f32.mrb[5].mxu1  ;;  %v887_v60 = vunpack.c.h.bf16 %v932_v34  ;;  %v919_v61 = vunpack.c.h.bf16 %v940_v35 }
  0xf3   : > { %715 = vst.msk [vmem:[%s1160_s12 + $0x8] sm:$0xff] %vm713_vm1, %v682_v5  ;;  %731 = vst.msk [vmem:[%s1160_s12 + $0x88] sm:$0xff] %vm713_vm1, %v698_v6  ;;  %v475_v17 = vadd.f32 %v1148_v24, %v474_v13  ;;  %v539_v18 = vadd.f32 %v1148_v24, %v538_v14  ;;  %v978_v19 = vpop.f32.mrb[6].mxu0  ;;  %v994_v20 = vpop.f32.mrb[6].mxu1  ;;  %v883_v2 = vunpack.c.h.bf16 %v931_v40  ;;  %v934_v14 = vld [vmem:[%s1139_s6 + $0x38] sm:$0xff]  }
  0xf4   : > { %v655_v23 = vadd.f32 %v878_v3, %v483_v11  ;;  %v671_v25 = vadd.f32 %v910_v4, %v547_v12  ;;  %v486_v26 = vadd.f32 %v978_v19, %v1148_v24  ;;  %v550_v27 = vadd.f32 %v994_v20, %v1148_v24  ;;  %v477_v28 = vpop.f32.mrb[7].mxu0  ;;  %v541_v29 = vpop.f32.mrb[7].mxu1  ;;  %v933_v20 = vld [vmem:[%s1139_s6 + $0x30] sm:$0xff]  }
  0xf5   : > { %v653_v30 = vadd.f32 %v874_v9, %v475_v17  ;;  %v669_v31 = vadd.f32 %v906_v10, %v539_v18  ;;  %v478_v32 = vadd.f32 %v1148_v24, %v477_v28  ;;  %v542_v33 = vadd.f32 %v1148_v24, %v541_v29 }
  0xf6   : > { %v687_v36 = vmax.f32 %v655_v23, 0.0  ;;  %v703_v37 = vmax.f32 %v671_v25, 0.0  ;;  %v656_v38 = vadd.f32 %v879_v15, %v486_v26  ;;  %v672_v39 = vadd.f32 %v911_v16, %v550_v27  ;;  %v942_v15 = vld [vmem:[%s1139_s6 + $0x78] sm:$0xff]  }
  0xf7   : > { %v685_v42 = vmax.f32 %v653_v30, 0.0  ;;  %v701_v43 = vmax.f32 %v669_v31, 0.0  ;;  %v654_v44 = vadd.f32 %v875_v21, %v478_v32  ;;  %v670_v45 = vadd.f32 %v907_v22, %v542_v33  ;;  %v941_v21 = vld [vmem:[%s1139_s6 + $0x70] sm:$0xff]  }
  0xf8   : > { %720 = vst.msk [vmem:[%s1160_s12 + $0x30] sm:$0xff] %vm713_vm1, %v687_v36  ;;  %736 = vst.msk [vmem:[%s1160_s12 + $0xb0] sm:$0xff] %vm713_vm1, %v703_v37  ;;  %v688_v46 = vmax.f32 %v656_v38, 0.0  ;;  %v704_v47 = vmax.f32 %v672_v39, 0.0  ;;  %v915_v3 = vunpack.c.h.bf16 %v939_v41  ;;  %v894_v29 = vunpack.c.l.bf16 %v934_v14 }
  0xf9   : > { %718 = vst.msk [vmem:[%s1160_s12 + $0x20] sm:$0xff] %vm713_vm1, %v685_v42  ;;  %734 = vst.msk [vmem:[%s1160_s12 + $0xa0] sm:$0xff] %vm713_vm1, %v701_v43  ;;  %v686_v50 = vmax.f32 %v654_v44, 0.0  ;;  %v702_v51 = vmax.f32 %v670_v45, 0.0  ;;  %v981_v52 = vpop.f32.mrb[8].mxu0  ;;  %v997_v53 = vpop.f32.mrb[8].mxu1  ;;  %v926_v30 = vunpack.c.l.bf16 %v942_v15  ;;  %v890_v35 = vunpack.c.l.bf16 %v933_v20 }
  0xfa   : > { %721 = vst.msk [vmem:[%s1160_s12 + $0x38] sm:$0xff] %vm713_vm1, %v688_v46  ;;  %737 = vst.msk [vmem:[%s1160_s12 + $0xb8] sm:$0xff] %vm713_vm1, %v704_v47  ;;  %v499_v56 = vadd.f32 %v981_v52, %v1148_v24  ;;  %v563_v57 = vadd.f32 %v997_v53, %v1148_v24  ;;  %v490_v58 = vpop.f32.mrb[9].mxu0  ;;  %v554_v59 = vpop.f32.mrb[9].mxu1  ;;  %v922_v36 = vunpack.c.l.bf16 %v941_v21  ;;  %v895_v41 = vunpack.c.h.bf16 %v934_v14 }
  0xfb   : > { %719 = vst.msk [vmem:[%s1160_s12 + $0x28] sm:$0xff] %vm713_vm1, %v686_v50  ;;  %735 = vst.msk [vmem:[%s1160_s12 + $0xa8] sm:$0xff] %vm713_vm1, %v702_v51  ;;  %v491_v62 = vadd.f32 %v1148_v24, %v490_v58  ;;  %v555_v63 = vadd.f32 %v1148_v24, %v554_v59  ;;  %v982_v0 = vpop.f32.mrb[10].mxu0  ;;  %v998_v1 = vpop.f32.mrb[10].mxu1  ;;  %v927_v42 = vunpack.c.h.bf16 %v942_v15  ;;  %v891_v47 = vunpack.c.h.bf16 %v933_v20 }
  0xfc   : > { %v659_v4 = vadd.f32 %v886_v48, %v499_v56  ;;  %v675_v5 = vadd.f32 %v918_v49, %v563_v57  ;;  %v502_v6 = vadd.f32 %v982_v0, %v1148_v24  ;;  %v566_v7 = vadd.f32 %v998_v1, %v1148_v24  ;;  %v493_v8 = vpop.f32.mrb[11].mxu0  ;;  %v557_v9 = vpop.f32.mrb[11].mxu1 }
  0xfd   : > { %v657_v10 = vadd.f32 %v882_v54, %v491_v62  ;;  %v673_v11 = vadd.f32 %v914_v55, %v555_v63  ;;  %v494_v12 = vadd.f32 %v1148_v24, %v493_v8  ;;  %v558_v13 = vadd.f32 %v1148_v24, %v557_v9 }
  0xfe   : > { %v691_v16 = vmax.f32 %v659_v4, 0.0  ;;  %v707_v17 = vmax.f32 %v675_v5, 0.0  ;;  %v660_v18 = vadd.f32 %v887_v60, %v502_v6  ;;  %v676_v19 = vadd.f32 %v919_v61, %v566_v7 }
  0xff   : > { %v689_v22 = vmax.f32 %v657_v10, 0.0  ;;  %v705_v23 = vmax.f32 %v673_v11, 0.0  ;;  %v658_v25 = vadd.f32 %v883_v2, %v494_v12  ;;  %v674_v26 = vadd.f32 %v915_v3, %v558_v13 }
 0x100   : > { %724 = vst.msk [vmem:[%s1160_s12 + $0x50] sm:$0xff] %vm713_vm1, %v691_v16  ;;  %740 = vst.msk [vmem:[%s1160_s12 + $0xd0] sm:$0xff] %vm713_vm1, %v707_v17  ;;  %v692_v27 = vmax.f32 %v660_v18, 0.0  ;;  %v708_v28 = vmax.f32 %v676_v19, 0.0  ;;  %v923_v48 = vunpack.c.h.bf16 %v941_v21 }
 0x101   : > { %722 = vst.msk [vmem:[%s1160_s12 + $0x40] sm:$0xff] %vm713_vm1, %v689_v22  ;;  %738 = vst.msk [vmem:[%s1160_s12 + $0xc0] sm:$0xff] %vm713_vm1, %v705_v23  ;;  %v690_v31 = vmax.f32 %v658_v25, 0.0  ;;  %v706_v32 = vmax.f32 %v674_v26, 0.0  ;;  %v985_v33 = vpop.f32.mrb[12].mxu0  ;;  %v1001_v34 = vpop.f32.mrb[12].mxu1 }
 0x102   : > { %725 = vst.msk [vmem:[%s1160_s12 + $0x58] sm:$0xff] %vm713_vm1, %v692_v27  ;;  %741 = vst.msk [vmem:[%s1160_s12 + $0xd8] sm:$0xff] %vm713_vm1, %v708_v28  ;;  %v515_v37 = vadd.f32 %v985_v33, %v1148_v24  ;;  %v579_v38 = vadd.f32 %v1001_v34, %v1148_v24  ;;  %v506_v39 = vpop.f32.mrb[13].mxu0  ;;  %v570_v40 = vpop.f32.mrb[13].mxu1 }
 0x103   : > { %723 = vst.msk [vmem:[%s1160_s12 + $0x48] sm:$0xff] %vm713_vm1, %v690_v31  ;;  %739 = vst.msk [vmem:[%s1160_s12 + $0xc8] sm:$0xff] %vm713_vm1, %v706_v32  ;;  %v507_v43 = vadd.f32 %v1148_v24, %v506_v39  ;;  %v571_v44 = vadd.f32 %v1148_v24, %v570_v40  ;;  %v986_v45 = vpop.f32.mrb[14].mxu0  ;;  %v1002_v46 = vpop.f32.mrb[14].mxu1 }
 0x104   : > { %v663_v49 = vadd.f32 %v894_v29, %v515_v37  ;;  %v679_v50 = vadd.f32 %v926_v30, %v579_v38  ;;  %v518_v51 = vadd.f32 %v986_v45, %v1148_v24  ;;  %v582_v52 = vadd.f32 %v1002_v46, %v1148_v24  ;;  %v509_v53 = vpop.f32.mrb[15].mxu0  ;;  %v573_v54 = vpop.f32.mrb[15].mxu1 }
 0x105   : > { %v661_v55 = vadd.f32 %v890_v35, %v507_v43  ;;  %v677_v56 = vadd.f32 %v922_v36, %v571_v44  ;;  %v510_v57 = vadd.f32 %v1148_v24, %v509_v53  ;;  %v574_v58 = vadd.f32 %v1148_v24, %v573_v54 }
 0x106   : > { %v695_v59 = vmax.f32 %v663_v49, 0.0  ;;  %v711_v60 = vmax.f32 %v679_v50, 0.0  ;;  %v664_v61 = vadd.f32 %v895_v41, %v518_v51  ;;  %v680_v62 = vadd.f32 %v927_v42, %v582_v52 }
 0x107   : > { %v693_v63 = vmax.f32 %v661_v55, 0.0  ;;  %v709_v0 = vmax.f32 %v677_v56, 0.0  ;;  %v662_v1 = vadd.f32 %v891_v47, %v510_v57  ;;  %v678_v2 = vadd.f32 %v923_v48, %v574_v58 }
 0x108   : > { %728 = vst.msk [vmem:[%s1160_s12 + $0x70] sm:$0xff] %vm713_vm1, %v695_v59  ;;  %744 = vst.msk [vmem:[%s1160_s12 + $0xf0] sm:$0xff] %vm713_vm1, %v711_v60  ;;  %v696_v3 = vmax.f32 %v664_v61, 0.0  ;;  %v712_v4 = vmax.f32 %v680_v62, 0.0 }
 0x109   : > { %726 = vst.msk [vmem:[%s1160_s12 + $0x60] sm:$0xff] %vm713_vm1, %v693_v63  ;;  %742 = vst.msk [vmem:[%s1160_s12 + $0xe0] sm:$0xff] %vm713_vm1, %v709_v0  ;;  %v694_v24 = vmax.f32 %v662_v1, 0.0  ;;  %v710_v5 = vmax.f32 %v678_v2, 0.0 }
 0x10a   : > { %729 = vst.msk [vmem:[%s1160_s12 + $0x78] sm:$0xff] %vm713_vm1, %v696_v3  ;;  %745 = vst.msk [vmem:[%s1160_s12 + $0xf8] sm:$0xff] %vm713_vm1, %v712_v4 }
 0x10b   : > { %727 = vst.msk [vmem:[%s1160_s12 + $0x68] sm:$0xff] %vm713_vm1, %v694_v24  ;;  %743 = vst.msk [vmem:[%s1160_s12 + $0xe8] sm:$0xff] %vm713_vm1, %v710_v5 }
 0x10c PF: > { %s14_s15 = sadd.s32 1, %s1045_s15  }
 0x10d   : > { %p11_p4 = scmp.ge.s32.totalorder %s14_s15, 4  }
 0x10f   :  { %13 = sbr.rel (!%p11_p4) target bundleno = 1 (0x1), region = 69 }

</bundles_post_ra>
